<compile_context>
chip_gen: v7x
topology: tpu7x:2x2x1
jax: 0.10.0
libtpu: 0.0.40
codegen_flags: <defaults>
</compile_context>

<pallas_src>
import functools

import jax
import jax.numpy as jnp
from jax import lax
from jax.experimental import pallas as pl
from jax.experimental.pallas import tpu as pltpu


# --------------------------------------------------------------------------
# Pallas kernel: one block of BW windows of multi-head window attention.
# --------------------------------------------------------------------------
def window_attn_kernel(x_ref, wqkv_ref, bqkv_ref, wproj_ref, bproj_ref, bm_ref,
                       o_ref, qkv_acc, out_acc, *, num_heads, heads_per_group,
                       n_win):
    BW, N, C = x_ref.shape
    hd = C // num_heads
    G = heads_per_group
    Gh = G * hd
    num_groups = num_heads // G
    nW = n_win
    cdt = x_ref.dtype                       # MXU input dtype (bf16)

    # ---- fused QKV projection; stage immediately as bf16 in VMEM ----------
    x2d = x_ref[...].reshape(BW * N, C)                                   # (BW*N, C)
    qkv = jnp.dot(x2d, wqkv_ref[...],
                  preferred_element_type=jnp.float32) + bqkv_ref[0]       # f32
    qkv_acc[...] = qkv.astype(cdt)                                        # bf16 scratch

    # ---- attention over one lane-width group of heads ----------------------
    def attend_group(g):
        if isinstance(g, int):                       # static (single-group) path
            col, hrow = g * Gh, g * G
        else:                                        # fori_loop path
            col = pl.multiple_of(g * Gh, Gh)
            hrow = pl.multiple_of(g * G, G)

        q_g = qkv_acc[:, pl.ds(col, Gh)]                         # (BW*N, Gh) bf16
        k_g = qkv_acc[:, pl.ds(C + col, Gh)]
        v_g = qkv_acc[:, pl.ds(2 * C + col, Gh)]
        bm_g = bm_ref[pl.ds(hrow, G)]                            # (G, nW, N, N) f32

        outs = []
        for i in range(G):
            qh = q_g[:, i * hd:(i + 1) * hd].reshape(BW, N, hd)
            kh = k_g[:, i * hd:(i + 1) * hd].reshape(BW, N, hd)
            vh = v_g[:, i * hd:(i + 1) * hd].reshape(BW, N, hd)

            # scaled scores (scale folded into Q weights) + combined bias/mask
            s = jnp.einsum("bqd,bkd->bqk", qh, kh,
                           preferred_element_type=jnp.float32)   # (BW, N, N) f32
            if nW == 1:
                s = s + bm_g[i, 0]
            else:
                s = (s.reshape(BW // nW, nW, N, N) + bm_g[i][None]
                     ).reshape(BW, N, N)

            # softmax in f32; normalize AFTER the PV matmul (hd-wide multiply
            # instead of N-wide), reciprocal on the EUP slot.
            s = s - jnp.max(s, axis=-1, keepdims=True)
            p = jnp.exp(s)
            denom = jnp.sum(p, axis=-1, keepdims=True)           # (BW, N, 1)
            oh = jnp.einsum("bqk,bkd->bqd", p.astype(cdt), vh,
                            preferred_element_type=jnp.float32)  # (BW, N, hd) f32
            oh = oh * pl.reciprocal(denom, approx=True)
            outs.append(oh.astype(cdt))

        grp = outs[0] if G == 1 else jnp.concatenate(outs, axis=-1)  # (BW, N, Gh)
        out_acc[:, pl.ds(col, Gh)] = grp.reshape(BW * N, Gh)         # one wide store

    if num_groups == 1:
        attend_group(0)
    else:
        def body(g, carry):
            attend_group(g)
            return carry
        lax.fori_loop(0, num_groups, body, 0)

    # ---- output projection --------------------------------------------------
    o = jnp.dot(out_acc[...], wproj_ref[...],
                preferred_element_type=jnp.float32) + bproj_ref[0]    # (BW*N, C)
    o_ref[...] = o.reshape(o_ref.shape).astype(o_ref.dtype)


# --------------------------------------------------------------------------
# Relative position index / bias helpers (parameter-setup glue, plain JAX).
# --------------------------------------------------------------------------
def relative_position_index(window_size):
    Wh, Ww = window_size
    coords_h = jnp.arange(Wh)
    coords_w = jnp.arange(Ww)
    coords = jnp.stack(jnp.meshgrid(coords_h, coords_w, indexing="ij"))   # (2,Wh,Ww)
    coords_flatten = coords.reshape(2, -1)                                # (2, N)
    rel = coords_flatten[:, :, None] - coords_flatten[:, None, :]         # (2, N, N)
    rel = rel.transpose(1, 2, 0)                                          # (N, N, 2)
    rel = rel.at[:, :, 0].add(Wh - 1)
    rel = rel.at[:, :, 1].add(Ww - 1)
    rel = rel.at[:, :, 0].multiply(2 * Ww - 1)
    return rel.sum(-1)                                                    # (N, N)


def gather_relative_bias(table, rpi, num_heads):
    N = rpi.shape[0]
    bias = table[rpi.reshape(-1)].reshape(N, N, num_heads)                # (N, N, H)
    return bias.transpose(2, 0, 1)                                        # (H, N, N)


# --------------------------------------------------------------------------
# Sizing helpers (VMEM-aware block choice, head grouping).
# --------------------------------------------------------------------------
def _vmem_bytes(BW, N, C, H, nW, in_bytes=2, out_bytes=4):
    """Approximate per-step resident VMEM for the kernel's buffers."""
    rows = BW * N
    x_io = 2 * rows * C * in_bytes                 # x block, double-buffered
    o_io = 2 * rows * C * out_bytes                # output block, double-buffered
    weights = (3 * C * C + C * C) * in_bytes + 4 * C * 4   # single-buffered
    bm = H * nW * N * N * 4
    scratch = rows * 3 * C * in_bytes + rows * C * in_bytes
    return x_io + o_io + weights + bm + scratch


def _vmem_capacity_bytes():
    try:
        return int(pltpu.get_tpu_info().vmem_capacity_bytes)
    except Exception:
        return 64 << 20   # assume the tighter v7x per-TC budget


def _choose_block_windows(B_, N, C, H, nW, target_rows=512, vmem_budget=None):
    """Windows per grid step: multiple of nW, divides B_, fits the VMEM budget,
    and (for v7x's two TensorCores) keeps at least 2 grid steps if possible."""
    if vmem_budget is None:
        vmem_budget = min(48 << 20, int(_vmem_capacity_bytes() * 0.6))
    valid = [bw for bw in range(nW, B_ + 1, nW) if B_ % bw == 0]
    fits = [bw for bw in valid if _vmem_bytes(bw, N, C, H, nW) <= vmem_budget]
    if not fits:
        fits = [min(valid)]
    good = [bw for bw in fits if bw * N >= target_rows]
    bw = min(good) if good else max(fits)
    while ((B_ // bw) < 2 and bw > nW and bw % 2 == 0
           and (bw // 2) % nW == 0 and B_ % (bw // 2) == 0):
        bw //= 2
    return bw


def _heads_per_group(num_heads, head_dim, lane=128):
    """Largest divisor of num_heads with group width <= 128 lanes."""
    g = min(num_heads, max(1, lane // max(1, head_dim)))
    while num_heads % g != 0:
        g -= 1
    return max(1, g)


# --------------------------------------------------------------------------
# Wrapper: parameter prep, BlockSpecs / grid, pallas_call.
# --------------------------------------------------------------------------
def window_attention(x, params, window_size, num_heads, mask=None,
                     compute_dtype=jnp.bfloat16, block_windows=None):
    B_, N, C = x.shape
    assert N == window_size[0] * window_size[1]
    assert C % num_heads == 0
    head_dim = C // num_heads
    assert num_heads * head_dim == C   # out_acc columns must cover C exactly
    scale = head_dim ** (-0.5)
    out_dtype = x.dtype

    nW = 1 if mask is None else mask.shape[0]
    assert B_ % nW == 0
    BW = (block_windows if block_windows is not None
          else _choose_block_windows(B_, N, C, num_heads, nW))
    assert B_ % BW == 0 and BW % nW == 0

    # --- one-time parameter prep (wrapper side, free at kernel runtime) -----
    wqkv, bqkv = params["wqkv"], params["bqkv"]                  # (C,3C), (3C,)
    col_scale = jnp.concatenate(
        [jnp.full((C,), scale, jnp.float32), jnp.ones((2 * C,), jnp.float32)])
    wqkv_c = (wqkv * col_scale[None, :]).astype(compute_dtype)   # scale folded into Q
    bqkv_c = (bqkv * col_scale).reshape(1, 3 * C).astype(jnp.float32)
    wproj_c = params["wproj"].astype(compute_dtype)
    bproj_c = params["bproj"].reshape(1, C).astype(jnp.float32)

    # relative-position bias gathered once and combined with the shift-window
    # mask at (H, nW, N, N); broadcast per window inside the kernel (no tiling).
    rpi = relative_position_index(window_size)
    bias = gather_relative_bias(params["rpb_table"], rpi, num_heads)     # (H,N,N)
    if mask is None:
        bm = bias[:, None].astype(jnp.float32)                           # (H,1,N,N)
    else:
        bm = (bias[:, None] + mask.astype(jnp.float32)[None])            # (H,nW,N,N)
        bm = bm.astype(jnp.float32)

    G = _heads_per_group(num_heads, head_dim)
    rows = BW * N

    # 2-D (BW*N, C) output slab (store without a 3-D reshape) when 8-aligned.
    out_2d = (rows % 8 == 0)
    if out_2d:
        out_shape = jax.ShapeDtypeStruct((B_ * N, C), out_dtype)
    else:
        out_shape = jax.ShapeDtypeStruct((B_, N, C), out_dtype)

    # explicit scoped-VMEM budget from the actual buffer footprint
    vmem_need = _vmem_bytes(BW, N, C, num_heads, nW)
    cap = _vmem_capacity_bytes()
    vmem_limit = int(min(max(2 * vmem_need + (4 << 20), 16 << 20),
                         int(cap * 0.75)))

    kernel = functools.partial(window_attn_kernel, num_heads=num_heads,
                               heads_per_group=G, n_win=nW)

    def run(single_buffer_invariants):
        pmode = ({"pipeline_mode": pl.Buffered(1)}
                 if single_buffer_invariants else {})
        if out_2d:
            out_spec = pl.BlockSpec((rows, C), lambda b: (b, 0))
        else:
            out_spec = pl.BlockSpec((BW, N, C), lambda b: (b, 0, 0))
        grid_spec = pltpu.PrefetchScalarGridSpec(
            num_scalar_prefetch=0,
            grid=(B_ // BW,),
            in_specs=[
                pl.BlockSpec((BW, N, C), lambda b: (b, 0, 0)),            # x block
                pl.BlockSpec((C, 3 * C), lambda b: (0, 0), **pmode),      # wqkv
                pl.BlockSpec((1, 3 * C), lambda b: (0, 0), **pmode),      # bqkv
                pl.BlockSpec((C, C), lambda b: (0, 0), **pmode),          # wproj
                pl.BlockSpec((1, C), lambda b: (0, 0), **pmode),          # bproj
                pl.BlockSpec((num_heads, nW, N, N),
                             lambda b: (0, 0, 0, 0), **pmode),            # bias+mask
            ],
            out_specs=out_spec,
            scratch_shapes=[
                pltpu.VMEM((rows, 3 * C), compute_dtype),   # staged qkv (bf16)
                pltpu.VMEM((rows, C), compute_dtype),       # head-concat slab (bf16)
            ],
        )
        return pl.pallas_call(
            kernel,
            out_shape=out_shape,
            grid_spec=grid_spec,
            compiler_params=pltpu.CompilerParams(
                dimension_semantics=("parallel",),
                vmem_limit_bytes=vmem_limit),
        )(x.astype(compute_dtype), wqkv_c, bqkv_c, wproj_c, bproj_c, bm)

    try:
        out = run(True)
    except Exception:
        # TODO(synk): pipeline_mode=pl.Buffered(1) unsupported on this JAX
        # version; fall back to default double-buffering of the invariants.
        out = run(False)

    return out.reshape(B_, N, C)


# --------------------------------------------------------------------------
# Pure-JAX reference mirroring the PyTorch forward (for validation).
# --------------------------------------------------------------------------
def window_attention_ref(x, params, window_size, num_heads, mask=None):
    B_, N, C = x.shape
    head_dim = C // num_heads
    scale = head_dim ** (-0.5)

    qkv = x @ params["wqkv"] + params["bqkv"]                    # (B_, N, 3C)
    qkv = qkv.reshape(B_, N, 3, num_heads, head_dim).transpose(2, 0, 3, 1, 4)
    q, k, v = qkv[0], qkv[1], qkv[2]                             # (B_, H, N, hd)
    q = q * scale
    attn = jnp.einsum("bhnd,bhmd->bhnm", q, k)                   # (B_, H, N, N)

    rpi = relative_position_index(window_size)
    bias = gather_relative_bias(params["rpb_table"], rpi, num_heads)
    attn = attn + bias[None]

    if mask is not None:
        nW = mask.shape[0]
        attn = attn.reshape(B_ // nW, nW, num_heads, N, N) + mask[None, :, None]
        attn = attn.reshape(-1, num_heads, N, N)

    attn = jax.nn.softmax(attn, axis=-1)
    out = jnp.einsum("bhnm,bhmd->bhnd", attn, v)                 # (B_, H, N, hd)
    out = out.transpose(0, 2, 1, 3).reshape(B_, N, C)
    return out @ params["wproj"] + params["bproj"]


# --------------------------------------------------------------------------
# Main
# --------------------------------------------------------------------------
if __name__ == "__main__":
    dim = 32
    window_size = (4, 4)
    num_heads = 4
    N = window_size[0] * window_size[1]         # 16
    batch = 2
    num_windows = 4
    B_ = batch * num_windows                    # 8

    key = jax.random.PRNGKey(0)
    k_x, k_t, k_w1, k_b1, k_w2, k_b2 = jax.random.split(key, 6)

    x = jax.random.normal(k_x, (B_, N, dim), jnp.float32)

    params = {
        # TODO(synk): trunc_normal_(std=0.02) approximated by plain normal*0.02
        "rpb_table": 0.02 * jax.random.normal(
            k_t, ((2 * window_size[0] - 1) * (2 * window_size[1] - 1), num_heads),
            jnp.float32),
        "wqkv": 0.05 * jax.random.normal(k_w1, (dim, 3 * dim), jnp.float32),
        "bqkv": 0.05 * jax.random.normal(k_b1, (3 * dim,), jnp.float32),
        "wproj": 0.05 * jax.random.normal(k_w2, (dim, dim), jnp.float32),
        "bproj": 0.05 * jax.random.normal(k_b2, (dim,), jnp.float32),
    }

    # --- run without mask -------------------------------------------------
    out = window_attention(x, params, window_size, num_heads, mask=None)
    out = jax.block_until_ready(out)
    ref = window_attention_ref(x, params, window_size, num_heads, mask=None)
    # bf16 matmul inputs + approx reciprocal => slightly loosened tolerance.
    assert jnp.allclose(out, ref, atol=2e-2, rtol=2e-2), "no-mask mismatch"

    # --- run with a (0 / -100) shift-window style mask --------------------
    idx = jnp.arange(N)
    half = N // 2
    region = (idx >= half).astype(jnp.int32)                      # (N,)
    same = region[:, None] == region[None, :]
    base_mask = jnp.where(same, 0.0, -100.0).astype(jnp.float32)  # (N, N)
    mask = jnp.stack([base_mask * (w % 2) for w in range(num_windows)])  # (nW,N,N)

    out_m = window_attention(x, params, window_size, num_heads, mask=mask)
    out_m = jax.block_until_ready(out_m)
    ref_m = window_attention_ref(x, params, window_size, num_heads, mask=mask)
    assert jnp.allclose(out_m, ref_m, atol=2e-2, rtol=2e-2), "mask mismatch"

    print("KERNEL_OK")
</pallas_src>

<mosaic_0001>
module attributes {stable_mosaic.version = 11 : i64} {
  func.func @window_attn_kernel(%arg0: i32, %arg1: memref<4x16x32xbf16, #tpu.memory_space<vmem>>, %arg2: memref<32x96xbf16, #tpu.memory_space<vmem>>, %arg3: memref<1x96xf32, #tpu.memory_space<vmem>>, %arg4: memref<32x32xbf16, #tpu.memory_space<vmem>>, %arg5: memref<1x32xf32, #tpu.memory_space<vmem>>, %arg6: memref<4x1x16x16xf32, #tpu.memory_space<vmem>>, %arg7: memref<64x32xf32, #tpu.memory_space<vmem>>, %arg8: memref<64x96xbf16, #tpu.memory_space<vmem>>, %arg9: memref<64x32xbf16, #tpu.memory_space<vmem>>) attributes {dimension_semantics = [#tpu.dimension_semantics<parallel>], iteration_bounds = array<i64: 2>, scalar_prefetch = 0 : i64, scratch_operands = 2 : i64, tpu.core_type = #tpu.core_type<tc>, window_params = [{transform_indices = @transform_0, window_bounds = array<i64: 4, 16, 32>}, {pipeline_mode = #tpu.pipeline_mode<synchronous>, transform_indices = @transform_1, window_bounds = array<i64: 32, 96>}, {pipeline_mode = #tpu.pipeline_mode<synchronous>, transform_indices = @transform_2, window_bounds = array<i64: 1, 96>}, {pipeline_mode = #tpu.pipeline_mode<synchronous>, transform_indices = @transform_3, window_bounds = array<i64: 32, 32>}, {pipeline_mode = #tpu.pipeline_mode<synchronous>, transform_indices = @transform_4, window_bounds = array<i64: 1, 32>}, {pipeline_mode = #tpu.pipeline_mode<synchronous>, transform_indices = @transform_5, window_bounds = array<i64: 4, 1, 16, 16>}, {transform_indices = @transform_6, window_bounds = array<i64: 64, 32>}]} {
    %c0 = arith.constant 0 : index
    %c0_0 = arith.constant 0 : index
    %c0_1 = arith.constant 0 : index
    %0 = vector.load %arg1[%c0, %c0_0, %c0_1] : memref<4x16x32xbf16, #tpu.memory_space<vmem>>, vector<4x16x32xbf16>
    %1 = vector.shape_cast %0 : vector<4x16x32xbf16> to vector<64x32xbf16>
    %c0_2 = arith.constant 0 : index
    %c0_3 = arith.constant 0 : index
    %2 = vector.load %arg2[%c0_2, %c0_3] : memref<32x96xbf16, #tpu.memory_space<vmem>>, vector<32x96xbf16>
    %cst = arith.constant dense<0.000000e+00> : vector<64x96xf32>
    %3 = tpu.matmul %1, %2, %cst {dimension_numbers = #tpu.dot_dimension_numbers<[1], [0], [0], [1], [0, 0, 1, 1], [], []>} : vector<64x32xbf16>, vector<32x96xbf16>, vector<64x96xf32> -> vector<64x96xf32>
    %c0_4 = arith.constant 0 : index
    %c0_5 = arith.constant 0 : index
    %4 = vector.load %arg3[%c0_4, %c0_5] : memref<1x96xf32, #tpu.memory_space<vmem>>, vector<1x96xf32>
    %5 = vector.shape_cast %4 : vector<1x96xf32> to vector<96xf32>
    %6 = vector.shape_cast %5 : vector<96xf32> to vector<1x96xf32>
    %7 = vector.broadcast %6 : vector<1x96xf32> to vector<64x96xf32>
    %8 = arith.addf %3, %7 : vector<64x96xf32>
    %9 = arith.truncf %8 : vector<64x96xf32> to vector<64x96xbf16>
    %c0_6 = arith.constant 0 : index
    %c0_7 = arith.constant 0 : index
    %10 = vector.load %arg8[%c0_6, %c0_7] : memref<64x96xbf16, #tpu.memory_space<vmem>>, vector<64x96xbf16>
    tpu.vector_store %arg8[%c0_6, %c0_7], %9 {strides = array<i32>} : memref<64x96xbf16, #tpu.memory_space<vmem>>, vector<64x96xbf16>,
    %c0_8 = arith.constant 0 : index
    %c0_9 = arith.constant 0 : index
    %11 = vector.load %arg8[%c0_8, %c0_9] : memref<64x96xbf16, #tpu.memory_space<vmem>>, vector<64x32xbf16>
    %c0_10 = arith.constant 0 : index
    %c32 = arith.constant 32 : index
    %12 = vector.load %arg8[%c0_10, %c32] : memref<64x96xbf16, #tpu.memory_space<vmem>>, vector<64x32xbf16>
    %c0_11 = arith.constant 0 : index
    %c64 = arith.constant 64 : index
    %13 = vector.load %arg8[%c0_11, %c64] : memref<64x96xbf16, #tpu.memory_space<vmem>>, vector<64x32xbf16>
    %c0_12 = arith.constant 0 : index
    %c0_13 = arith.constant 0 : index
    %c0_14 = arith.constant 0 : index
    %c0_15 = arith.constant 0 : index
    %14 = vector.load %arg6[%c0_12, %c0_13, %c0_14, %c0_15] : memref<4x1x16x16xf32, #tpu.memory_space<vmem>>, vector<4x1x16x16xf32>
    %15 = vector.extract_strided_slice %11 {offsets = [0, 0], sizes = [64, 8], strides = [1, 1]} : vector<64x32xbf16> to vector<64x8xbf16>
    %16 = vector.shape_cast %15 : vector<64x8xbf16> to vector<4x16x8xbf16>
    %17 = vector.extract_strided_slice %12 {offsets = [0, 0], sizes = [64, 8], strides = [1, 1]} : vector<64x32xbf16> to vector<64x8xbf16>
    %18 = vector.shape_cast %17 : vector<64x8xbf16> to vector<4x16x8xbf16>
    %19 = vector.extract_strided_slice %13 {offsets = [0, 0], sizes = [64, 8], strides = [1, 1]} : vector<64x32xbf16> to vector<64x8xbf16>
    %20 = vector.shape_cast %19 : vector<64x8xbf16> to vector<4x16x8xbf16>
    "tpu.trace_start"() <{level = 10 : i32, message = "bqd,bkd->bqk"}> : () -> ()
    %cst_16 = arith.constant dense<0.000000e+00> : vector<4x16x16xf32>
    %21 = tpu.matmul %16, %18, %cst_16 {dimension_numbers = #tpu.dot_dimension_numbers<[2], [2], [1], [1], [0, 0, 0, 1, 1, 1], [0], [0]>} : vector<4x16x8xbf16>, vector<4x16x8xbf16>, vector<4x16x16xf32> -> vector<4x16x16xf32>
    "tpu.trace_stop"() : () -> ()
    %22 = vector.extract_strided_slice %14 {offsets = [0, 0, 0, 0], sizes = [1, 1, 16, 16], strides = [1, 1, 1, 1]} : vector<4x1x16x16xf32> to vector<1x1x16x16xf32>
    %23 = vector.shape_cast %22 : vector<1x1x16x16xf32> to vector<16x16xf32>
    %24 = vector.shape_cast %23 : vector<16x16xf32> to vector<1x16x16xf32>
    %25 = vector.broadcast %24 : vector<1x16x16xf32> to vector<4x16x16xf32>
    %26 = arith.addf %21, %25 : vector<4x16x16xf32>
    %cst_17 = arith.constant dense<0xFF800000> : vector<4x16xf32>
    %27 = vector.multi_reduction <maximumf>, %26, %cst_17 [2] : vector<4x16x16xf32> to vector<4x16xf32>
    %28 = vector.shape_cast %27 : vector<4x16xf32> to vector<4x16x1xf32>
    %29 = vector.broadcast %28 : vector<4x16x1xf32> to vector<4x16x16xf32>
    %30 = arith.subf %26, %29 : vector<4x16x16xf32>
    %31 = math.exp %30 : vector<4x16x16xf32>
    %cst_18 = arith.constant dense<0.000000e+00> : vector<4x16xf32>
    %32 = vector.multi_reduction <add>, %31, %cst_18 [2] : vector<4x16x16xf32> to vector<4x16xf32>
    %33 = vector.shape_cast %32 : vector<4x16xf32> to vector<4x16x1xf32>
    %34 = arith.truncf %31 : vector<4x16x16xf32> to vector<4x16x16xbf16>
    "tpu.trace_start"() <{level = 10 : i32, message = "bqk,bkd->bqd"}> : () -> ()
    %cst_19 = arith.constant dense<0.000000e+00> : vector<4x16x8xf32>
    %35 = tpu.matmul %34, %20, %cst_19 {dimension_numbers = #tpu.dot_dimension_numbers<[2], [1], [1], [2], [0, 0, 0, 1, 1, 2], [0], [0]>} : vector<4x16x16xbf16>, vector<4x16x8xbf16>, vector<4x16x8xf32> -> vector<4x16x8xf32>
    "tpu.trace_stop"() : () -> ()
    %36 = tpu.reciprocal %33 {approx = true} : vector<4x16x1xf32> -> vector<4x16x1xf32>
    %37 = vector.broadcast %36 : vector<4x16x1xf32> to vector<4x16x8xf32>
    %38 = arith.mulf %35, %37 : vector<4x16x8xf32>
    %39 = arith.truncf %38 : vector<4x16x8xf32> to vector<4x16x8xbf16>
    %40 = vector.extract_strided_slice %11 {offsets = [0, 8], sizes = [64, 8], strides = [1, 1]} : vector<64x32xbf16> to vector<64x8xbf16>
    %41 = vector.shape_cast %40 : vector<64x8xbf16> to vector<4x16x8xbf16>
    %42 = vector.extract_strided_slice %12 {offsets = [0, 8], sizes = [64, 8], strides = [1, 1]} : vector<64x32xbf16> to vector<64x8xbf16>
    %43 = vector.shape_cast %42 : vector<64x8xbf16> to vector<4x16x8xbf16>
    %44 = vector.extract_strided_slice %13 {offsets = [0, 8], sizes = [64, 8], strides = [1, 1]} : vector<64x32xbf16> to vector<64x8xbf16>
    %45 = vector.shape_cast %44 : vector<64x8xbf16> to vector<4x16x8xbf16>
    "tpu.trace_start"() <{level = 10 : i32, message = "bqd,bkd->bqk"}> : () -> ()
    %cst_20 = arith.constant dense<0.000000e+00> : vector<4x16x16xf32>
    %46 = tpu.matmul %41, %43, %cst_20 {dimension_numbers = #tpu.dot_dimension_numbers<[2], [2], [1], [1], [0, 0, 0, 1, 1, 1], [0], [0]>} : vector<4x16x8xbf16>, vector<4x16x8xbf16>, vector<4x16x16xf32> -> vector<4x16x16xf32>
    "tpu.trace_stop"() : () -> ()
    %47 = vector.extract_strided_slice %14 {offsets = [1, 0, 0, 0], sizes = [1, 1, 16, 16], strides = [1, 1, 1, 1]} : vector<4x1x16x16xf32> to vector<1x1x16x16xf32>
    %48 = vector.shape_cast %47 : vector<1x1x16x16xf32> to vector<16x16xf32>
    %49 = vector.shape_cast %48 : vector<16x16xf32> to vector<1x16x16xf32>
    %50 = vector.broadcast %49 : vector<1x16x16xf32> to vector<4x16x16xf32>
    %51 = arith.addf %46, %50 : vector<4x16x16xf32>
    %cst_21 = arith.constant dense<0xFF800000> : vector<4x16xf32>
    %52 = vector.multi_reduction <maximumf>, %51, %cst_21 [2] : vector<4x16x16xf32> to vector<4x16xf32>
    %53 = vector.shape_cast %52 : vector<4x16xf32> to vector<4x16x1xf32>
    %54 = vector.broadcast %53 : vector<4x16x1xf32> to vector<4x16x16xf32>
    %55 = arith.subf %51, %54 : vector<4x16x16xf32>
    %56 = math.exp %55 : vector<4x16x16xf32>
    %cst_22 = arith.constant dense<0.000000e+00> : vector<4x16xf32>
    %57 = vector.multi_reduction <add>, %56, %cst_22 [2] : vector<4x16x16xf32> to vector<4x16xf32>
    %58 = vector.shape_cast %57 : vector<4x16xf32> to vector<4x16x1xf32>
    %59 = arith.truncf %56 : vector<4x16x16xf32> to vector<4x16x16xbf16>
    "tpu.trace_start"() <{level = 10 : i32, message = "bqk,bkd->bqd"}> : () -> ()
    %cst_23 = arith.constant dense<0.000000e+00> : vector<4x16x8xf32>
    %60 = tpu.matmul %59, %45, %cst_23 {dimension_numbers = #tpu.dot_dimension_numbers<[2], [1], [1], [2], [0, 0, 0, 1, 1, 2], [0], [0]>} : vector<4x16x16xbf16>, vector<4x16x8xbf16>, vector<4x16x8xf32> -> vector<4x16x8xf32>
    "tpu.trace_stop"() : () -> ()
    %61 = tpu.reciprocal %58 {approx = true} : vector<4x16x1xf32> -> vector<4x16x1xf32>
    %62 = vector.broadcast %61 : vector<4x16x1xf32> to vector<4x16x8xf32>
    %63 = arith.mulf %60, %62 : vector<4x16x8xf32>
    %64 = arith.truncf %63 : vector<4x16x8xf32> to vector<4x16x8xbf16>
    %65 = vector.extract_strided_slice %11 {offsets = [0, 16], sizes = [64, 8], strides = [1, 1]} : vector<64x32xbf16> to vector<64x8xbf16>
    %66 = vector.shape_cast %65 : vector<64x8xbf16> to vector<4x16x8xbf16>
    %67 = vector.extract_strided_slice %12 {offsets = [0, 16], sizes = [64, 8], strides = [1, 1]} : vector<64x32xbf16> to vector<64x8xbf16>
    %68 = vector.shape_cast %67 : vector<64x8xbf16> to vector<4x16x8xbf16>
    %69 = vector.extract_strided_slice %13 {offsets = [0, 16], sizes = [64, 8], strides = [1, 1]} : vector<64x32xbf16> to vector<64x8xbf16>
    %70 = vector.shape_cast %69 : vector<64x8xbf16> to vector<4x16x8xbf16>
    "tpu.trace_start"() <{level = 10 : i32, message = "bqd,bkd->bqk"}> : () -> ()
    %cst_24 = arith.constant dense<0.000000e+00> : vector<4x16x16xf32>
    %71 = tpu.matmul %66, %68, %cst_24 {dimension_numbers = #tpu.dot_dimension_numbers<[2], [2], [1], [1], [0, 0, 0, 1, 1, 1], [0], [0]>} : vector<4x16x8xbf16>, vector<4x16x8xbf16>, vector<4x16x16xf32> -> vector<4x16x16xf32>
    "tpu.trace_stop"() : () -> ()
    %72 = vector.extract_strided_slice %14 {offsets = [2, 0, 0, 0], sizes = [1, 1, 16, 16], strides = [1, 1, 1, 1]} : vector<4x1x16x16xf32> to vector<1x1x16x16xf32>
    %73 = vector.shape_cast %72 : vector<1x1x16x16xf32> to vector<16x16xf32>
    %74 = vector.shape_cast %73 : vector<16x16xf32> to vector<1x16x16xf32>
    %75 = vector.broadcast %74 : vector<1x16x16xf32> to vector<4x16x16xf32>
    %76 = arith.addf %71, %75 : vector<4x16x16xf32>
    %cst_25 = arith.constant dense<0xFF800000> : vector<4x16xf32>
    %77 = vector.multi_reduction <maximumf>, %76, %cst_25 [2] : vector<4x16x16xf32> to vector<4x16xf32>
    %78 = vector.shape_cast %77 : vector<4x16xf32> to vector<4x16x1xf32>
    %79 = vector.broadcast %78 : vector<4x16x1xf32> to vector<4x16x16xf32>
    %80 = arith.subf %76, %79 : vector<4x16x16xf32>
    %81 = math.exp %80 : vector<4x16x16xf32>
    %cst_26 = arith.constant dense<0.000000e+00> : vector<4x16xf32>
    %82 = vector.multi_reduction <add>, %81, %cst_26 [2] : vector<4x16x16xf32> to vector<4x16xf32>
    %83 = vector.shape_cast %82 : vector<4x16xf32> to vector<4x16x1xf32>
    %84 = arith.truncf %81 : vector<4x16x16xf32> to vector<4x16x16xbf16>
    "tpu.trace_start"() <{level = 10 : i32, message = "bqk,bkd->bqd"}> : () -> ()
    %cst_27 = arith.constant dense<0.000000e+00> : vector<4x16x8xf32>
    %85 = tpu.matmul %84, %70, %cst_27 {dimension_numbers = #tpu.dot_dimension_numbers<[2], [1], [1], [2], [0, 0, 0, 1, 1, 2], [0], [0]>} : vector<4x16x16xbf16>, vector<4x16x8xbf16>, vector<4x16x8xf32> -> vector<4x16x8xf32>
    "tpu.trace_stop"() : () -> ()
    %86 = tpu.reciprocal %83 {approx = true} : vector<4x16x1xf32> -> vector<4x16x1xf32>
    %87 = vector.broadcast %86 : vector<4x16x1xf32> to vector<4x16x8xf32>
    %88 = arith.mulf %85, %87 : vector<4x16x8xf32>
    %89 = arith.truncf %88 : vector<4x16x8xf32> to vector<4x16x8xbf16>
    %90 = vector.extract_strided_slice %11 {offsets = [0, 24], sizes = [64, 8], strides = [1, 1]} : vector<64x32xbf16> to vector<64x8xbf16>
    %91 = vector.shape_cast %90 : vector<64x8xbf16> to vector<4x16x8xbf16>
    %92 = vector.extract_strided_slice %12 {offsets = [0, 24], sizes = [64, 8], strides = [1, 1]} : vector<64x32xbf16> to vector<64x8xbf16>
    %93 = vector.shape_cast %92 : vector<64x8xbf16> to vector<4x16x8xbf16>
    %94 = vector.extract_strided_slice %13 {offsets = [0, 24], sizes = [64, 8], strides = [1, 1]} : vector<64x32xbf16> to vector<64x8xbf16>
    %95 = vector.shape_cast %94 : vector<64x8xbf16> to vector<4x16x8xbf16>
    "tpu.trace_start"() <{level = 10 : i32, message = "bqd,bkd->bqk"}> : () -> ()
    %cst_28 = arith.constant dense<0.000000e+00> : vector<4x16x16xf32>
    %96 = tpu.matmul %91, %93, %cst_28 {dimension_numbers = #tpu.dot_dimension_numbers<[2], [2], [1], [1], [0, 0, 0, 1, 1, 1], [0], [0]>} : vector<4x16x8xbf16>, vector<4x16x8xbf16>, vector<4x16x16xf32> -> vector<4x16x16xf32>
    "tpu.trace_stop"() : () -> ()
    %97 = vector.extract_strided_slice %14 {offsets = [3, 0, 0, 0], sizes = [1, 1, 16, 16], strides = [1, 1, 1, 1]} : vector<4x1x16x16xf32> to vector<1x1x16x16xf32>
    %98 = vector.shape_cast %97 : vector<1x1x16x16xf32> to vector<16x16xf32>
    %99 = vector.shape_cast %98 : vector<16x16xf32> to vector<1x16x16xf32>
    %100 = vector.broadcast %99 : vector<1x16x16xf32> to vector<4x16x16xf32>
    %101 = arith.addf %96, %100 : vector<4x16x16xf32>
    %cst_29 = arith.constant dense<0xFF800000> : vector<4x16xf32>
    %102 = vector.multi_reduction <maximumf>, %101, %cst_29 [2] : vector<4x16x16xf32> to vector<4x16xf32>
    %103 = vector.shape_cast %102 : vector<4x16xf32> to vector<4x16x1xf32>
    %104 = vector.broadcast %103 : vector<4x16x1xf32> to vector<4x16x16xf32>
    %105 = arith.subf %101, %104 : vector<4x16x16xf32>
    %106 = math.exp %105 : vector<4x16x16xf32>
    %cst_30 = arith.constant dense<0.000000e+00> : vector<4x16xf32>
    %107 = vector.multi_reduction <add>, %106, %cst_30 [2] : vector<4x16x16xf32> to vector<4x16xf32>
    %108 = vector.shape_cast %107 : vector<4x16xf32> to vector<4x16x1xf32>
    %109 = arith.truncf %106 : vector<4x16x16xf32> to vector<4x16x16xbf16>
    "tpu.trace_start"() <{level = 10 : i32, message = "bqk,bkd->bqd"}> : () -> ()
    %cst_31 = arith.constant dense<0.000000e+00> : vector<4x16x8xf32>
    %110 = tpu.matmul %109, %95, %cst_31 {dimension_numbers = #tpu.dot_dimension_numbers<[2], [1], [1], [2], [0, 0, 0, 1, 1, 2], [0], [0]>} : vector<4x16x16xbf16>, vector<4x16x8xbf16>, vector<4x16x8xf32> -> vector<4x16x8xf32>
    "tpu.trace_stop"() : () -> ()
    %111 = tpu.reciprocal %108 {approx = true} : vector<4x16x1xf32> -> vector<4x16x1xf32>
    %112 = vector.broadcast %111 : vector<4x16x1xf32> to vector<4x16x8xf32>
    %113 = arith.mulf %110, %112 : vector<4x16x8xf32>
    %114 = arith.truncf %113 : vector<4x16x8xf32> to vector<4x16x8xbf16>
    %115 = tpu.concatenate %39, %64, %89, %114 in 2 : vector<4x16x8xbf16>, vector<4x16x8xbf16>, vector<4x16x8xbf16>, vector<4x16x8xbf16> -> vector<4x16x32xbf16>
    %116 = vector.shape_cast %115 : vector<4x16x32xbf16> to vector<64x32xbf16>
    %c0_32 = arith.constant 0 : index
    %c0_33 = arith.constant 0 : index
    %117 = vector.load %arg9[%c0_32, %c0_33] : memref<64x32xbf16, #tpu.memory_space<vmem>>, vector<64x32xbf16>
    tpu.vector_store %arg9[%c0_32, %c0_33], %116 {strides = array<i32>} : memref<64x32xbf16, #tpu.memory_space<vmem>>, vector<64x32xbf16>,
    %c0_34 = arith.constant 0 : index
    %c0_35 = arith.constant 0 : index
    %118 = vector.load %arg9[%c0_34, %c0_35] : memref<64x32xbf16, #tpu.memory_space<vmem>>, vector<64x32xbf16>
    %c0_36 = arith.constant 0 : index
    %c0_37 = arith.constant 0 : index
    %119 = vector.load %arg4[%c0_36, %c0_37] : memref<32x32xbf16, #tpu.memory_space<vmem>>, vector<32x32xbf16>
    %cst_38 = arith.constant dense<0.000000e+00> : vector<64x32xf32>
    %120 = tpu.matmul %118, %119, %cst_38 {dimension_numbers = #tpu.dot_dimension_numbers<[1], [0], [0], [1], [0, 0, 1, 1], [], []>} : vector<64x32xbf16>, vector<32x32xbf16>, vector<64x32xf32> -> vector<64x32xf32>
    %c0_39 = arith.constant 0 : index
    %c0_40 = arith.constant 0 : index
    %121 = vector.load %arg5[%c0_39, %c0_40] : memref<1x32xf32, #tpu.memory_space<vmem>>, vector<1x32xf32>
    %122 = vector.shape_cast %121 : vector<1x32xf32> to vector<32xf32>
    %123 = vector.shape_cast %122 : vector<32xf32> to vector<1x32xf32>
    %124 = vector.broadcast %123 : vector<1x32xf32> to vector<64x32xf32>
    %125 = arith.addf %120, %124 : vector<64x32xf32>
    %c0_41 = arith.constant 0 : index
    %c0_42 = arith.constant 0 : index
    %126 = vector.load %arg7[%c0_41, %c0_42] : memref<64x32xf32, #tpu.memory_space<vmem>>, vector<64x32xf32>
    tpu.vector_store %arg7[%c0_41, %c0_42], %125 {strides = array<i32>} : memref<64x32xf32, #tpu.memory_space<vmem>>, vector<64x32xf32>,
    return
  }
  func.func @transform_0(%arg0: i32) -> (i32, i32, i32) {
    %c0_i32 = arith.constant 0 : i32
    %c0_i32_0 = arith.constant 0 : i32
    %c0_i32_1 = arith.constant 0 : i32
    return %arg0, %c0_i32, %c0_i32_0 : i32, i32, i32
  }
  func.func @transform_1(%arg0: i32) -> (i32, i32) {
    %c0_i32 = arith.constant 0 : i32
    %c0_i32_0 = arith.constant 0 : i32
    %c0_i32_1 = arith.constant 0 : i32
    return %c0_i32, %c0_i32_0 : i32, i32
  }
  func.func @transform_2(%arg0: i32) -> (i32, i32) {
    %c0_i32 = arith.constant 0 : i32
    %c0_i32_0 = arith.constant 0 : i32
    %c0_i32_1 = arith.constant 0 : i32
    return %c0_i32, %c0_i32_0 : i32, i32
  }
  func.func @transform_3(%arg0: i32) -> (i32, i32) {
    %c0_i32 = arith.constant 0 : i32
    %c0_i32_0 = arith.constant 0 : i32
    %c0_i32_1 = arith.constant 0 : i32
    return %c0_i32, %c0_i32_0 : i32, i32
  }
  func.func @transform_4(%arg0: i32) -> (i32, i32) {
    %c0_i32 = arith.constant 0 : i32
    %c0_i32_0 = arith.constant 0 : i32
    %c0_i32_1 = arith.constant 0 : i32
    return %c0_i32, %c0_i32_0 : i32, i32
  }
  func.func @transform_5(%arg0: i32) -> (i32, i32, i32, i32) {
    %c0_i32 = arith.constant 0 : i32
    %c0_i32_0 = arith.constant 0 : i32
    %c0_i32_1 = arith.constant 0 : i32
    %c0_i32_2 = arith.constant 0 : i32
    %c0_i32_3 = arith.constant 0 : i32
    return %c0_i32, %c0_i32_0, %c0_i32_1, %c0_i32_2 : i32, i32, i32, i32
  }
  func.func @transform_6(%arg0: i32) -> (i32, i32) {
    %c0_i32 = arith.constant 0 : i32
    %c0_i32_0 = arith.constant 0 : i32
    return %arg0, %c0_i32 : i32, i32
  }
}

module attributes {stable_mosaic.version = 11 : i64} {
  func.func @window_attn_kernel(%arg0: i32, %arg1: memref<4x16x32xbf16, #tpu.memory_space<vmem>>, %arg2: memref<32x96xbf16, #tpu.memory_space<vmem>>, %arg3: memref<1x96xf32, #tpu.memory_space<vmem>>, %arg4: memref<32x32xbf16, #tpu.memory_space<vmem>>, %arg5: memref<1x32xf32, #tpu.memory_space<vmem>>, %arg6: memref<4x1x16x16xf32, #tpu.memory_space<vmem>>, %arg7: memref<64x32xf32, #tpu.memory_space<vmem>>, %arg8: memref<64x96xbf16, #tpu.memory_space<vmem>>, %arg9: memref<64x32xbf16, #tpu.memory_space<vmem>>) attributes {dimension_semantics = [#tpu.dimension_semantics<parallel>], iteration_bounds = array<i64: 2>, scalar_prefetch = 0 : i64, scratch_operands = 2 : i64, tpu.core_type = #tpu.core_type<tc>, window_params = [{transform_indices = @transform_0, window_bounds = array<i64: 4, 16, 32>}, {pipeline_mode = #tpu.pipeline_mode<synchronous>, transform_indices = @transform_1, window_bounds = array<i64: 32, 96>}, {pipeline_mode = #tpu.pipeline_mode<synchronous>, transform_indices = @transform_2, window_bounds = array<i64: 1, 96>}, {pipeline_mode = #tpu.pipeline_mode<synchronous>, transform_indices = @transform_3, window_bounds = array<i64: 32, 32>}, {pipeline_mode = #tpu.pipeline_mode<synchronous>, transform_indices = @transform_4, window_bounds = array<i64: 1, 32>}, {pipeline_mode = #tpu.pipeline_mode<synchronous>, transform_indices = @transform_5, window_bounds = array<i64: 4, 1, 16, 16>}, {transform_indices = @transform_6, window_bounds = array<i64: 64, 32>}]} {
    %c0 = arith.constant 0 : index
    %c0_0 = arith.constant 0 : index
    %c0_1 = arith.constant 0 : index
    %0 = vector.load %arg1[%c0, %c0_0, %c0_1] : memref<4x16x32xbf16, #tpu.memory_space<vmem>>, vector<4x16x32xbf16>
    %1 = vector.shape_cast %0 : vector<4x16x32xbf16> to vector<64x32xbf16>
    %c0_2 = arith.constant 0 : index
    %c0_3 = arith.constant 0 : index
    %2 = vector.load %arg2[%c0_2, %c0_3] : memref<32x96xbf16, #tpu.memory_space<vmem>>, vector<32x96xbf16>
    %cst = arith.constant dense<0.000000e+00> : vector<64x96xf32>
    %3 = tpu.matmul %1, %2, %cst {dimension_numbers = #tpu.dot_dimension_numbers<[1], [0], [0], [1], [0, 0, 1, 1], [], []>} : vector<64x32xbf16>, vector<32x96xbf16>, vector<64x96xf32> -> vector<64x96xf32>
    %c0_4 = arith.constant 0 : index
    %c0_5 = arith.constant 0 : index
    %4 = vector.load %arg3[%c0_4, %c0_5] : memref<1x96xf32, #tpu.memory_space<vmem>>, vector<1x96xf32>
    %5 = vector.shape_cast %4 : vector<1x96xf32> to vector<96xf32>
    %6 = vector.shape_cast %5 : vector<96xf32> to vector<1x96xf32>
    %7 = vector.broadcast %6 : vector<1x96xf32> to vector<64x96xf32>
    %8 = arith.addf %3, %7 : vector<64x96xf32>
    %9 = arith.truncf %8 : vector<64x96xf32> to vector<64x96xbf16>
    %c0_6 = arith.constant 0 : index
    %c0_7 = arith.constant 0 : index
    %10 = vector.load %arg8[%c0_6, %c0_7] : memref<64x96xbf16, #tpu.memory_space<vmem>>, vector<64x96xbf16>
    tpu.vector_store %arg8[%c0_6, %c0_7], %9 {strides = array<i32>} : memref<64x96xbf16, #tpu.memory_space<vmem>>, vector<64x96xbf16>,
    %c0_8 = arith.constant 0 : index
    %c0_9 = arith.constant 0 : index
    %11 = vector.load %arg8[%c0_8, %c0_9] : memref<64x96xbf16, #tpu.memory_space<vmem>>, vector<64x32xbf16>
    %c0_10 = arith.constant 0 : index
    %c32 = arith.constant 32 : index
    %12 = vector.load %arg8[%c0_10, %c32] : memref<64x96xbf16, #tpu.memory_space<vmem>>, vector<64x32xbf16>
    %c0_11 = arith.constant 0 : index
    %c64 = arith.constant 64 : index
    %13 = vector.load %arg8[%c0_11, %c64] : memref<64x96xbf16, #tpu.memory_space<vmem>>, vector<64x32xbf16>
    %c0_12 = arith.constant 0 : index
    %c0_13 = arith.constant 0 : index
    %c0_14 = arith.constant 0 : index
    %c0_15 = arith.constant 0 : index
    %14 = vector.load %arg6[%c0_12, %c0_13, %c0_14, %c0_15] : memref<4x1x16x16xf32, #tpu.memory_space<vmem>>, vector<4x1x16x16xf32>
    %15 = vector.extract_strided_slice %11 {offsets = [0, 0], sizes = [64, 8], strides = [1, 1]} : vector<64x32xbf16> to vector<64x8xbf16>
    %16 = vector.shape_cast %15 : vector<64x8xbf16> to vector<4x16x8xbf16>
    %17 = vector.extract_strided_slice %12 {offsets = [0, 0], sizes = [64, 8], strides = [1, 1]} : vector<64x32xbf16> to vector<64x8xbf16>
    %18 = vector.shape_cast %17 : vector<64x8xbf16> to vector<4x16x8xbf16>
    %19 = vector.extract_strided_slice %13 {offsets = [0, 0], sizes = [64, 8], strides = [1, 1]} : vector<64x32xbf16> to vector<64x8xbf16>
    %20 = vector.shape_cast %19 : vector<64x8xbf16> to vector<4x16x8xbf16>
    "tpu.trace_start"() <{level = 10 : i32, message = "bqd,bkd->bqk"}> : () -> ()
    %cst_16 = arith.constant dense<0.000000e+00> : vector<4x16x16xf32>
    %21 = tpu.matmul %16, %18, %cst_16 {dimension_numbers = #tpu.dot_dimension_numbers<[2], [2], [1], [1], [0, 0, 0, 1, 1, 1], [0], [0]>} : vector<4x16x8xbf16>, vector<4x16x8xbf16>, vector<4x16x16xf32> -> vector<4x16x16xf32>
    "tpu.trace_stop"() : () -> ()
    %22 = vector.extract_strided_slice %14 {offsets = [0, 0, 0, 0], sizes = [1, 1, 16, 16], strides = [1, 1, 1, 1]} : vector<4x1x16x16xf32> to vector<1x1x16x16xf32>
    %23 = vector.shape_cast %22 : vector<1x1x16x16xf32> to vector<16x16xf32>
    %24 = vector.shape_cast %23 : vector<16x16xf32> to vector<1x16x16xf32>
    %25 = vector.broadcast %24 : vector<1x16x16xf32> to vector<4x16x16xf32>
    %26 = arith.addf %21, %25 : vector<4x16x16xf32>
    %cst_17 = arith.constant dense<0xFF800000> : vector<4x16xf32>
    %27 = vector.multi_reduction <maximumf>, %26, %cst_17 [2] : vector<4x16x16xf32> to vector<4x16xf32>
    %28 = vector.shape_cast %27 : vector<4x16xf32> to vector<4x16x1xf32>
    %29 = vector.broadcast %28 : vector<4x16x1xf32> to vector<4x16x16xf32>
    %30 = arith.subf %26, %29 : vector<4x16x16xf32>
    %31 = math.exp %30 : vector<4x16x16xf32>
    %cst_18 = arith.constant dense<0.000000e+00> : vector<4x16xf32>
    %32 = vector.multi_reduction <add>, %31, %cst_18 [2] : vector<4x16x16xf32> to vector<4x16xf32>
    %33 = vector.shape_cast %32 : vector<4x16xf32> to vector<4x16x1xf32>
    %34 = arith.truncf %31 : vector<4x16x16xf32> to vector<4x16x16xbf16>
    "tpu.trace_start"() <{level = 10 : i32, message = "bqk,bkd->bqd"}> : () -> ()
    %cst_19 = arith.constant dense<0.000000e+00> : vector<4x16x8xf32>
    %35 = tpu.matmul %34, %20, %cst_19 {dimension_numbers = #tpu.dot_dimension_numbers<[2], [1], [1], [2], [0, 0, 0, 1, 1, 2], [0], [0]>} : vector<4x16x16xbf16>, vector<4x16x8xbf16>, vector<4x16x8xf32> -> vector<4x16x8xf32>
    "tpu.trace_stop"() : () -> ()
    %36 = tpu.reciprocal %33 {approx = true} : vector<4x16x1xf32> -> vector<4x16x1xf32>
    %37 = vector.broadcast %36 : vector<4x16x1xf32> to vector<4x16x8xf32>
    %38 = arith.mulf %35, %37 : vector<4x16x8xf32>
    %39 = arith.truncf %38 : vector<4x16x8xf32> to vector<4x16x8xbf16>
    %40 = vector.extract_strided_slice %11 {offsets = [0, 8], sizes = [64, 8], strides = [1, 1]} : vector<64x32xbf16> to vector<64x8xbf16>
    %41 = vector.shape_cast %40 : vector<64x8xbf16> to vector<4x16x8xbf16>
    %42 = vector.extract_strided_slice %12 {offsets = [0, 8], sizes = [64, 8], strides = [1, 1]} : vector<64x32xbf16> to vector<64x8xbf16>
    %43 = vector.shape_cast %42 : vector<64x8xbf16> to vector<4x16x8xbf16>
    %44 = vector.extract_strided_slice %13 {offsets = [0, 8], sizes = [64, 8], strides = [1, 1]} : vector<64x32xbf16> to vector<64x8xbf16>
    %45 = vector.shape_cast %44 : vector<64x8xbf16> to vector<4x16x8xbf16>
    "tpu.trace_start"() <{level = 10 : i32, message = "bqd,bkd->bqk"}> : () -> ()
    %cst_20 = arith.constant dense<0.000000e+00> : vector<4x16x16xf32>
    %46 = tpu.matmul %41, %43, %cst_20 {dimension_numbers = #tpu.dot_dimension_numbers<[2], [2], [1], [1], [0, 0, 0, 1, 1, 1], [0], [0]>} : vector<4x16x8xbf16>, vector<4x16x8xbf16>, vector<4x16x16xf32> -> vector<4x16x16xf32>
    "tpu.trace_stop"() : () -> ()
    %47 = vector.extract_strided_slice %14 {offsets = [1, 0, 0, 0], sizes = [1, 1, 16, 16], strides = [1, 1, 1, 1]} : vector<4x1x16x16xf32> to vector<1x1x16x16xf32>
    %48 = vector.shape_cast %47 : vector<1x1x16x16xf32> to vector<16x16xf32>
    %49 = vector.shape_cast %48 : vector<16x16xf32> to vector<1x16x16xf32>
    %50 = vector.broadcast %49 : vector<1x16x16xf32> to vector<4x16x16xf32>
    %51 = arith.addf %46, %50 : vector<4x16x16xf32>
    %cst_21 = arith.constant dense<0xFF800000> : vector<4x16xf32>
    %52 = vector.multi_reduction <maximumf>, %51, %cst_21 [2] : vector<4x16x16xf32> to vector<4x16xf32>
    %53 = vector.shape_cast %52 : vector<4x16xf32> to vector<4x16x1xf32>
    %54 = vector.broadcast %53 : vector<4x16x1xf32> to vector<4x16x16xf32>
    %55 = arith.subf %51, %54 : vector<4x16x16xf32>
    %56 = math.exp %55 : vector<4x16x16xf32>
    %cst_22 = arith.constant dense<0.000000e+00> : vector<4x16xf32>
    %57 = vector.multi_reduction <add>, %56, %cst_22 [2] : vector<4x16x16xf32> to vector<4x16xf32>
    %58 = vector.shape_cast %57 : vector<4x16xf32> to vector<4x16x1xf32>
    %59 = arith.truncf %56 : vector<4x16x16xf32> to vector<4x16x16xbf16>
    "tpu.trace_start"() <{level = 10 : i32, message = "bqk,bkd->bqd"}> : () -> ()
    %cst_23 = arith.constant dense<0.000000e+00> : vector<4x16x8xf32>
    %60 = tpu.matmul %59, %45, %cst_23 {dimension_numbers = #tpu.dot_dimension_numbers<[2], [1], [1], [2], [0, 0, 0, 1, 1, 2], [0], [0]>} : vector<4x16x16xbf16>, vector<4x16x8xbf16>, vector<4x16x8xf32> -> vector<4x16x8xf32>
    "tpu.trace_stop"() : () -> ()
    %61 = tpu.reciprocal %58 {approx = true} : vector<4x16x1xf32> -> vector<4x16x1xf32>
    %62 = vector.broadcast %61 : vector<4x16x1xf32> to vector<4x16x8xf32>
    %63 = arith.mulf %60, %62 : vector<4x16x8xf32>
    %64 = arith.truncf %63 : vector<4x16x8xf32> to vector<4x16x8xbf16>
    %65 = vector.extract_strided_slice %11 {offsets = [0, 16], sizes = [64, 8], strides = [1, 1]} : vector<64x32xbf16> to vector<64x8xbf16>
    %66 = vector.shape_cast %65 : vector<64x8xbf16> to vector<4x16x8xbf16>
    %67 = vector.extract_strided_slice %12 {offsets = [0, 16], sizes = [64, 8], strides = [1, 1]} : vector<64x32xbf16> to vector<64x8xbf16>
    %68 = vector.shape_cast %67 : vector<64x8xbf16> to vector<4x16x8xbf16>
    %69 = vector.extract_strided_slice %13 {offsets = [0, 16], sizes = [64, 8], strides = [1, 1]} : vector<64x32xbf16> to vector<64x8xbf16>
    %70 = vector.shape_cast %69 : vector<64x8xbf16> to vector<4x16x8xbf16>
    "tpu.trace_start"() <{level = 10 : i32, message = "bqd,bkd->bqk"}> : () -> ()
    %cst_24 = arith.constant dense<0.000000e+00> : vector<4x16x16xf32>
    %71 = tpu.matmul %66, %68, %cst_24 {dimension_numbers = #tpu.dot_dimension_numbers<[2], [2], [1], [1], [0, 0, 0, 1, 1, 1], [0], [0]>} : vector<4x16x8xbf16>, vector<4x16x8xbf16>, vector<4x16x16xf32> -> vector<4x16x16xf32>
    "tpu.trace_stop"() : () -> ()
    %72 = vector.extract_strided_slice %14 {offsets = [2, 0, 0, 0], sizes = [1, 1, 16, 16], strides = [1, 1, 1, 1]} : vector<4x1x16x16xf32> to vector<1x1x16x16xf32>
    %73 = vector.shape_cast %72 : vector<1x1x16x16xf32> to vector<16x16xf32>
    %74 = vector.shape_cast %73 : vector<16x16xf32> to vector<1x16x16xf32>
    %75 = vector.broadcast %74 : vector<1x16x16xf32> to vector<4x16x16xf32>
    %76 = arith.addf %71, %75 : vector<4x16x16xf32>
    %cst_25 = arith.constant dense<0xFF800000> : vector<4x16xf32>
    %77 = vector.multi_reduction <maximumf>, %76, %cst_25 [2] : vector<4x16x16xf32> to vector<4x16xf32>
    %78 = vector.shape_cast %77 : vector<4x16xf32> to vector<4x16x1xf32>
    %79 = vector.broadcast %78 : vector<4x16x1xf32> to vector<4x16x16xf32>
    %80 = arith.subf %76, %79 : vector<4x16x16xf32>
    %81 = math.exp %80 : vector<4x16x16xf32>
    %cst_26 = arith.constant dense<0.000000e+00> : vector<4x16xf32>
    %82 = vector.multi_reduction <add>, %81, %cst_26 [2] : vector<4x16x16xf32> to vector<4x16xf32>
    %83 = vector.shape_cast %82 : vector<4x16xf32> to vector<4x16x1xf32>
    %84 = arith.truncf %81 : vector<4x16x16xf32> to vector<4x16x16xbf16>
    "tpu.trace_start"() <{level = 10 : i32, message = "bqk,bkd->bqd"}> : () -> ()
    %cst_27 = arith.constant dense<0.000000e+00> : vector<4x16x8xf32>
    %85 = tpu.matmul %84, %70, %cst_27 {dimension_numbers = #tpu.dot_dimension_numbers<[2], [1], [1], [2], [0, 0, 0, 1, 1, 2], [0], [0]>} : vector<4x16x16xbf16>, vector<4x16x8xbf16>, vector<4x16x8xf32> -> vector<4x16x8xf32>
    "tpu.trace_stop"() : () -> ()
    %86 = tpu.reciprocal %83 {approx = true} : vector<4x16x1xf32> -> vector<4x16x1xf32>
    %87 = vector.broadcast %86 : vector<4x16x1xf32> to vector<4x16x8xf32>
    %88 = arith.mulf %85, %87 : vector<4x16x8xf32>
    %89 = arith.truncf %88 : vector<4x16x8xf32> to vector<4x16x8xbf16>
    %90 = vector.extract_strided_slice %11 {offsets = [0, 24], sizes = [64, 8], strides = [1, 1]} : vector<64x32xbf16> to vector<64x8xbf16>
    %91 = vector.shape_cast %90 : vector<64x8xbf16> to vector<4x16x8xbf16>
    %92 = vector.extract_strided_slice %12 {offsets = [0, 24], sizes = [64, 8], strides = [1, 1]} : vector<64x32xbf16> to vector<64x8xbf16>
    %93 = vector.shape_cast %92 : vector<64x8xbf16> to vector<4x16x8xbf16>
    %94 = vector.extract_strided_slice %13 {offsets = [0, 24], sizes = [64, 8], strides = [1, 1]} : vector<64x32xbf16> to vector<64x8xbf16>
    %95 = vector.shape_cast %94 : vector<64x8xbf16> to vector<4x16x8xbf16>
    "tpu.trace_start"() <{level = 10 : i32, message = "bqd,bkd->bqk"}> : () -> ()
    %cst_28 = arith.constant dense<0.000000e+00> : vector<4x16x16xf32>
    %96 = tpu.matmul %91, %93, %cst_28 {dimension_numbers = #tpu.dot_dimension_numbers<[2], [2], [1], [1], [0, 0, 0, 1, 1, 1], [0], [0]>} : vector<4x16x8xbf16>, vector<4x16x8xbf16>, vector<4x16x16xf32> -> vector<4x16x16xf32>
    "tpu.trace_stop"() : () -> ()
    %97 = vector.extract_strided_slice %14 {offsets = [3, 0, 0, 0], sizes = [1, 1, 16, 16], strides = [1, 1, 1, 1]} : vector<4x1x16x16xf32> to vector<1x1x16x16xf32>
    %98 = vector.shape_cast %97 : vector<1x1x16x16xf32> to vector<16x16xf32>
    %99 = vector.shape_cast %98 : vector<16x16xf32> to vector<1x16x16xf32>
    %100 = vector.broadcast %99 : vector<1x16x16xf32> to vector<4x16x16xf32>
    %101 = arith.addf %96, %100 : vector<4x16x16xf32>
    %cst_29 = arith.constant dense<0xFF800000> : vector<4x16xf32>
    %102 = vector.multi_reduction <maximumf>, %101, %cst_29 [2] : vector<4x16x16xf32> to vector<4x16xf32>
    %103 = vector.shape_cast %102 : vector<4x16xf32> to vector<4x16x1xf32>
    %104 = vector.broadcast %103 : vector<4x16x1xf32> to vector<4x16x16xf32>
    %105 = arith.subf %101, %104 : vector<4x16x16xf32>
    %106 = math.exp %105 : vector<4x16x16xf32>
    %cst_30 = arith.constant dense<0.000000e+00> : vector<4x16xf32>
    %107 = vector.multi_reduction <add>, %106, %cst_30 [2] : vector<4x16x16xf32> to vector<4x16xf32>
    %108 = vector.shape_cast %107 : vector<4x16xf32> to vector<4x16x1xf32>
    %109 = arith.truncf %106 : vector<4x16x16xf32> to vector<4x16x16xbf16>
    "tpu.trace_start"() <{level = 10 : i32, message = "bqk,bkd->bqd"}> : () -> ()
    %cst_31 = arith.constant dense<0.000000e+00> : vector<4x16x8xf32>
    %110 = tpu.matmul %109, %95, %cst_31 {dimension_numbers = #tpu.dot_dimension_numbers<[2], [1], [1], [2], [0, 0, 0, 1, 1, 2], [0], [0]>} : vector<4x16x16xbf16>, vector<4x16x8xbf16>, vector<4x16x8xf32> -> vector<4x16x8xf32>
    "tpu.trace_stop"() : () -> ()
    %111 = tpu.reciprocal %108 {approx = true} : vector<4x16x1xf32> -> vector<4x16x1xf32>
    %112 = vector.broadcast %111 : vector<4x16x1xf32> to vector<4x16x8xf32>
    %113 = arith.mulf %110, %112 : vector<4x16x8xf32>
    %114 = arith.truncf %113 : vector<4x16x8xf32> to vector<4x16x8xbf16>
    %115 = tpu.concatenate %39, %64, %89, %114 in 2 : vector<4x16x8xbf16>, vector<4x16x8xbf16>, vector<4x16x8xbf16>, vector<4x16x8xbf16> -> vector<4x16x32xbf16>
    %116 = vector.shape_cast %115 : vector<4x16x32xbf16> to vector<64x32xbf16>
    %c0_32 = arith.constant 0 : index
    %c0_33 = arith.constant 0 : index
    %117 = vector.load %arg9[%c0_32, %c0_33] : memref<64x32xbf16, #tpu.memory_space<vmem>>, vector<64x32xbf16>
    tpu.vector_store %arg9[%c0_32, %c0_33], %116 {strides = array<i32>} : memref<64x32xbf16, #tpu.memory_space<vmem>>, vector<64x32xbf16>,
    %c0_34 = arith.constant 0 : index
    %c0_35 = arith.constant 0 : index
    %118 = vector.load %arg9[%c0_34, %c0_35] : memref<64x32xbf16, #tpu.memory_space<vmem>>, vector<64x32xbf16>
    %c0_36 = arith.constant 0 : index
    %c0_37 = arith.constant 0 : index
    %119 = vector.load %arg4[%c0_36, %c0_37] : memref<32x32xbf16, #tpu.memory_space<vmem>>, vector<32x32xbf16>
    %cst_38 = arith.constant dense<0.000000e+00> : vector<64x32xf32>
    %120 = tpu.matmul %118, %119, %cst_38 {dimension_numbers = #tpu.dot_dimension_numbers<[1], [0], [0], [1], [0, 0, 1, 1], [], []>} : vector<64x32xbf16>, vector<32x32xbf16>, vector<64x32xf32> -> vector<64x32xf32>
    %c0_39 = arith.constant 0 : index
    %c0_40 = arith.constant 0 : index
    %121 = vector.load %arg5[%c0_39, %c0_40] : memref<1x32xf32, #tpu.memory_space<vmem>>, vector<1x32xf32>
    %122 = vector.shape_cast %121 : vector<1x32xf32> to vector<32xf32>
    %123 = vector.shape_cast %122 : vector<32xf32> to vector<1x32xf32>
    %124 = vector.broadcast %123 : vector<1x32xf32> to vector<64x32xf32>
    %125 = arith.addf %120, %124 : vector<64x32xf32>
    %c0_41 = arith.constant 0 : index
    %c0_42 = arith.constant 0 : index
    %126 = vector.load %arg7[%c0_41, %c0_42] : memref<64x32xf32, #tpu.memory_space<vmem>>, vector<64x32xf32>
    tpu.vector_store %arg7[%c0_41, %c0_42], %125 {strides = array<i32>} : memref<64x32xf32, #tpu.memory_space<vmem>>, vector<64x32xf32>,
    return
  }
  func.func @transform_0(%arg0: i32) -> (i32, i32, i32) {
    %c0_i32 = arith.constant 0 : i32
    %c0_i32_0 = arith.constant 0 : i32
    %c0_i32_1 = arith.constant 0 : i32
    return %arg0, %c0_i32, %c0_i32_0 : i32, i32, i32
  }
  func.func @transform_1(%arg0: i32) -> (i32, i32) {
    %c0_i32 = arith.constant 0 : i32
    %c0_i32_0 = arith.constant 0 : i32
    %c0_i32_1 = arith.constant 0 : i32
    return %c0_i32, %c0_i32_0 : i32, i32
  }
  func.func @transform_2(%arg0: i32) -> (i32, i32) {
    %c0_i32 = arith.constant 0 : i32
    %c0_i32_0 = arith.constant 0 : i32
    %c0_i32_1 = arith.constant 0 : i32
    return %c0_i32, %c0_i32_0 : i32, i32
  }
  func.func @transform_3(%arg0: i32) -> (i32, i32) {
    %c0_i32 = arith.constant 0 : i32
    %c0_i32_0 = arith.constant 0 : i32
    %c0_i32_1 = arith.constant 0 : i32
    return %c0_i32, %c0_i32_0 : i32, i32
  }
  func.func @transform_4(%arg0: i32) -> (i32, i32) {
    %c0_i32 = arith.constant 0 : i32
    %c0_i32_0 = arith.constant 0 : i32
    %c0_i32_1 = arith.constant 0 : i32
    return %c0_i32, %c0_i32_0 : i32, i32
  }
  func.func @transform_5(%arg0: i32) -> (i32, i32, i32, i32) {
    %c0_i32 = arith.constant 0 : i32
    %c0_i32_0 = arith.constant 0 : i32
    %c0_i32_1 = arith.constant 0 : i32
    %c0_i32_2 = arith.constant 0 : i32
    %c0_i32_3 = arith.constant 0 : i32
    return %c0_i32, %c0_i32_0, %c0_i32_1, %c0_i32_2 : i32, i32, i32, i32
  }
  func.func @transform_6(%arg0: i32) -> (i32, i32) {
    %c0_i32 = arith.constant 0 : i32
    %c0_i32_0 = arith.constant 0 : i32
    return %arg0, %c0_i32 : i32, i32
  }
}

</mosaic_0001>

<bundles_post_ra>
// kernel: tpu_custom_call.1
= control target key start
LH: loop header
LB: loop body
LE: loop exit
PB: predicated region body
PF: predicated region fallthrough
CT: control target
= control target key end

     0   :  { %11 = vsyncpa [#allocation5], 0  ;;  %s4331_s0 = inlined_call_operand.hbm [shape: bf16[8,16,32], index: 0, kind: input, shape index: {}]   ;;  %s4332_s1 = inlined_call_operand.hbm [shape: bf16[32,96], index: 1, kind: input, shape index: {}]   ;;  %s4333_s2 = inlined_call_operand.vmem [shape: f32[1,96], index: 2, kind: input, shape index: {}]   ;;  %s4334_s3 = inlined_call_operand.hbm [shape: bf16[32,32], index: 3, kind: input, shape index: {}]   ;;  %s4335_s4 = inlined_call_operand.vmem [shape: f32[1,32], index: 4, kind: input, shape index: {}]   ;;  %s4336_s5 = inlined_call_operand.hbm [shape: f32[4,1,16,16], index: 5, kind: input, shape index: {}]   ;;  %s4337_s6 = inlined_call_operand.vmem [shape: f32[128,32], index: 6, kind: output, shape index: {}]  }
   0x1   :  { %13 = vsyncpa [#allocation5 + $0x1], 0 }
   0x2   :  { %14 = vsyncpa [#allocation7], 0 }
   0x3   :  { %15 = vsyncpa [#allocation10], 0  ;;  %s3515_s21 = smov 0   ;;  %s3517_s22 = smov 0  }
   0x4   :  { %s3519_s23 = smov 0   ;;  %s3521_s24 = smov 0  }
   0x5 LB: > { %s2701_s25 = sadd.s32 4294967295, %s3454_s24   ;;  %p41_p0 = scmp.ne.s32.totalorder %s3446_s22, %s3442_s21  ;;  %s3454_s24 = sphi %s3521_s24, %s4361_s24   ;;  %s3450_s23 = sphi %s3519_s23, %s4360_s23   ;;  %s3446_s22 = sphi %s3517_s22, %s4359_s22   ;;  %s3442_s21 = sphi %s3515_s21, %s4358_s21  }
   0x6   : > { %p3537_p1 = scmp.eq.s32.totalorder %s2701_s25, 0  ;;  %p2703_p2 = scmp.ge.s32.totalorder %s3454_s24, 1 }
   0x7   : > { %p183_p3 = scmp.lt.s32.totalorder %s3454_s24, 3  ;;  %s3456_s29 = smov [#allocation6]  }
   0x8   : > { %s4344_s26 = scalar_select %p3537_p1, 1, 0 }
   0x9   : > { %p3545_p4 = por %p3537_p1, %p41_p0  ;;  %p3549_p5 = pnand %p2703_p2, %p183_p3 }
   0xa   : > { %s195_s30 = sshll.u32 %s3456_s29, 4  ;;  %s3457_s8 = smov [#allocation8]   ;;  %s3553_s30 = int_to_ptr.vmem [resolvable:$true] %s195_s30 }
   0xb   : > { %s4345_s27 = scalar_select %p3545_p4, 1, 0 }
   0xc   : > { %s4346_s28 = scalar_select %p3549_p5, 1, 0 }
   0xd   : > { %p3083_p6 = pneg %p3549_p5  ;;  %s211_s9 = sshll.u32 %s3457_s8, 4  ;;  %s3563_s9 = int_to_ptr.vmem [resolvable:$true] %s211_s9 }
   0xe   : > { %s3458_s10 = smov [#allocation9]   ;;  %s3298_s14 = scalar_lea.hbm %s4332_s1, 256 }
   0xf   : > { %p3559_p7 = pnand %p3083_p6, %p3537_p1  ;;  %s3565_s11 = sshll.u32 %s3458_s10, 4  ;;  %s228_s11 = int_to_ptr.vmem [resolvable:$true] %s3565_s11 }
  0x10   : > { %p3299_p8 = scmp.ne.s32.totalorder %s4332_s1, %s3298_s14  ;;  %p3305_p12 = scmp.lt.u32.totalorder %s3298_s14, %s4332_s1 }
  0x11   : > { %p3575_p9 = pneg %p3559_p7 }
  0x13   : > { %p3301_p10 = pnand %p3575_p9, %p3299_p8 }
  0x15   : > { %p3302_p11 = pneg %p3301_p10 }
  0x17   : > { %p3307_p13 = pnand %p3305_p12, %p3302_p11 }
  0x19   : > { %3310 = shalt.err (!%p3307_p13)
}
  0x1a   : > { %s3311_s20 = scalar_lea.vmem %s3553_s30, 256  ;;  %p3319_p6 = scmp.lt.s32.totalorder %s3553_s30, %s3553_s30 }
  0x1b   : > { %p3312_p0 = scmp.ne.s32.totalorder %s3553_s30, %s3311_s20  ;;  %p3320_p1 = scmp.lt.s32.totalorder %s3311_s20, %s3311_s20 }
  0x1d   : > { %p3314_p2 = pnand %p3312_p0, %p3575_p9  ;;  %p3321_p8 = por %p3320_p1, %p3319_p6 }
  0x1f   : > { %p3315_p3 = pneg %p3314_p2 }
  0x21   : > { %p3322_p10 = pnand %p3321_p8, %p3315_p3 }
  0x23   : > { %3325 = shalt.err (!%p3322_p10)
}
  0x24   : > { %s3459_s21 = smov 64   ;;  %s3460_s29 = smov 4  }
  0x25   : > { %3086 = dma.hbm_to_vmem [thread:$0]  (!%p3559_p7), %s4332_s1, 256, %s3553_s30, [#allocation7], %s3459_s21, %s3459_s21, %s3460_s29  }
  0x26   : > { %s3326_s14 = scalar_lea.hbm %s4334_s3, 256 }
  0x27   : > { %p3327_p1 = scmp.ne.s32.totalorder %s4334_s3, %s3326_s14  ;;  %p3333_p13 = scmp.lt.u32.totalorder %s3326_s14, %s4334_s3 }
  0x29   : > { %p3329_p11 = pnand %p3327_p1, %p3575_p9 }
  0x2b   : > { %p3330_p12 = pneg %p3329_p11 }
  0x2d   : > { %p3335_p0 = pnand %p3333_p13, %p3330_p12 }
  0x2f   : > { %3338 = shalt.err (!%p3335_p0)
}
  0x30   : > { %s3339_s30 = scalar_lea.vmem %s3563_s9, 256  ;;  %p3347_p8 = scmp.lt.s32.totalorder %s3563_s9, %s3563_s9 }
  0x31   : > { %p3340_p2 = scmp.ne.s32.totalorder %s3563_s9, %s3339_s30  ;;  %p3348_p10 = scmp.lt.s32.totalorder %s3339_s30, %s3339_s30 }
  0x33   : > { %p3342_p3 = pnand %p3340_p2, %p3575_p9  ;;  %p3349_p1 = por %p3348_p10, %p3347_p8 }
  0x35   : > { %p3343_p6 = pneg %p3342_p3 }
  0x37   : > { %p3350_p11 = pnand %p3349_p1, %p3343_p6 }
  0x39   : > { %3353 = shalt.err (!%p3350_p11)
}
  0x3a   : > { %3089 = dma.hbm_to_vmem [thread:$0]  (!%p3559_p7), %s4334_s3, 256, %s3563_s9, [#allocation7], %s3459_s21, %s3459_s21, %s3460_s29  }
  0x3b   : > { %s3354_s13 = scalar_lea.hbm %s4336_s5, 1024 }
  0x3c   : > { %p3355_p12 = scmp.ne.s32.totalorder %s4336_s5, %s3354_s13  ;;  %p3361_p2 = scmp.lt.u32.totalorder %s3354_s13, %s4336_s5 }
  0x3e   : > { %p3357_p13 = pnand %p3355_p12, %p3575_p9 }
  0x40   : > { %p3358_p0 = pneg %p3357_p13 }
  0x42   : > { %p3363_p3 = pnand %p3361_p2, %p3358_p0 }
  0x44   : > { %3366 = shalt.err (!%p3363_p3)
}
  0x45   : > { %s3367_s19 = scalar_lea.vmem %s228_s11, 1024  ;;  %p3375_p1 = scmp.lt.s32.totalorder %s228_s11, %s228_s11 }
  0x46   : > { %p3368_p6 = scmp.ne.s32.totalorder %s228_s11, %s3367_s19  ;;  %p3376_p11 = scmp.lt.s32.totalorder %s3367_s19, %s3367_s19 }
  0x48   : > { %p3370_p8 = pnand %p3368_p6, %p3575_p9  ;;  %p3377_p4 = por %p3376_p11, %p3375_p1 }
  0x4a   : > { %p3371_p10 = pneg %p3370_p8 }
  0x4c   : > { %p3378_p5 = pnand %p3377_p4, %p3371_p10 }
  0x4e   : > { %3381 = shalt.err (!%p3378_p5)
}
  0x4f   : > { %s3461_s9 = smov 128   ;;  %s3462_s17 = smov 8  }
  0x50   : > { %3092 = dma.hbm_to_vmem [thread:$0]  (!%p3559_p7), %s4336_s5, 1024, %s228_s11, [#allocation10], %s3461_s9, %s3461_s9, %s3462_s17  }
  0x51   : > { %s3645_s8 = sadd.s32 1, %s3454_s24   ;;  %s28_s12 = sadd.s32 1, %s3450_s23 }
  0x52   : > { %s25_s10 = ssub.s32 %s3454_s24, %s3645_s8  ;;  %p35_p5 = scmp.ne.s32.totalorder %s3450_s23, %s3446_s22 }
  0x53   : > { %p26_p4 = scmp.eq.s32.totalorder %s25_s10, 0  ;;  %p36_p9 = scmp.eq.s32.totalorder %s3454_s24, 0 }
  0x54   : > { %p3100_p12 = scmp.lt.s32.totalorder %s3454_s24, 2  ;;  %s241_s14 = sand.u32 1, %s3450_s23  }
  0x55   : > { %s3655_s13 = scalar_select %p26_p4, %s3450_s23, %s28_s12  }
  0x56   : > { %p37_p13 = por %p36_p9, %p35_p5  ;;  %s2708_s15 = sshll.u32 %s241_s14, 5 }
  0x57   : > { %s2772_s16 = sshll.u32 %s3454_s24, 9  ;;  %s245_s11 = scalar_lea.vmem [#allocation4], %s2708_s15 }
  0x58   : > { %s3662_s19 = scalar_lea.hbm %s4331_s0, %s2772_s16  ;;  %s253_s9 = sshll.u32 %s245_s11, 4  ;;  %s3664_s9 = int_to_ptr.vmem [resolvable:$true] %s253_s9 }
  0x59   : > { %p3666_p7 = pnand %p3100_p12, %p37_p13  ;;  %s3670_s30 = scalar_lea.sflag [#allocation5], %s241_s14 }
  0x5a   : > { %s3382_s20 = scalar_lea.hbm %s3662_s19, 512  ;;  %s3387_s15 = scalar_lea.hbm %s4331_s0, 1024 }
  0x5b   : > { %p3383_p0 = scmp.ne.s32.totalorder %s3662_s19, %s3382_s20  ;;  %p3384_p2 = pneg %p3666_p7 }
  0x5c   : > { %p3388_p8 = scmp.lt.u32.totalorder %s3662_s19, %s4331_s0  ;;  %p3389_p10 = scmp.lt.u32.totalorder %s3387_s15, %s3382_s20 }
  0x5d   : > { %p3385_p3 = pnand %p3384_p2, %p3383_p0  ;;  %p3391_p11 = scmp.lt.u32.totalorder %s3382_s20, %s3662_s19 }
  0x5e   : > { %p3390_p1 = por %p3389_p10, %p3388_p8 }
  0x5f   : > { %p3386_p6 = pneg %p3385_p3 }
  0x60   : > { %p3392_p4 = por %p3391_p11, %p3390_p1 }
  0x62   : > { %p3393_p5 = pnand %p3392_p4, %p3386_p6 }
  0x64   : > { %3396 = shalt.err (!%p3393_p5)
}
  0x65   : > { %s3397_s14 = scalar_lea.vmem %s3664_s9, 512  ;;  %s3463_s18 = smov [#allocation4]  }
  0x66   : > { %p3398_p9 = scmp.ne.s32.totalorder %s3664_s9, %s3397_s14  ;;  %s3402_s11 = sshll.u32 %s3463_s18, 4  ;;  %s3403_s11 = int_to_ptr.vmem [resolvable:$false] %s3402_s11 }
  0x67   : > { %s3404_s10 = scalar_lea.vmem %s3403_s11, 1024  ;;  %p3405_p0 = scmp.lt.s32.totalorder %s3664_s9, %s3403_s11 }
  0x68   : > { %p3400_p12 = pnand %p3398_p9, %p3384_p2  ;;  %p3406_p3 = scmp.lt.s32.totalorder %s3404_s10, %s3397_s14 }
  0x6a   : > { %p3401_p13 = pneg %p3400_p12  ;;  %p3407_p8 = por %p3406_p3, %p3405_p0 }
  0x6c   : > { %p3408_p10 = pnand %p3407_p8, %p3401_p13 }
  0x6e   : > { %3411 = shalt.err (!%p3408_p10)
}
  0x6f   : > { %3096 = dma.hbm_to_vmem [thread:$0]  (!%p3666_p7), %s3662_s19, 512, %s3664_s9, %s3670_s30, %s3459_s21, %s3459_s21, %s3460_s29  }
  0x70   : > { %p4350_p2 = scmp.ne.s32.totalorder %s4346_s28, 0 }
  0x72   : > { %265 = sbr.rel (%p4350_p2) target bundleno = 2672 (0xa70), region = 44 }
  0x79   : > { %s267_s20 = sand.u32 1, %s3446_s22   ;;  %p4351_p6 = scmp.ne.s32.totalorder %s4345_s27, 0 }
  0x7a   : > { %s2713_s12 = sshll.u32 %s267_s20, 5  ;;  %s268_s15 = scalar_lea.sflag [#allocation5], %s267_s20 }
  0x7b   : > { %s271_s16 = scalar_lea.vmem [#allocation4], %s2713_s12 }
  0x7c   : > { %3429 = dma.done.wait (%p4351_p6), %s268_s15, 512  }
  0x7d   : > { %3431 = vsyncadd (%p4351_p6), %s268_s15, 4294966784  ;;  %p4352_p1 = scmp.ne.s32.totalorder %s4344_s26, 0 }
  0x7f   : > { %3433 = dma.done.wait (%p4352_p1), [#allocation7], 512  }
  0x80   : > { %3435 = vsyncadd (%p4352_p1), [#allocation7], 4294966784 }
  0x81   : > { %3437 = dma.done.wait (%p4352_p1), [#allocation10], 1024  }
  0x82   : > { %3439 = vsyncadd (%p4352_p1), [#allocation10], 4294966272  ;;  %v3159_v0 = vld [vmem:[#allocation6] sm:$0xff]   ;;  %v3160_v1 = vld [vmem:[#allocation6 + $0x8] sm:$0xff]   ;;  %vm371_vm0 = vcmask 261120   ;;  %v4342_v20 = vmov 0.0  }
  0x83   : > { %2849 = vmatprep.subr.bf16.mxu0 %v3159_v0  ;;  %3065 = vmatprep.subr.bf16.mxu1 %v3159_v0  ;;  %v3161_v2 = vld [vmem:[%s271_s16] sm:$0xff]   ;;  %v3162_v3 = vld [vmem:[%s271_s16 + $0x10] sm:$0xff]   ;;  %v3163_v4 = vld [vmem:[%s271_s16 + $0x8] sm:$0xff]   ;;  %vm453_vm1 = vcmask 785408   ;;  %vm3465_vm2 = vmmov 0   ;;  %s3466_s28 = smov 96  }
  0x84   : > { %2850 = vmatpush3.bf16.msra.mxu0 %v3159_v0  ;;  %3067 = vmatpush3.bf16.msra.mxu1 %v3159_v0  ;;  %v3164_v5 = vld [vmem:[%s271_s16 + $0x18] sm:$0xff]   ;;  %v2719_v7 = vld [vmem:[%s4333_s2] ss:$0 sm:$0xff]  ;;  %s3467_s21 = smov 64   ;;  %vm473_vm3 = vcmask 64512   ;;  %v463_v44 = vld [vmem:[#allocation9 + $0x8] sm:$0xff] }
  0x85   : > { %2851 = vmatprep.subr.bf16.mxu0 %v3160_v1  ;;  %3066 = vmatprep.subr.bf16.mxu1 %v3160_v1  ;;  %v462_v41 = vld [vmem:[#allocation9] sm:$0xff]  ;;  %vm671_vm4 = vcmask 130048   ;;  %s3468_s29 = smov 88   ;;  %s3469_s19 = smov 120   ;;  %vm2476_vm5 = vcmask 195584  }
  0x86   : > { %2853 = vmatprep.mubr.msk.bf16.mxu0 %vm371_vm0, %v3161_v2  ;;  %2857 = vmatprep.mubr.msk.bf16.mxu1 %vm371_vm0, %v3162_v3  ;;  %s3470_s9 = smov 56   ;;  %s3471_s17 = smov 80  }
  0x87   : > { %s3472_s30 = smov 112   ;;  %s3473_s7 = smov 48  }
  0x88   : > { %2852 = vmatpush3.bf16.msra.mxu0 %v3160_v1  ;;  %3068 = vmatpush3.bf16.msra.mxu1 %v3160_v1  ;;  %s3474_s14 = smov 72   ;;  %s3475_s18 = smov 104  }
  0x89   : > { %2861 = vmatprep.subr.bf16.mxu1 %v4342_v20  ;;  %2873 = vmatprep.subr.bf16.mxu0 %v4342_v20  ;;  %s3476_s11 = smov 40   ;;  %s3477_s10 = smov 8  }
  0x8a   : > { %s3478_s20 = smov 16   ;;  %s3479_s12 = smov 24  }
  0x8b   : > { %2854 = vmatmul.mubr.msk.bf16.vlgmr.msra.gmra.mrb[0].mxu0 %vm371_vm0, %v3163_v4  ;;  %2858 = vmatmul.mubr.msk.bf16.vlgmr.msra.gmra.mrb[0].mxu1 %vm371_vm0, %v3164_v5  ;;  %s2717_s15 = sshll.u32 %s2701_s25, 3 }
  0x8c   : > { %2863 = vmatprep.mubr.msk.bf16.mxu1 %vm3465_vm2, %v4342_v20  ;;  %2875 = vmatprep.mubr.msk.bf16.mxu0 %vm3465_vm2, %v4342_v20  ;;  %p314_p7 = scmp.lt.s32.totalorder %s2717_s15, 15 }
  0x8e   : > { %s4363_s15 = smov (!%p314_p7, %s2717_s15), 15 }
  0x8f   : > { %s2718_s16 = sshll.u32 %s4363_s15, 3 }
 0x15e   : > { %v2855_v6 = vpop.f32.mrb[0].mxu0  ;;  %v2859_v8 = vpop.f32.mrb[0].mxu1 }
 0x15f   : > { %v443_v9 = vadd.f32 %v2859_v8, %v2719_v7  ;;  %v418_v10 = vpop.f32.mrb[1].mxu0  ;;  %v434_v11 = vpop.f32.mrb[1].mxu1  ;;  %v427_v15 = vadd.f32 %v2855_v6, %v2719_v7 }
 0x160   : > { %v435_v12 = vadd.f32 %v2719_v7, %v434_v11  ;;  %v2856_v13 = vpop.f32.mrb[2].mxu0  ;;  %v2860_v14 = vpop.f32.mrb[2].mxu1  ;;  %v419_v21 = vadd.f32 %v2719_v7, %v418_v10 }
 0x161   : > { %v430_v16 = vadd.f32 %v2856_v13, %v2719_v7  ;;  %v446_v17 = vadd.f32 %v2860_v14, %v2719_v7  ;;  %v421_v18 = vpop.f32.mrb[3].mxu0  ;;  %v437_v19 = vpop.f32.mrb[3].mxu1 }
 0x162   : > { %v422_v22 = vadd.f32 %v2719_v7, %v421_v18  ;;  %v438_v23 = vadd.f32 %v2719_v7, %v437_v19 }
 0x163   : > { %v450_v24 = vpack.c.bf16 %v430_v16, %v427_v15  ;;  %v452_v25 = vpack.c.bf16 %v446_v17, %v443_v9 }
 0x164   : > { %v449_v26 = vpack.c.bf16 %v422_v22, %v419_v21  ;;  %v451_v27 = vpack.c.bf16 %v438_v23, %v435_v12 }
 0x165   : > { %455 = vst.msk [vmem:[#allocation2 + $0x8] sm:$0xff] %vm453_vm1, %v450_v24  ;;  %457 = vst.msk [vmem:[#allocation2 + $0x18] sm:$0xff] %vm453_vm1, %v452_v25 }
 0x166   : > { %454 = vst.msk [vmem:[#allocation2] sm:$0xff] %vm453_vm1, %v449_v26  ;;  %456 = vst.msk [vmem:[#allocation2 + $0x10] sm:$0xff] %vm453_vm1, %v451_v27 }
 0x16c   : > { %v3735_v30 = vld [vmem:[#allocation2 + $0x18] sm:$0xff]  ;;  %v3737_v31 = vld [vmem:[#allocation2 + $0x8] sm:$0xff] }
 0x16d   : > { %v3729_v28 = vld [vmem:[#allocation2 + $0x10] sm:$0xff]  ;;  %v3731_v29 = vld [vmem:[#allocation2] sm:$0xff] }
 0x16e   : > { %572 = vrot.lane.b32.xlu1 %v3729_v28, %s3466_s28  ;;  %471 = vrot.lane.b32.xlu0 %v3731_v29, %s3466_s28 }
 0x172   : > { %622 = vrot.lane.b32.xlu1 %v3735_v30, %s3466_s28  ;;  %522 = vrot.lane.b32.xlu0 %v3737_v31, %s3466_s28 }
 0x176   : > { %748 = vrot.lane.b32.xlu1 %v3731_v29, %s3467_s21 }
 0x1e0   : > { %v573_v32 = vpop.permute.xlu1 %572  ;;  %v472_v33 = vpop.permute.xlu0 %471 }
 0x1e1   : > { %v578_v34 = vsel %vm473_vm3, %v573_v32, 0  ;;  %v478_v35 = vsel %vm473_vm3, %v472_v33, 0 }
 0x1e2   : > { %2862 = vmatpush3.bf16.xpose.msra.mxu1 %v478_v35  ;;  %2874 = vmatpush3.bf16.xpose.msra.mxu0 %v578_v34 }
 0x1e3   : > { %2867 = vmatprep.subr.bf16.mxu1 %v4342_v20  ;;  %2885 = vmatprep.subr.bf16.mxu0 %v4342_v20 }
 0x1e4   : > { %v623_v36 = vpop.permute.xlu1 %622  ;;  %v523_v37 = vpop.permute.xlu0 %522 }
 0x1e5   : > { %v528_v39 = vsel %vm473_vm3, %v523_v37, 0  ;;  %v628_v40 = vsel %vm473_vm3, %v623_v36, 0 }
 0x1e8   : > { %v749_v38 = vpop.permute.xlu1 %748 }
 0x1e9   : > { %2864 = vmatmul.mubr.msk.bf16.vlgmr.msra.gmra.mrb[4].mxu1 %vm473_vm3, %v3731_v29  ;;  %2876 = vmatmul.mubr.msk.bf16.vlgmr.msra.gmra.mrb[4].mxu0 %vm473_vm3, %v3729_v28 }
 0x1ea   : > { %2868 = vmatpush3.bf16.xpose.msra.mxu1 %v528_v39  ;;  %2886 = vmatpush3.bf16.msra.mxu0 %v749_v38 }
 0x1eb   : > { %2869 = vmatprep.mubr.msk.bf16.mxu1 %vm3465_vm2, %v4342_v20  ;;  %2879 = vmatprep.subr.bf16.mxu1 %v4342_v20 }
 0x1ec   : > { %2887 = vmatprep.mubr.msk.bf16.mxu0 %vm3465_vm2, %v4342_v20  ;;  %2897 = vmatprep.subr.bf16.mxu0 %v4342_v20 }
 0x1f1   : > { %2870 = vmatmul.mubr.msk.bf16.vlgmr.msra.gmra.mrb[8].mxu1 %vm473_vm3, %v3737_v31 }
 0x1f2   : > { %2880 = vmatpush3.bf16.xpose.msra.mxu1 %v628_v40  ;;  %2881 = vmatprep.mubr.msk.bf16.mxu1 %vm3465_vm2, %v4342_v20 }
 0x1f3   : > { %2891 = vmatprep.subr.bf16.mxu1 %v4342_v20 }
 0x1f9   : > { %2882 = vmatmul.mubr.msk.bf16.vlgmr.msra.gmra.mrb[12].mxu1 %vm473_vm3, %v3735_v30 }
 0x1fa   : > { %2893 = vmatprep.mubr.msk.bf16.mxu1 %vm3465_vm2, %v4342_v20 }
 0x2bc   : > { %v514_v42 = vpop.f32.mrb[4].mxu1  ;;  %v614_v43 = vpop.f32.mrb[4].mxu0 }
 0x2bd   : > { %v515_v45 = vadd.f32 %v514_v42, %v462_v41  ;;  %v3768_v46 = vadd.f32 %v614_v43, %v462_v41  ;;  %v2865_v47 = vpop.f32.mrb[5].mxu1  ;;  %v2877_v48 = vpop.f32.mrb[5].mxu0 }
 0x2be   : > { %v517_v49 = vpop.f32.mrb[6].mxu1  ;;  %v617_v50 = vpop.f32.mrb[6].mxu0 }
 0x2bf   : > { %v518_v51 = vadd.f32 %v517_v49, %v463_v44  ;;  %v3770_v52 = vadd.f32 %v617_v50, %v463_v44  ;;  %v2866_v53 = vpop.f32.mrb[7].mxu1  ;;  %v2878_v54 = vpop.f32.mrb[7].mxu0  ;;  %v684_v55 = vsel %vm671_vm4, %v3768_v46, -inf  ;;  %v672_v56 = vsel %vm671_vm4, %v515_v45, -inf }
 0x2c0   : > { %685 = vmax.xlane.f32.xlu1 %v684_v55  ;;  %673 = vmax.xlane.f32.xlu0 %v672_v56 }
 0x2c1   : > { %v687_v57 = vsel %vm671_vm4, %v3770_v52, -inf  ;;  %v675_v58 = vsel %vm671_vm4, %v518_v51, -inf }
 0x2c4   : > { %688 = vmax.xlane.f32.xlu0 %v687_v57  ;;  %676 = vmax.xlane.f32.xlu1 %v675_v58  ;;  %v564_v59 = vpop.f32.mrb[8].mxu1 }
 0x2c5   : > { %v565_v60 = vadd.f32 %v564_v59, %v462_v41  ;;  %v2871_v61 = vpop.f32.mrb[9].mxu1 }
 0x2c6   : > { %v567_v62 = vpop.f32.mrb[10].mxu1 }
 0x2c7   : > { %v568_v63 = vadd.f32 %v567_v62, %v463_v44  ;;  %v2872_v0 = vpop.f32.mrb[11].mxu1  ;;  %v678_v1 = vsel %vm671_vm4, %v565_v60, -inf }
 0x2c8   : > { %679 = vmax.xlane.f32.xlu0 %v678_v1 }
 0x2c9   : > { %v681_v2 = vsel %vm671_vm4, %v568_v63, -inf }
 0x2cc   : > { %682 = vmax.xlane.f32.xlu0 %v681_v2  ;;  %v664_v3 = vpop.f32.mrb[12].mxu1 }
 0x2cd   : > { %v2883_v4 = vpop.f32.mrb[13].mxu1  ;;  %v3786_v7 = vadd.f32 %v664_v3, %v462_v41 }
 0x2ce   : > { %v667_v5 = vpop.f32.mrb[14].mxu1 }
 0x2cf   : > { %v2884_v6 = vpop.f32.mrb[15].mxu1  ;;  %v3788_v8 = vadd.f32 %v667_v5, %v463_v44  ;;  %v690_v9 = vsel %vm671_vm4, %v3786_v7, -inf }
 0x2d1   : > { %v693_v10 = vsel %vm671_vm4, %v3788_v8, -inf }
 0x2d5   : > { %842 = vrot.lane.b32.xlu1 %v3729_v28, %s3467_s21 }
 0x2d9   : > { %889 = vrot.lane.b32.xlu1 %v3735_v30, %s3467_s21 }
 0x2e2   : > { %795 = vrot.lane.b32.xlu0 %v3737_v31, %s3467_s21 }
 0x2fd   : > { %691 = vmax.xlane.f32.xlu1 %v690_v9 }
 0x301   : > { %694 = vmax.xlane.f32.xlu0 %v693_v10 }
 0x30e   : > { %1009 = vrot.lane.b32.xlu1 %v3737_v31, %s3468_s29 }
 0x312   : > { %1060 = vrot.lane.b32.xlu1 %v3729_v28, %s3468_s29 }
 0x316   : > { %1111 = vrot.lane.b32.xlu1 %v3735_v30, %s3468_s29 }
 0x317   : > { %958 = vrot.lane.b32.xlu0 %v3731_v29, %s3468_s29  ;;  %s317_s29 = scalar_lea.vmem %s4337_s6, %s2718_s16 }
 0x31a   : > { %1109 = vrot.lane.b32.xlu1 %v3735_v30, %s3469_s19 }
 0x31b   : > { %956 = vrot.lane.b32.xlu0 %v3731_v29, %s3469_s19 }
 0x31e   : > { %1236 = vrot.lane.b32.xlu1 %v3731_v29, %s3470_s9 }
 0x31f   : > { %1007 = vrot.lane.b32.xlu0 %v3737_v31, %s3469_s19 }
 0x322   : > { %1330 = vrot.lane.b32.xlu1 %v3729_v28, %s3470_s9 }
 0x323   : > { %1058 = vrot.lane.b32.xlu0 %v3729_v28, %s3469_s19 }
 0x326   : > { %1377 = vrot.lane.b32.xlu1 %v3735_v30, %s3470_s9 }
 0x327   : > { %1283 = vrot.lane.b32.xlu0 %v3737_v31, %s3470_s9 }
 0x34d   : > { %v686_v11 = vpop.xlane.xlu1 %685  ;;  %v674_v12 = vpop.xlane.xlu0 %673 }
 0x34e   : > { %v696_v13 = vsub.f32 %v515_v45, %v674_v12  ;;  %v700_v18 = vsub.f32 %v3768_v46, %v686_v11 }
 0x350   : > { %v704_v14 = vmul.f32 1.442695, %v696_v13  ;;  %v712_v24 = vmul.f32 1.442695, %v700_v18 }
 0x351   : > { %v677_v15 = vpop.xlane.xlu1 %676  ;;  %v689_v16 = vpop.xlane.xlu0 %688 }
 0x352   : > { %v697_v17 = vsub.f32 %v518_v51, %v677_v15  ;;  %v701_v21 = vsub.f32 %v3770_v52, %v689_v16  ;;  %3167 = vpow2.f32 %v704_v14 }
 0x354   : > { %v706_v19 = vmul.f32 1.442695, %v697_v17  ;;  %v714_v25 = vmul.f32 1.442695, %v701_v21  ;;  %v464_v17 = vld [vmem:[#allocation9 + $0x10] sm:$0xff] }
 0x355   : > { %v680_v22 = vpop.xlane.xlu0 %679  ;;  %v843_v38 = vpop.permute.xlu1 %842 }
 0x356   : > { %3169 = vpow2.f32 %v706_v19  ;;  %v698_v23 = vsub.f32 %v565_v60, %v680_v22  ;;  %v465_v19 = vld [vmem:[#allocation9 + $0x18] sm:$0xff] }
 0x357   : > { %3171 = vpow2.f32 %v712_v24 }
 0x358   : > { %v708_v26 = vmul.f32 1.442695, %v698_v23  ;;  %3173 = vpow2.f32 %v714_v25 }
 0x359   : > { %v683_v27 = vpop.xlane.xlu0 %682  ;;  %v890_v45 = vpop.permute.xlu1 %889 }
 0x35a   : > { %v699_v32 = vsub.f32 %v568_v63, %v683_v27  ;;  %3175 = vpow2.f32 %v708_v26 }
 0x35c   : > { %v710_v33 = vmul.f32 1.442695, %v699_v32  ;;  %v3808_v35 = vpop.eup %3167 }
 0x35d   : > { %v796_v34 = vpop.permute.xlu0 %795 }
 0x35e   : > { %3177 = vpow2.f32 %v710_v33  ;;  %2892 = vmatpush3.bf16.msra.mxu1 %v796_v34 }
 0x35f   : > { %2903 = vmatprep.subr.bf16.mxu1 %v4342_v20 }
 0x360   : > { %v3811_v36 = vpop.eup %3169 }
 0x361   : > { %v744_v37 = vpack.c.bf16 %v3811_v36, %v3808_v35  ;;  %v3818_v39 = vpop.eup %3171 }
 0x362   : > { %v3821_v40 = vpop.eup %3173 }
 0x363   : > { %2888 = vmatmul.mubr.msk.bf16.vlgmr.msra.gmra.mrb[8].mxu0 %vm671_vm4, %v744_v37  ;;  %v746_v44 = vpack.c.bf16 %v3821_v40, %v3818_v39 }
 0x364   : > { %2898 = vmatpush3.bf16.msra.mxu0 %v843_v38  ;;  %2899 = vmatprep.mubr.msk.bf16.mxu0 %vm3465_vm2, %v4342_v20  ;;  %v3823_v41 = vpop.eup %3175 }
 0x365   : > { %2909 = vmatprep.subr.bf16.mxu0 %v4342_v20 }
 0x368   : > { %v3825_v42 = vpop.eup %3177 }
 0x369   : > { %v745_v43 = vpack.c.bf16 %v3825_v42, %v3823_v41 }
 0x36b   : > { %2894 = vmatmul.mubr.msk.bf16.vlgmr.msra.gmra.mrb[16].mxu1 %vm671_vm4, %v745_v43  ;;  %2900 = vmatmul.mubr.msk.bf16.vlgmr.msra.gmra.mrb[12].mxu0 %vm671_vm4, %v746_v44 }
 0x36c   : > { %2904 = vmatpush3.bf16.msra.mxu1 %v890_v45  ;;  %2911 = vmatprep.mubr.msk.bf16.mxu0 %vm3465_vm2, %v4342_v20 }
 0x36d   : > { %2905 = vmatprep.mubr.msk.bf16.mxu1 %vm3465_vm2, %v4342_v20  ;;  %2915 = vmatprep.subr.bf16.mxu1 %v4342_v20 }
 0x38a   : > { %v692_v46 = vpop.xlane.xlu1 %691 }
 0x38b   : > { %v702_v47 = vsub.f32 %v3786_v7, %v692_v46 }
 0x38d   : > { %v716_v48 = vmul.f32 1.442695, %v702_v47 }
 0x38e   : > { %v1010_v49 = vpop.permute.xlu1 %1009  ;;  %v695_v50 = vpop.xlane.xlu0 %694 }
 0x38f   : > { %v703_v51 = vsub.f32 %v3788_v8, %v695_v50  ;;  %3179 = vpow2.f32 %v716_v48  ;;  %v1015_v0 = vsel %vm473_vm3, %v1010_v49, 0 }
 0x391   : > { %v718_v52 = vmul.f32 1.442695, %v703_v51 }
 0x392   : > { %v1061_v53 = vpop.permute.xlu1 %1060  ;;  %v959_v54 = vpop.permute.xlu0 %958 }
 0x393   : > { %3181 = vpow2.f32 %v718_v52  ;;  %v964_v55 = vsel %vm473_vm3, %v959_v54, 0  ;;  %v1066_v58 = vsel %vm473_vm3, %v1061_v53, 0 }
 0x394   : > { %2910 = vmatpush3.bf16.xpose.msra.mxu0 %v964_v55 }
 0x395   : > { %2921 = vmatprep.subr.bf16.mxu0 %v4342_v20 }
 0x396   : > { %v957_v56 = vpop.permute.xlu0 %956  ;;  %v1112_v57 = vpop.permute.xlu1 %1111 }
 0x397   : > { %v1117_v3 = vsel %vm473_vm3, %v1112_v57, 0 }
 0x399   : > { %v3844_v59 = vpop.eup %3179 }
 0x39a   : > { %v1008_v60 = vpop.permute.xlu0 %1007  ;;  %v1110_v62 = vpop.permute.xlu1 %1109 }
 0x39b   : > { %2912 = vmatmul.mubr.msk.bf16.vlgmr.msra.gmra.mrb[16].mxu0 %vm473_vm3, %v957_v56 }
 0x39c   : > { %2922 = vmatpush3.bf16.xpose.msra.mxu0 %v1066_v58  ;;  %2923 = vmatprep.mubr.msk.bf16.mxu0 %vm3465_vm2, %v4342_v20 }
 0x39d   : > { %v3848_v61 = vpop.eup %3181  ;;  %2933 = vmatprep.subr.bf16.mxu0 %v4342_v20 }
 0x39e   : > { %v747_v63 = vpack.c.bf16 %v3848_v61, %v3844_v59  ;;  %v1059_v1 = vpop.permute.xlu0 %1058  ;;  %v1237_v2 = vpop.permute.xlu1 %1236 }
 0x3a0   : > { %2906 = vmatmul.mubr.msk.bf16.vlgmr.msra.gmra.mrb[20].mxu1 %vm671_vm4, %v747_v63 }
 0x3a1   : > { %2916 = vmatpush3.bf16.xpose.msra.mxu1 %v1015_v0  ;;  %2917 = vmatprep.mubr.msk.bf16.mxu1 %vm3465_vm2, %v4342_v20 }
 0x3a2   : > { %2927 = vmatprep.subr.bf16.mxu1 %v4342_v20  ;;  %v1284_v4 = vpop.permute.xlu0 %1283 }
 0x3a3   : > { %2924 = vmatmul.mubr.msk.bf16.vlgmr.msra.gmra.mrb[20].mxu0 %vm473_vm3, %v1059_v1 }
 0x3a4   : > { %2934 = vmatpush3.bf16.msra.mxu0 %v1237_v2  ;;  %2935 = vmatprep.mubr.msk.bf16.mxu0 %vm3465_vm2, %v4342_v20 }
 0x3a5   : > { %2945 = vmatprep.subr.bf16.mxu0 %v4342_v20 }
 0x3a8   : > { %2918 = vmatmul.mubr.msk.bf16.vlgmr.msra.gmra.mrb[24].mxu1 %vm473_vm3, %v1008_v60 }
 0x3a9   : > { %2928 = vmatpush3.bf16.xpose.msra.mxu1 %v1117_v3  ;;  %2929 = vmatprep.mubr.msk.bf16.mxu1 %vm3465_vm2, %v4342_v20 }
 0x3aa   : > { %2939 = vmatprep.subr.bf16.mxu1 %v4342_v20 }
 0x3b0   : > { %2930 = vmatmul.mubr.msk.bf16.vlgmr.msra.gmra.mrb[28].mxu1 %vm473_vm3, %v1110_v62 }
 0x3b1   : > { %2940 = vmatpush3.bf16.msra.mxu1 %v1284_v4  ;;  %2941 = vmatprep.mubr.msk.bf16.mxu1 %vm3465_vm2, %v4342_v20  ;;  %v1331_v4 = vpop.permute.xlu1 %1330 }
 0x3b2   : > { %2951 = vmatprep.subr.bf16.mxu1 %v4342_v20 }
 0x436   : > { %v3871_v5 = vpop.f32.mrb[8].mxu0 }
 0x437   : > { %v2889_v6 = vpop.f32.mrb[9].mxu0 }
 0x438   : > { %v3873_v7 = vpop.f32.mrb[10].mxu0  ;;  %v1378_v6 = vpop.permute.xlu1 %1377 }
 0x439   : > { %v2890_v8 = vpop.f32.mrb[11].mxu0 }
 0x43e   : > { %v3875_v9 = vpop.f32.mrb[16].mxu1  ;;  %v3877_v10 = vpop.f32.mrb[12].mxu0 }
 0x43f   : > { %v2895_v11 = vpop.f32.mrb[17].mxu1  ;;  %v2901_v12 = vpop.f32.mrb[13].mxu0 }
 0x440   : > { %v3879_v13 = vpop.f32.mrb[18].mxu1  ;;  %v3881_v14 = vpop.f32.mrb[14].mxu0 }
 0x441   : > { %v2896_v15 = vpop.f32.mrb[19].mxu1  ;;  %v2902_v16 = vpop.f32.mrb[15].mxu0 }
 0x46e   : > { %v1000_v18 = vpop.f32.mrb[16].mxu0 }
 0x46f   : > { %v3883_v21 = vadd.f32 %v1000_v18, %v464_v17  ;;  %v2913_v22 = vpop.f32.mrb[17].mxu0 }
 0x470   : > { %v1003_v23 = vpop.f32.mrb[18].mxu0 }
 0x471   : > { %v1004_v24 = vadd.f32 %v1003_v23, %v465_v19  ;;  %v2914_v25 = vpop.f32.mrb[19].mxu0  ;;  %v1160_v26 = vsel %vm671_vm4, %v3883_v21, -inf }
 0x472   : > { %1161 = vmax.xlane.f32.xlu0 %v1160_v26 }
 0x473   : > { %v3887_v27 = vpop.f32.mrb[20].mxu1  ;;  %v1163_v32 = vsel %vm671_vm4, %v1004_v24, -inf }
 0x474   : > { %4353 = vst [vmem:[#allocation14_spill] sm:$0xff] %v3887_v27  ;;  %v2907_v33 = vpop.f32.mrb[21].mxu1  ;;  %1164 = vmax.xlane.f32.xlu1 %v1163_v32 }
 0x475   : > { %v3890_v34 = vpop.f32.mrb[22].mxu1 }
 0x476   : > { %4354 = vst [vmem:[#allocation15_spill] sm:$0xff] %v3890_v34  ;;  %v2908_v37 = vpop.f32.mrb[23].mxu1  ;;  %v1102_v38 = vpop.f32.mrb[20].mxu0 }
 0x477   : > { %v3892_v43 = vadd.f32 %v1102_v38, %v464_v17  ;;  %v2925_v44 = vpop.f32.mrb[21].mxu0 }
 0x478   : > { %v1105_v45 = vpop.f32.mrb[22].mxu0 }
 0x479   : > { %v2926_v46 = vpop.f32.mrb[23].mxu0  ;;  %v1172_v47 = vsel %vm671_vm4, %v3892_v43, -inf  ;;  %v1106_v55 = vadd.f32 %v1105_v45, %v465_v19 }
 0x47a   : > { %1173 = vmax.xlane.f32.xlu1 %v1172_v47 }
 0x47b   : > { %v1051_v48 = vpop.f32.mrb[24].mxu1  ;;  %v1175_v2 = vsel %vm671_vm4, %v1106_v55, -inf }
 0x47c   : > { %v1052_v49 = vadd.f32 %v1051_v48, %v464_v17  ;;  %v2919_v50 = vpop.f32.mrb[25].mxu1 }
 0x47d   : > { %v1054_v51 = vpop.f32.mrb[26].mxu1 }
 0x47e   : > { %v1055_v52 = vadd.f32 %v1054_v51, %v465_v19  ;;  %v2920_v53 = vpop.f32.mrb[27].mxu1  ;;  %v1166_v54 = vsel %vm671_vm4, %v1052_v49, -inf }
 0x47f   : > { %1167 = vmax.xlane.f32.xlu0 %v1166_v54 }
 0x480   : > { %v1169_v56 = vsel %vm671_vm4, %v1055_v52, -inf }
 0x483   : > { %1170 = vmax.xlane.f32.xlu0 %v1169_v56  ;;  %v1153_v57 = vpop.f32.mrb[28].mxu1 }
 0x484   : > { %v1154_v58 = vadd.f32 %v1153_v57, %v464_v17  ;;  %v2931_v60 = vpop.f32.mrb[29].mxu1 }
 0x485   : > { %v1156_v62 = vpop.f32.mrb[30].mxu1 }
 0x486   : > { %v1157_v63 = vadd.f32 %v1156_v62, %v465_v19  ;;  %v2932_v0 = vpop.f32.mrb[31].mxu1  ;;  %v1178_v1 = vsel %vm671_vm4, %v1154_v58, -inf }
 0x487   : > { %1179 = vmax.xlane.f32.xlu1 %v1178_v1  ;;  %1176 = vmax.xlane.f32.xlu0 %v1175_v2 }
 0x488   : > { %v1181_v3 = vsel %vm671_vm4, %v1157_v63, -inf }
 0x48b   : > { %1182 = vmax.xlane.f32.xlu0 %v1181_v3 }
 0x498   : > { %1497 = vrot.lane.b32.xlu1 %v3737_v31, %s3471_s17 }
 0x49c   : > { %1548 = vrot.lane.b32.xlu1 %v3729_v28, %s3471_s17 }
 0x4a0   : > { %1599 = vrot.lane.b32.xlu1 %v3735_v30, %s3471_s17 }
 0x4a1   : > { %1446 = vrot.lane.b32.xlu0 %v3731_v29, %s3471_s17 }
 0x4a4   : > { %1597 = vrot.lane.b32.xlu1 %v3735_v30, %s3472_s30 }
 0x4a5   : > { %1444 = vrot.lane.b32.xlu0 %v3731_v29, %s3472_s30 }
 0x4a8   : > { %1724 = vrot.lane.b32.xlu1 %v3731_v29, %s3473_s7 }
 0x4a9   : > { %1495 = vrot.lane.b32.xlu0 %v3737_v31, %s3472_s30 }
 0x4ac   : > { %1818 = vrot.lane.b32.xlu1 %v3729_v28, %s3473_s7 }
 0x4ad   : > { %1546 = vrot.lane.b32.xlu0 %v3729_v28, %s3472_s30 }
 0x4b0   : > { %1865 = vrot.lane.b32.xlu1 %v3735_v30, %s3473_s7 }
 0x4b1   : > { %1771 = vrot.lane.b32.xlu0 %v3737_v31, %s3473_s7 }
 0x4ff   : > { %v1162_v8 = vpop.xlane.xlu0 %1161 }
 0x500   : > { %v1184_v11 = vsub.f32 %v3883_v21, %v1162_v8 }
 0x501   : > { %v1165_v12 = vpop.xlane.xlu1 %1164 }
 0x502   : > { %v1192_v15 = vmul.f32 1.442695, %v1184_v11  ;;  %v1185_v16 = vsub.f32 %v1004_v24, %v1165_v12 }
 0x504   : > { %v1194_v17 = vmul.f32 1.442695, %v1185_v16  ;;  %3183 = vpow2.f32 %v1192_v15 }
 0x506   : > { %3185 = vpow2.f32 %v1194_v17 }
 0x507   : > { %v1174_v22 = vpop.xlane.xlu1 %1173 }
 0x508   : > { %v1188_v33 = vsub.f32 %v3892_v43, %v1174_v22 }
 0x50a   : > { %v1200_v45 = vmul.f32 1.442695, %v1188_v33 }
 0x50c   : > { %v1168_v18 = vpop.xlane.xlu0 %1167 }
 0x50d   : > { %v1186_v19 = vsub.f32 %v1052_v49, %v1168_v18 }
 0x50e   : > { %v3914_v23 = vpop.eup %3183 }
 0x50f   : > { %v1196_v26 = vmul.f32 1.442695, %v1186_v19 }
 0x510   : > { %v3916_v25 = vpop.eup %3185  ;;  %v1171_v32 = vpop.xlane.xlu0 %1170 }
 0x511   : > { %v1187_v37 = vsub.f32 %v1055_v52, %v1171_v32  ;;  %v1232_v21 = vpack.c.bf16 %v3916_v25, %v3914_v23  ;;  %3187 = vpow2.f32 %v1196_v26 }
 0x513   : > { %v1198_v38 = vmul.f32 1.442695, %v1187_v37  ;;  %2936 = vmatmul.mubr.msk.bf16.vlgmr.msra.gmra.mrb[24].mxu0 %vm671_vm4, %v1232_v21 }
 0x514   : > { %2946 = vmatpush3.bf16.msra.mxu0 %v1331_v4  ;;  %v1180_v24 = vpop.xlane.xlu1 %1179  ;;  %v1177_v44 = vpop.xlane.xlu0 %1176  ;;  %2947 = vmatprep.mubr.msk.bf16.mxu0 %vm3465_vm2, %v4342_v20 }
 0x515   : > { %3189 = vpow2.f32 %v1198_v38  ;;  %v1190_v46 = vsub.f32 %v1154_v58, %v1180_v24  ;;  %v1189_v47 = vsub.f32 %v1106_v55, %v1177_v44  ;;  %2957 = vmatprep.subr.bf16.mxu0 %v4342_v20 }
 0x516   : > { %3191 = vpow2.f32 %v1200_v45 }
 0x517   : > { %v1202_v43 = vmul.f32 1.442695, %v1189_v47  ;;  %v1204_v48 = vmul.f32 1.442695, %v1190_v46 }
 0x518   : > { %v1183_v49 = vpop.xlane.xlu0 %1182  ;;  %v1498_v54 = vpop.permute.xlu1 %1497 }
 0x519   : > { %v1191_v50 = vsub.f32 %v1157_v63, %v1183_v49  ;;  %3193 = vpow2.f32 %v1202_v43  ;;  %v1503_v4 = vsel %vm473_vm3, %v1498_v54, 0  ;;  %v467_v54 = vld [vmem:[#allocation9 + $0x28] sm:$0xff] }
 0x51a   : > { %3195 = vpow2.f32 %v1204_v48 }
 0x51b   : > { %v1206_v51 = vmul.f32 1.442695, %v1191_v50  ;;  %v3925_v52 = vpop.eup %3187  ;;  %v466_v50 = vld [vmem:[#allocation9 + $0x20] sm:$0xff] }
 0x51c   : > { %v1447_v57 = vpop.permute.xlu0 %1446  ;;  %v1549_v60 = vpop.permute.xlu1 %1548 }
 0x51d   : > { %3197 = vpow2.f32 %v1206_v51  ;;  %v1452_v1 = vsel %vm473_vm3, %v1447_v57, 0  ;;  %v1554_v8 = vsel %vm473_vm3, %v1549_v60, 0 }
 0x51f   : > { %v3927_v53 = vpop.eup %3189 }
 0x520   : > { %v1233_v56 = vpack.c.bf16 %v3927_v53, %v3925_v52  ;;  %v3932_v55 = vpop.eup %3191  ;;  %v1445_v3 = vpop.permute.xlu0 %1444 }
 0x522   : > { %2942 = vmatmul.mubr.msk.bf16.vlgmr.msra.gmra.mrb[32].mxu1 %vm671_vm4, %v1233_v56 }
 0x523   : > { %2952 = vmatpush3.bf16.msra.mxu1 %v1378_v6  ;;  %2953 = vmatprep.mubr.msk.bf16.mxu1 %vm3465_vm2, %v4342_v20  ;;  %v3936_v58 = vpop.eup %3193  ;;  %v1600_v6 = vpop.permute.xlu1 %1599 }
 0x524   : > { %2963 = vmatprep.subr.bf16.mxu1 %v4342_v20  ;;  %v1234_v62 = vpack.c.bf16 %v3936_v58, %v3932_v55  ;;  %v3941_v63 = vpop.eup %3195  ;;  %v1496_v11 = vpop.permute.xlu0 %1495  ;;  %v1605_v15 = vsel %vm473_vm3, %v1600_v6, 0 }
 0x526   : > { %2948 = vmatmul.mubr.msk.bf16.vlgmr.msra.gmra.mrb[28].mxu0 %vm671_vm4, %v1234_v62 }
 0x527   : > { %v3943_v0 = vpop.eup %3197  ;;  %2958 = vmatpush3.bf16.xpose.msra.mxu0 %v1452_v1  ;;  %2959 = vmatprep.mubr.msk.bf16.mxu0 %vm3465_vm2, %v4342_v20  ;;  %v1598_v12 = vpop.permute.xlu1 %1597 }
 0x528   : > { %v1235_v2 = vpack.c.bf16 %v3943_v0, %v3941_v63  ;;  %2969 = vmatprep.subr.bf16.mxu0 %v4342_v20  ;;  %v1547_v16 = vpop.permute.xlu0 %1546 }
 0x52a   : > { %2954 = vmatmul.mubr.msk.bf16.vlgmr.msra.gmra.mrb[36].mxu1 %vm671_vm4, %v1235_v2 }
 0x52b   : > { %2965 = vmatprep.mubr.msk.bf16.mxu1 %vm3465_vm2, %v4342_v20  ;;  %v1725_v17 = vpop.permute.xlu1 %1724 }
 0x52c   : > { %2964 = vmatpush3.bf16.xpose.msra.mxu1 %v1503_v4  ;;  %v1772_v18 = vpop.permute.xlu0 %1771 }
 0x52d   : > { %2975 = vmatprep.subr.bf16.mxu1 %v4342_v20 }
 0x52e   : > { %2960 = vmatmul.mubr.msk.bf16.vlgmr.msra.gmra.mrb[32].mxu0 %vm473_vm3, %v1445_v3 }
 0x52f   : > { %2970 = vmatpush3.bf16.xpose.msra.mxu0 %v1554_v8  ;;  %2971 = vmatprep.mubr.msk.bf16.mxu0 %vm3465_vm2, %v4342_v20 }
 0x530   : > { %2981 = vmatprep.subr.bf16.mxu0 %v4342_v20 }
 0x533   : > { %2966 = vmatmul.mubr.msk.bf16.vlgmr.msra.gmra.mrb[40].mxu1 %vm473_vm3, %v1496_v11 }
 0x534   : > { %2976 = vmatpush3.bf16.xpose.msra.mxu1 %v1605_v15  ;;  %2977 = vmatprep.mubr.msk.bf16.mxu1 %vm3465_vm2, %v4342_v20 }
 0x535   : > { %2987 = vmatprep.subr.bf16.mxu1 %v4342_v20 }
 0x536   : > { %2972 = vmatmul.mubr.msk.bf16.vlgmr.msra.gmra.mrb[36].mxu0 %vm473_vm3, %v1547_v16 }
 0x537   : > { %2982 = vmatpush3.bf16.msra.mxu0 %v1725_v17  ;;  %2983 = vmatprep.mubr.msk.bf16.mxu0 %vm3465_vm2, %v4342_v20 }
 0x538   : > { %2993 = vmatprep.subr.bf16.mxu0 %v4342_v20 }
 0x53b   : > { %2978 = vmatmul.mubr.msk.bf16.vlgmr.msra.gmra.mrb[44].mxu1 %vm473_vm3, %v1598_v12 }
 0x53c   : > { %2988 = vmatpush3.bf16.msra.mxu1 %v1772_v18  ;;  %2989 = vmatprep.mubr.msk.bf16.mxu1 %vm3465_vm2, %v4342_v20 }
 0x53d   : > { %2999 = vmatprep.subr.bf16.mxu1 %v4342_v20 }
 0x5e6   : > { %v3975_v19 = vpop.f32.mrb[24].mxu0 }
 0x5e7   : > { %v2937_v22 = vpop.f32.mrb[25].mxu0 }
 0x5e8   : > { %v3977_v26 = vpop.f32.mrb[26].mxu0 }
 0x5e9   : > { %v2938_v32 = vpop.f32.mrb[27].mxu0 }
 0x5f5   : > { %v3979_v33 = vpop.f32.mrb[32].mxu1 }
 0x5f6   : > { %v2943_v37 = vpop.f32.mrb[33].mxu1 }
 0x5f7   : > { %v3981_v21 = vpop.f32.mrb[34].mxu1 }
 0x5f8   : > { %v2944_v38 = vpop.f32.mrb[35].mxu1 }
 0x5f9   : > { %v3983_v24 = vpop.f32.mrb[28].mxu0 }
 0x5fa   : > { %v2949_v44 = vpop.f32.mrb[29].mxu0 }
 0x5fb   : > { %v3985_v45 = vpop.f32.mrb[30].mxu0 }
 0x5fc   : > { %v2950_v46 = vpop.f32.mrb[31].mxu0 }
 0x5fd   : > { %v3987_v47 = vpop.f32.mrb[36].mxu1 }
 0x5fe   : > { %v2955_v43 = vpop.f32.mrb[37].mxu1 }
 0x5ff   : > { %v3989_v48 = vpop.f32.mrb[38].mxu1 }
 0x600   : > { %v2956_v49 = vpop.f32.mrb[39].mxu1 }
 0x601   : > { %v1488_v51 = vpop.f32.mrb[32].mxu0 }
 0x602   : > { %v1489_v56 = vadd.f32 %v1488_v51, %v466_v50  ;;  %v2961_v57 = vpop.f32.mrb[33].mxu0 }
 0x603   : > { %v1491_v60 = vpop.f32.mrb[34].mxu0 }
 0x604   : > { %v1492_v62 = vadd.f32 %v1491_v60, %v467_v54  ;;  %v2962_v1 = vpop.f32.mrb[35].mxu0  ;;  %v1648_v2 = vsel %vm671_vm4, %v1489_v56, -inf }
 0x605   : > { %1649 = vmax.xlane.f32.xlu0 %v1648_v2 }
 0x606   : > { %v1539_v3 = vpop.f32.mrb[40].mxu1  ;;  %v1651_v8 = vsel %vm671_vm4, %v1492_v62, -inf }
 0x607   : > { %v1540_v4 = vadd.f32 %v1539_v3, %v466_v50  ;;  %v2967_v6 = vpop.f32.mrb[41].mxu1  ;;  %1652 = vmax.xlane.f32.xlu1 %v1651_v8 }
 0x608   : > { %v1542_v11 = vpop.f32.mrb[42].mxu1 }
 0x609   : > { %v1543_v12 = vadd.f32 %v1542_v11, %v467_v54  ;;  %v2968_v15 = vpop.f32.mrb[43].mxu1  ;;  %v1654_v16 = vsel %vm671_vm4, %v1540_v4, -inf  ;;  %v1590_v17 = vpop.f32.mrb[36].mxu0 }
 0x60a   : > { %1655 = vmax.xlane.f32.xlu0 %v1654_v16  ;;  %v1591_v18 = vadd.f32 %v1590_v17, %v466_v50  ;;  %v2973_v22 = vpop.f32.mrb[37].mxu0 }
 0x60b   : > { %v1593_v32 = vpop.f32.mrb[38].mxu0  ;;  %v1657_v44 = vsel %vm671_vm4, %v1543_v12, -inf }
 0x60c   : > { %v1594_v37 = vadd.f32 %v1593_v32, %v467_v54  ;;  %v2974_v38 = vpop.f32.mrb[39].mxu0  ;;  %v1660_v46 = vsel %vm671_vm4, %v1591_v18, -inf }
 0x60d   : > { %1661 = vmax.xlane.f32.xlu1 %v1660_v46 }
 0x60e   : > { %1658 = vmax.xlane.f32.xlu0 %v1657_v44  ;;  %v1641_v43 = vpop.f32.mrb[44].mxu1  ;;  %v1663_v3 = vsel %vm671_vm4, %v1594_v37, -inf }
 0x60f   : > { %v1642_v49 = vadd.f32 %v1641_v43, %v466_v50  ;;  %v2979_v51 = vpop.f32.mrb[45].mxu1  ;;  %v1819_v50 = vpop.permute.xlu1 %1818 }
 0x610   : > { %v1644_v57 = vpop.f32.mrb[46].mxu1 }
 0x611   : > { %v1645_v60 = vadd.f32 %v1644_v57, %v467_v54  ;;  %v2980_v1 = vpop.f32.mrb[47].mxu1  ;;  %v1666_v2 = vsel %vm671_vm4, %v1642_v49, -inf }
 0x612   : > { %1667 = vmax.xlane.f32.xlu1 %v1666_v2  ;;  %1664 = vmax.xlane.f32.xlu0 %v1663_v3 }
 0x613   : > { %v1669_v6 = vsel %vm671_vm4, %v1645_v60, -inf  ;;  %v1866_v54 = vpop.permute.xlu1 %1865 }
 0x616   : > { %1670 = vmax.xlane.f32.xlu0 %v1669_v6 }
 0x623   : > { %1985 = vrot.lane.b32.xlu1 %v3737_v31, %s3474_s14 }
 0x627   : > { %2036 = vrot.lane.b32.xlu1 %v3729_v28, %s3474_s14 }
 0x62b   : > { %2087 = vrot.lane.b32.xlu1 %v3735_v30, %s3474_s14 }
 0x62c   : > { %1934 = vrot.lane.b32.xlu0 %v3731_v29, %s3474_s14 }
 0x62f   : > { %2085 = vrot.lane.b32.xlu1 %v3735_v30, %s3475_s18 }
 0x630   : > { %1932 = vrot.lane.b32.xlu0 %v3731_v29, %s3475_s18 }
 0x633   : > { %2212 = vrot.lane.b32.xlu1 %v3731_v29, %s3476_s11 }
 0x634   : > { %1983 = vrot.lane.b32.xlu0 %v3737_v31, %s3475_s18 }
 0x638   : > { %2034 = vrot.lane.b32.xlu0 %v3729_v28, %s3475_s18 }
 0x692   : > { %v1650_v8 = vpop.xlane.xlu0 %1649 }
 0x693   : > { %v1672_v11 = vsub.f32 %v1489_v56, %v1650_v8 }
 0x694   : > { %v1653_v15 = vpop.xlane.xlu1 %1652 }
 0x695   : > { %v1680_v16 = vmul.f32 1.442695, %v1672_v11  ;;  %v1673_v17 = vsub.f32 %v1492_v62, %v1653_v15 }
 0x697   : > { %v1656_v22 = vpop.xlane.xlu0 %1655  ;;  %v1682_v32 = vmul.f32 1.442695, %v1673_v17  ;;  %3199 = vpow2.f32 %v1680_v16 }
 0x698   : > { %v1674_v30 = vsub.f32 %v1540_v4, %v1656_v22 }
 0x699   : > { %3201 = vpow2.f32 %v1682_v32 }
 0x69a   : > { %v1662_v38 = vpop.xlane.xlu1 %1661  ;;  %v1684_v46 = vmul.f32 1.442695, %v1674_v30 }
 0x69b   : > { %v1659_v44 = vpop.xlane.xlu0 %1658  ;;  %v1676_v29 = vsub.f32 %v1591_v18, %v1662_v38 }
 0x69c   : > { %v1675_v43 = vsub.f32 %v1543_v12, %v1659_v44  ;;  %3203 = vpow2.f32 %v1684_v46 }
 0x69d   : > { %v1688_v57 = vmul.f32 1.442695, %v1676_v29 }
 0x69e   : > { %v1686_v31 = vmul.f32 1.442695, %v1675_v43 }
 0x69f   : > { %v1668_v51 = vpop.xlane.xlu1 %1667  ;;  %v1665_v28 = vpop.xlane.xlu0 %1664 }
 0x6a0   : > { %v1678_v1 = vsub.f32 %v1642_v49, %v1668_v51  ;;  %v1677_v56 = vsub.f32 %v1594_v37, %v1665_v28  ;;  %3205 = vpow2.f32 %v1686_v31 }
 0x6a1   : > { %v4009_v62 = vpop.eup %3199  ;;  %3207 = vpow2.f32 %v1688_v57 }
 0x6a2   : > { %v1690_v2 = vmul.f32 1.442695, %v1677_v56  ;;  %v1692_v3 = vmul.f32 1.442695, %v1678_v1 }
 0x6a3   : > { %v1671_v4 = vpop.xlane.xlu0 %1670  ;;  %v4011_v6 = vpop.eup %3201 }
 0x6a4   : > { %v1679_v8 = vsub.f32 %v1645_v60, %v1671_v4  ;;  %3209 = vpow2.f32 %v1690_v2  ;;  %v1720_v12 = vpack.c.bf16 %v4011_v6, %v4009_v62  ;;  %v1986_v49 = vpop.permute.xlu1 %1985 }
 0x6a5   : > { %3211 = vpow2.f32 %v1692_v3  ;;  %v1991_v29 = vsel %vm473_vm3, %v1986_v49, 0 }
 0x6a6   : > { %v1694_v18 = vmul.f32 1.442695, %v1679_v8  ;;  %2984 = vmatmul.mubr.msk.bf16.vlgmr.msra.gmra.mrb[40].mxu0 %vm671_vm4, %v1720_v12  ;;  %v4019_v37 = vpop.eup %3203 }
 0x6a7   : > { %2994 = vmatpush3.bf16.msra.mxu0 %v1819_v50  ;;  %2995 = vmatprep.mubr.msk.bf16.mxu0 %vm3465_vm2, %v4342_v20  ;;  %v1935_v50 = vpop.permute.xlu0 %1934 }
 0x6a8   : > { %3213 = vpow2.f32 %v1694_v18  ;;  %3005 = vmatprep.subr.bf16.mxu0 %v4342_v20  ;;  %v2037_v17 = vpop.permute.xlu1 %2036  ;;  %v1940_v38 = vsel %vm473_vm3, %v1935_v50, 0 }
 0x6a9   : > { %v2042_v43 = vsel %vm473_vm3, %v2037_v17, 0 }
 0x6aa   : > { %v4021_v11 = vpop.eup %3205 }
 0x6ab   : > { %v1721_v60 = vpack.c.bf16 %v4021_v11, %v4019_v37  ;;  %v4025_v15 = vpop.eup %3207  ;;  %v1933_v44 = vpop.permute.xlu0 %1932 }
 0x6ac   : > { %v2088_v46 = vpop.permute.xlu1 %2087 }
 0x6ad   : > { %2990 = vmatmul.mubr.msk.bf16.vlgmr.msra.gmra.mrb[48].mxu1 %vm671_vm4, %v1721_v60  ;;  %v2093_v28 = vsel %vm473_vm3, %v2088_v46, 0  ;;  %v468_v46 = vld [vmem:[#allocation9 + $0x30] sm:$0xff] }
 0x6ae   : > { %v4028_v16 = vpop.eup %3209  ;;  %3000 = vmatpush3.bf16.msra.mxu1 %v1866_v54  ;;  %3001 = vmatprep.mubr.msk.bf16.mxu1 %vm3465_vm2, %v4342_v20 }
 0x6af   : > { %v1722_v22 = vpack.c.bf16 %v4028_v16, %v4025_v15  ;;  %3011 = vmatprep.subr.bf16.mxu1 %v4342_v20  ;;  %v4035_v32 = vpop.eup %3211  ;;  %v1984_v31 = vpop.permute.xlu0 %1983 }
 0x6b0   : > { %v2086_v51 = vpop.permute.xlu1 %2085 }
 0x6b1   : > { %2996 = vmatmul.mubr.msk.bf16.vlgmr.msra.gmra.mrb[44].mxu0 %vm671_vm4, %v1722_v22 }
 0x6b2   : > { %v4037_v30 = vpop.eup %3213  ;;  %3006 = vmatpush3.bf16.xpose.msra.mxu0 %v1940_v38  ;;  %3007 = vmatprep.mubr.msk.bf16.mxu0 %vm3465_vm2, %v4342_v20 }
 0x6b3   : > { %v1723_v54 = vpack.c.bf16 %v4037_v30, %v4035_v32  ;;  %3017 = vmatprep.subr.bf16.mxu0 %v4342_v20  ;;  %v2035_v57 = vpop.permute.xlu0 %2034 }
 0x6b4   : > { %v2213_v1 = vpop.permute.xlu1 %2212 }
 0x6b5   : > { %3002 = vmatmul.mubr.msk.bf16.vlgmr.msra.gmra.mrb[52].mxu1 %vm671_vm4, %v1723_v54 }
 0x6b6   : > { %3013 = vmatprep.mubr.msk.bf16.mxu1 %vm3465_vm2, %v4342_v20 }
 0x6b7   : > { %3012 = vmatpush3.bf16.xpose.msra.mxu1 %v1991_v29 }
 0x6b8   : > { %3023 = vmatprep.subr.bf16.mxu1 %v4342_v20 }
 0x6b9   : > { %3008 = vmatmul.mubr.msk.bf16.vlgmr.msra.gmra.mrb[48].mxu0 %vm473_vm3, %v1933_v44 }
 0x6ba   : > { %3018 = vmatpush3.bf16.xpose.msra.mxu0 %v2042_v43  ;;  %3019 = vmatprep.mubr.msk.bf16.mxu0 %vm3465_vm2, %v4342_v20 }
 0x6bb   : > { %3029 = vmatprep.subr.bf16.mxu0 %v4342_v20 }
 0x6be   : > { %3014 = vmatmul.mubr.msk.bf16.vlgmr.msra.gmra.mrb[56].mxu1 %vm473_vm3, %v1984_v31  ;;  %v469_v31 = vld [vmem:[#allocation9 + $0x38] sm:$0xff] }
 0x6bf   : > { %3024 = vmatpush3.bf16.xpose.msra.mxu1 %v2093_v28  ;;  %3025 = vmatprep.mubr.msk.bf16.mxu1 %vm3465_vm2, %v4342_v20 }
 0x6c0   : > { %3035 = vmatprep.subr.bf16.mxu1 %v4342_v20 }
 0x6c1   : > { %3020 = vmatmul.mubr.msk.bf16.vlgmr.msra.gmra.mrb[52].mxu0 %vm473_vm3, %v2035_v57 }
 0x6c2   : > { %3030 = vmatpush3.bf16.msra.mxu0 %v2213_v1  ;;  %3031 = vmatprep.mubr.msk.bf16.mxu0 %vm3465_vm2, %v4342_v20 }
 0x6c3   : > { %3041 = vmatprep.subr.bf16.mxu0 %v4342_v20 }
 0x6c6   : > { %3026 = vmatmul.mubr.msk.bf16.vlgmr.msra.gmra.mrb[60].mxu1 %vm473_vm3, %v2086_v51 }
 0x6c7   : > { %3037 = vmatprep.mubr.msk.bf16.mxu1 %vm3465_vm2, %v4342_v20 }
 0x779   : > { %v4068_v56 = vpop.f32.mrb[40].mxu0 }
 0x77a   : > { %v2985_v2 = vpop.f32.mrb[41].mxu0 }
 0x77b   : > { %v4070_v3 = vpop.f32.mrb[42].mxu0 }
 0x77c   : > { %v2986_v4 = vpop.f32.mrb[43].mxu0 }
 0x780   : > { %v4072_v8 = vpop.f32.mrb[48].mxu1 }
 0x781   : > { %v2991_v12 = vpop.f32.mrb[49].mxu1 }
 0x782   : > { %v4074_v18 = vpop.f32.mrb[50].mxu1 }
 0x783   : > { %v2992_v49 = vpop.f32.mrb[51].mxu1 }
 0x784   : > { %v4076_v60 = vpop.f32.mrb[44].mxu0 }
 0x785   : > { %v2997_v50 = vpop.f32.mrb[45].mxu0 }
 0x786   : > { %v4078_v17 = vpop.f32.mrb[46].mxu0 }
 0x787   : > { %v2998_v22 = vpop.f32.mrb[47].mxu0 }
 0x788   : > { %v4080_v38 = vpop.f32.mrb[52].mxu1 }
 0x789   : > { %v3003_v54 = vpop.f32.mrb[53].mxu1 }
 0x78a   : > { %v4082_v44 = vpop.f32.mrb[54].mxu1 }
 0x78b   : > { %v3004_v29 = vpop.f32.mrb[55].mxu1 }
 0x78c   : > { %v1976_v43 = vpop.f32.mrb[48].mxu0 }
 0x78d   : > { %v4084_v51 = vadd.f32 %v1976_v43, %v468_v46  ;;  %v3009_v28 = vpop.f32.mrb[49].mxu0 }
 0x78e   : > { %v1979_v57 = vpop.f32.mrb[50].mxu0 }
 0x78f   : > { %v4086_v1 = vadd.f32 %v1979_v57, %v469_v31  ;;  %v3010_v2 = vpop.f32.mrb[51].mxu0  ;;  %v2136_v4 = vsel %vm671_vm4, %v4084_v51, -inf }
 0x790   : > { %2137 = vmax.xlane.f32.xlu0 %v2136_v4 }
 0x791   : > { %v2027_v12 = vpop.f32.mrb[56].mxu1  ;;  %v2139_v49 = vsel %vm671_vm4, %v4086_v1, -inf }
 0x792   : > { %v4092_v50 = vadd.f32 %v2027_v12, %v468_v46  ;;  %v3015_v22 = vpop.f32.mrb[57].mxu1  ;;  %2140 = vmax.xlane.f32.xlu1 %v2139_v49 }
 0x793   : > { %v2030_v54 = vpop.f32.mrb[58].mxu1 }
 0x794   : > { %v4094_v29 = vadd.f32 %v2030_v54, %v469_v31  ;;  %v3016_v43 = vpop.f32.mrb[59].mxu1  ;;  %v2142_v28 = vsel %vm671_vm4, %v4092_v50, -inf  ;;  %v2078_v57 = vpop.f32.mrb[52].mxu0 }
 0x795   : > { %2143 = vmax.xlane.f32.xlu0 %v2142_v28  ;;  %v4098_v2 = vadd.f32 %v2078_v57, %v468_v46  ;;  %v3021_v4 = vpop.f32.mrb[53].mxu0 }
 0x796   : > { %v2081_v20 = vpop.f32.mrb[54].mxu0  ;;  %v2145_v49 = vsel %vm671_vm4, %v4094_v29, -inf }
 0x797   : > { %v3022_v34 = vpop.f32.mrb[55].mxu0  ;;  %v2148_v12 = vsel %vm671_vm4, %v4098_v2, -inf  ;;  %v4102_v27 = vadd.f32 %v2081_v20, %v469_v31 }
 0x798   : > { %2149 = vmax.xlane.f32.xlu1 %v2148_v12 }
 0x799   : > { %2146 = vmax.xlane.f32.xlu0 %v2145_v49  ;;  %v2129_v22 = vpop.f32.mrb[60].mxu1  ;;  %v2151_v20 = vsel %vm671_vm4, %v4102_v27, -inf  ;;  %v3295_v49 = vld [vmem:[#allocation2 + $0x10] sm:$0xff] }
 0x79a   : > { %v4106_v54 = vadd.f32 %v2129_v22, %v468_v46  ;;  %v3027_v43 = vpop.f32.mrb[61].mxu1  ;;  %v3296_v46 = vld [vmem:[#allocation2 + $0x18] sm:$0xff]  ;;  %v1211_v22 = vsel %vm671_vm4, %v3916_v25, 0.0  ;;  %v1699_v25 = vsel %vm671_vm4, %v4011_v6, 0.0  ;;  %v1229_v6 = vsel %vm671_vm4, %v3943_v0, 0.0 }
 0x79b   : > { %v2132_v28 = vpop.f32.mrb[62].mxu1  ;;  %v1208_v43 = vsel %vm671_vm4, %v3914_v23, 0.0  ;;  %v1220_v23 = vsel %vm671_vm4, %v3932_v55, 0.0  ;;  %v1714_v55 = vsel %vm671_vm4, %v4035_v32, 0.0 }
 0x79c   : > { %v4108_v57 = vadd.f32 %v2132_v28, %v469_v31  ;;  %v3028_v4 = vpop.f32.mrb[63].mxu1  ;;  %v2154_v34 = vsel %vm671_vm4, %v4106_v54, -inf  ;;  %v3297_v31 = vld [vmem:[#allocation2 + $0x8] sm:$0xff]  ;;  %v1696_v28 = vsel %vm671_vm4, %v4009_v62, 0.0  ;;  %v1705_v62 = vsel %vm671_vm4, %v4021_v11, 0.0 }
 0x79d   : > { %2155 = vmax.xlane.f32.xlu1 %v2154_v34  ;;  %2152 = vmax.xlane.f32.xlu0 %v2151_v20  ;;  %v1214_v4 = vsel %vm671_vm4, %v3925_v52, 0.0  ;;  %v1702_v34 = vsel %vm671_vm4, %v4019_v37, 0.0  ;;  %v1217_v20 = vsel %vm671_vm4, %v3927_v53, 0.0  ;;  %v1226_v52 = vsel %vm671_vm4, %v3941_v63, 0.0 }
 0x79e   : > { %v2157_v12 = vsel %vm671_vm4, %v4108_v57, -inf  ;;  %v1708_v53 = vsel %vm671_vm4, %v4025_v15, 0.0  ;;  %v1223_v37 = vsel %vm671_vm4, %v3936_v58, 0.0  ;;  %v1711_v63 = vsel %vm671_vm4, %v4028_v16, 0.0 }
 0x79f   : > { %v1717_v11 = vsel %vm671_vm4, %v4037_v30, 0.0 }
 0x7a1   : > { %2158 = vmax.xlane.f32.xlu0 %v2157_v12 }
 0x7ae   : > { %2306 = vrot.lane.b32.xlu1 %v3295_v49, %s3476_s11 }
 0x7b2   : > { %2353 = vrot.lane.b32.xlu1 %v3296_v46, %s3476_s11 }
 0x7b7   : > { %2259 = vrot.lane.b32.xlu0 %v3297_v31, %s3476_s11 }
 0x7d6   : > { %1212 = vadd.xlane.f32.xlu1 %v1211_v22  ;;  %1209 = vadd.xlane.f32.xlu0 %v1208_v43 }
 0x7da   : > { %1697 = vadd.xlane.f32.xlu1 %v1696_v28  ;;  %1215 = vadd.xlane.f32.xlu0 %v1214_v4 }
 0x7de   : > { %1703 = vadd.xlane.f32.xlu1 %v1702_v34  ;;  %1218 = vadd.xlane.f32.xlu0 %v1217_v20 }
 0x7e2   : > { %1221 = vadd.xlane.f32.xlu1 %v1220_v23  ;;  %1700 = vadd.xlane.f32.xlu0 %v1699_v25 }
 0x7e6   : > { %1227 = vadd.xlane.f32.xlu1 %v1226_v52  ;;  %1706 = vadd.xlane.f32.xlu0 %v1705_v62 }
 0x7ea   : > { %1709 = vadd.xlane.f32.xlu1 %v1708_v53  ;;  %1224 = vadd.xlane.f32.xlu0 %v1223_v37 }
 0x7ee   : > { %1715 = vadd.xlane.f32.xlu1 %v1714_v55  ;;  %1230 = vadd.xlane.f32.xlu0 %v1229_v6 }
 0x7f2   : > { %1712 = vadd.xlane.f32.xlu0 %v1711_v63 }
 0x7f6   : > { %1718 = vadd.xlane.f32.xlu0 %v1717_v11 }
 0x81d   : > { %v2138_v15 = vpop.xlane.xlu0 %2137 }
 0x81e   : > { %v2160_v58 = vsub.f32 %v4084_v51, %v2138_v15  ;;  %v4355_v15 = vmov 0.0  }
 0x81f   : > { %v2141_v12 = vpop.xlane.xlu1 %2140 }
 0x820   : > { %v2168_v49 = vmul.f32 1.442695, %v2160_v58  ;;  %v2161_v32 = vsub.f32 %v4086_v1, %v2141_v12 }
 0x822   : > { %3215 = vpow2.f32 %v2168_v49  ;;  %v2170_v46 = vmul.f32 1.442695, %v2161_v32  ;;  %v2144_v0 = vpop.xlane.xlu0 %2143 }
 0x823   : > { %v2162_v31 = vsub.f32 %v4092_v50, %v2144_v0 }
 0x824   : > { %3217 = vpow2.f32 %v2170_v46 }
 0x825   : > { %v2172_v22 = vmul.f32 1.442695, %v2162_v31  ;;  %v2150_v16 = vpop.xlane.xlu1 %2149 }
 0x826   : > { %v2164_v43 = vsub.f32 %v4098_v2, %v2150_v16  ;;  %v2147_v28 = vpop.xlane.xlu0 %2146 }
 0x827   : > { %3219 = vpow2.f32 %v2172_v22  ;;  %v2163_v30 = vsub.f32 %v4094_v29, %v2147_v28 }
 0x828   : > { %v2176_v4 = vmul.f32 1.442695, %v2164_v43 }
 0x829   : > { %v2174_v51 = vmul.f32 1.442695, %v2163_v30  ;;  %v720_v30 = vsel %vm671_vm4, %v3808_v35, 0.0  ;;  %v729_v35 = vsel %vm671_vm4, %v3825_v42, 0.0 }
 0x82a   : > { %3221 = vpow2.f32 %v2176_v4  ;;  %v2156_v34 = vpop.xlane.xlu1 %2155  ;;  %v2153_v20 = vpop.xlane.xlu0 %2152 }
 0x82b   : > { %3223 = vpow2.f32 %v2174_v51  ;;  %v2166_v1 = vsub.f32 %v4106_v54, %v2156_v34  ;;  %v2165_v23 = vsub.f32 %v4102_v27, %v2153_v20  ;;  %v726_v34 = vsel %vm671_vm4, %v3823_v41, 0.0 }
 0x82c   : > { %v3216_v50 = vpop.eup %3215  ;;  %v723_v20 = vsel %vm671_vm4, %v3811_v36, 0.0  ;;  %v735_v41 = vsel %vm671_vm4, %v3821_v40, 0.0  ;;  %v741_v36 = vsel %vm671_vm4, %v3848_v61, 0.0 }
 0x82d   : > { %v2180_v25 = vmul.f32 1.442695, %v2166_v1  ;;  %v2178_v52 = vmul.f32 1.442695, %v2165_v23  ;;  %v2184_v62 = vsel %vm671_vm4, %v3216_v50, 0.0  ;;  %v732_v1 = vsel %vm671_vm4, %v3818_v39, 0.0 }
 0x82e   : > { %v3218_v2 = vpop.eup %3217  ;;  %v2159_v53 = vpop.xlane.xlu0 %2158  ;;  %2185 = vadd.xlane.f32.xlu1 %v2184_v62  ;;  %v738_v23 = vsel %vm671_vm4, %v3844_v59, 0.0 }
 0x82f   : > { %3225 = vpow2.f32 %v2180_v25  ;;  %v2167_v29 = vsub.f32 %v4108_v57, %v2159_v53  ;;  %v2187_v37 = vsel %vm671_vm4, %v3218_v2, 0.0  ;;  %v2208_v55 = vpack.c.bf16 %v3218_v2, %v3216_v50  ;;  %v2307_v54 = vpop.permute.xlu1 %2306 }
 0x830   : > { %3227 = vpow2.f32 %v2178_v52  ;;  %2188 = vadd.xlane.f32.xlu0 %v2187_v37 }
 0x831   : > { %v3220_v6 = vpop.eup %3219  ;;  %v2182_v63 = vmul.f32 1.442695, %v2167_v29  ;;  %3032 = vmatmul.mubr.msk.bf16.vlgmr.msra.gmra.mrb[56].mxu0 %vm671_vm4, %v2208_v55 }
 0x832   : > { %3042 = vmatpush3.bf16.msra.mxu0 %v2307_v54  ;;  %v2260_v27 = vpop.permute.xlu0 %2259  ;;  %v2190_v11 = vsel %vm671_vm4, %v3220_v6, 0.0  ;;  %3043 = vmatprep.mubr.msk.bf16.mxu0 %vm3465_vm2, %v4355_v15 }
 0x833   : > { %3229 = vpow2.f32 %v2182_v63  ;;  %2191 = vadd.xlane.f32.xlu1 %v2190_v11  ;;  %3036 = vmatpush3.bf16.msra.mxu1 %v2260_v27  ;;  %v2354_v46 = vpop.permute.xlu1 %2353 }
 0x834   : > { %v3222_v57 = vpop.eup %3221  ;;  %3047 = vmatprep.subr.bf16.mxu1 %v4355_v15 }
 0x835   : > { %v3224_v58 = vpop.eup %3223  ;;  %v2196_v12 = vsel %vm671_vm4, %v3222_v57, 0.0 }
 0x836   : > { %v2193_v49 = vsel %vm671_vm4, %v3224_v58, 0.0  ;;  %v2209_v32 = vpack.c.bf16 %v3224_v58, %v3220_v6 }
 0x837   : > { %2197 = vadd.xlane.f32.xlu1 %v2196_v12  ;;  %2194 = vadd.xlane.f32.xlu0 %v2193_v49 }
 0x838   : > { %3038 = vmatmul.mubr.msk.bf16.vlgmr.msra.gmra.mrb[64].mxu1 %vm671_vm4, %v2209_v32 }
 0x839   : > { %v3226_v0 = vpop.eup %3225  ;;  %3048 = vmatpush3.bf16.msra.mxu1 %v2354_v46  ;;  %3049 = vmatprep.mubr.msk.bf16.mxu1 %vm3465_vm2, %v4355_v15 }
 0x83a   : > { %v3228_v31 = vpop.eup %3227  ;;  %v2202_v22 = vsel %vm671_vm4, %v3226_v0, 0.0 }
 0x83b   : > { %2203 = vadd.xlane.f32.xlu1 %v2202_v22  ;;  %v2199_v16 = vsel %vm671_vm4, %v3228_v31, 0.0  ;;  %v2210_v43 = vpack.c.bf16 %v3228_v31, %v3222_v57 }
 0x83c   : > { %2200 = vadd.xlane.f32.xlu0 %v2199_v16 }
 0x83d   : > { %v3230_v28 = vpop.eup %3229  ;;  %3044 = vmatmul.mubr.msk.bf16.vlgmr.msra.gmra.mrb[60].mxu0 %vm671_vm4, %v2210_v43 }
 0x83e   : > { %v2205_v4 = vsel %vm671_vm4, %v3230_v28, 0.0  ;;  %v2211_v51 = vpack.c.bf16 %v3230_v28, %v3226_v0 }
 0x83f   : > { %721 = vadd.xlane.f32.xlu1 %v720_v30 }
 0x840   : > { %2206 = vadd.xlane.f32.xlu0 %v2205_v4  ;;  %3050 = vmatmul.mubr.msk.bf16.vlgmr.msra.gmra.mrb[68].mxu1 %vm671_vm4, %v2211_v51 }
 0x843   : > { %727 = vadd.xlane.f32.xlu1 %v726_v34 }
 0x844   : > { %724 = vadd.xlane.f32.xlu0 %v723_v20 }
 0x847   : > { %733 = vadd.xlane.f32.xlu1 %v732_v1 }
 0x848   : > { %730 = vadd.xlane.f32.xlu0 %v729_v35 }
 0x84b   : > { %739 = vadd.xlane.f32.xlu1 %v738_v23 }
 0x84c   : > { %736 = vadd.xlane.f32.xlu0 %v735_v41 }
 0x850   : > { %742 = vadd.xlane.f32.xlu0 %v741_v36 }
 0x863   : > { %v1213_v50 = vpop.xlane.xlu1 %1212  ;;  %v1210_v25 = vpop.xlane.xlu0 %1209 }
 0x864   : > { %3231 = vrcp.f32 %v1213_v50 }
 0x865   : > { %3233 = vrcp.f32 %v1210_v25 }
 0x867   : > { %v1698_v39 = vpop.xlane.xlu1 %1697  ;;  %v1216_v52 = vpop.xlane.xlu0 %1215 }
 0x868   : > { %3235 = vrcp.f32 %v1216_v52 }
 0x86b   : > { %v1704_v42 = vpop.xlane.xlu1 %1703  ;;  %v1219_v62 = vpop.xlane.xlu0 %1218 }
 0x86c   : > { %3237 = vrcp.f32 %v1219_v62 }
 0x86d   : > { %3239 = vrcp.f32 %v1698_v39 }
 0x86e   : > { %v3232_v59 = vpop.eup %3231 }
 0x86f   : > { %v3234_v2 = vpop.eup %3233  ;;  %v1222_v53 = vpop.xlane.xlu1 %1221  ;;  %v1433_v29 = vmul.f32 %v3232_v59, %v3977_v26 }
 0x870   : > { %v1701_v40 = vpop.xlane.xlu0 %1700  ;;  %v1432_v61 = vmul.f32 %v3234_v2, %v3975_v19 }
 0x871   : > { %3241 = vrcp.f32 %v1701_v40 }
 0x872   : > { %v1440_v37 = vpack.c.bf16 %v1433_v29, %v1432_v61  ;;  %3243 = vrcp.f32 %v1704_v42  ;;  %v3236_v54 = vpop.eup %3235 }
 0x873   : > { %v1228_v55 = vpop.xlane.xlu1 %1227  ;;  %v1434_v11 = vmul.f32 %v3236_v54, %v3979_v33 }
 0x874   : > { %v1707_v6 = vpop.xlane.xlu0 %1706  ;;  %2424 = vrot.lane.b32.xlu1 %v1440_v37, %s3477_s10 }
 0x875   : > { %3245 = vrcp.f32 %v1707_v6 }
 0x876   : > { %v3238_v63 = vpop.eup %3237  ;;  %3247 = vrcp.f32 %v1222_v53 }
 0x877   : > { %v1435_v15 = vmul.f32 %v3238_v63, %v3981_v21  ;;  %v3240_v26 = vpop.eup %3239  ;;  %v1710_v57 = vpop.xlane.xlu1 %1709 }
 0x878   : > { %v1225_v27 = vpop.xlane.xlu0 %1224  ;;  %v1920_v49 = vmul.f32 %v3240_v26, %v4068_v56 }
 0x879   : > { %3249 = vrcp.f32 %v1225_v27  ;;  %v1441_v19 = vpack.c.bf16 %v1435_v15, %v1434_v11 }
 0x87a   : > { %3251 = vrcp.f32 %v1228_v55 }
 0x87b   : > { %v3242_v58 = vpop.eup %3241  ;;  %2426 = vrot.lane.b32.xlu0 %v1441_v19, %s3477_s10  ;;  %v1716_v31 = vpop.xlane.xlu1 %1715 }
 0x87c   : > { %v1231_v12 = vpop.xlane.xlu0 %1230  ;;  %v1921_v32 = vmul.f32 %v3242_v58, %v4070_v3  ;;  %v3244_v46 = vpop.eup %3243 }
 0x87d   : > { %3253 = vrcp.f32 %v1231_v12  ;;  %v1922_v22 = vmul.f32 %v3244_v46, %v4072_v8 }
 0x87e   : > { %3255 = vrcp.f32 %v1710_v57  ;;  %v1928_v0 = vpack.c.bf16 %v1921_v32, %v1920_v49 }
 0x87f   : > { %v3246_v33 = vpop.eup %3245 }
 0x880   : > { %v1713_v21 = vpop.xlane.xlu0 %1712  ;;  %2436 = vrot.lane.b32.xlu1 %v1928_v0, %s3478_s20  ;;  %v1923_v16 = vmul.f32 %v3246_v33, %v4074_v18  ;;  %v3248_v43 = vpop.eup %3247  ;;  %v4356_v0 = vld [vmem:[#allocation14_spill] sm:$0xff] }
 0x881   : > { %3257 = vrcp.f32 %v1713_v21  ;;  %v1436_v30 = vmul.f32 %v3248_v43, %v3983_v24 }
 0x882   : > { %3259 = vrcp.f32 %v1716_v31  ;;  %v1929_v56 = vpack.c.bf16 %v1923_v16, %v1922_v22  ;;  %v3165_v16 = vld [vmem:[#allocation8] sm:$0xff]  }
 0x883   : > { %v3250_v28 = vpop.eup %3249  ;;  %3053 = vmatprep.subr.bf16.mxu0 %v3165_v16 }
 0x884   : > { %v1719_v3 = vpop.xlane.xlu0 %1718  ;;  %2438 = vrot.lane.b32.xlu1 %v1929_v56, %s3478_s20  ;;  %v1437_v4 = vmul.f32 %v3250_v28, %v3985_v45  ;;  %v3252_v51 = vpop.eup %3251  ;;  %3054 = vmatpush3.bf16.msra.mxu0 %v3165_v16 }
 0x885   : > { %3261 = vrcp.f32 %v1719_v3  ;;  %v1438_v8 = vmul.f32 %v3252_v51, %v3987_v47  ;;  %v3166_v51 = vld [vmem:[#allocation8 + $0x8] sm:$0xff]  }
 0x886   : > { %v1442_v34 = vpack.c.bf16 %v1437_v4, %v1436_v30  ;;  %3055 = vmatprep.subr.bf16.mxu0 %v3166_v51 }
 0x887   : > { %v3254_v20 = vpop.eup %3253 }
 0x888   : > { %v3256_v1 = vpop.eup %3255  ;;  %2428 = vrot.lane.b32.xlu0 %v1442_v34, %s3477_s10  ;;  %v1439_v18 = vmul.f32 %v3254_v20, %v3989_v48  ;;  %3056 = vmatpush3.bf16.msra.mxu0 %v3166_v51 }
 0x889   : > { %v4210_v41 = vmul.f32 %v3256_v1, %v4076_v60 }
 0x88a   : > { %v1443_v23 = vpack.c.bf16 %v1439_v18, %v1438_v8 }
 0x88b   : > { %v3258_v35 = vpop.eup %3257 }
 0x88c   : > { %v4213_v36 = vmul.f32 %v3258_v35, %v4078_v17  ;;  %v3260_v24 = vpop.eup %3259  ;;  %2430 = vrot.lane.b32.xlu1 %v1443_v23, %s3477_s10 }
 0x88d   : > { %v4219_v25 = vmul.f32 %v3260_v24, %v4080_v38 }
 0x88e   : > { %v1930_v45 = vpack.c.bf16 %v4213_v36, %v4210_v41 }
 0x88f   : > { %v3262_v50 = vpop.eup %3261 }
 0x890   : > { %v4222_v47 = vmul.f32 %v3262_v50, %v4082_v44 }
 0x892   : > { %v1931_v48 = vpack.c.bf16 %v4222_v47, %v4219_v25 }
 0x8bb   : > { %v2186_v60 = vpop.xlane.xlu1 %2185 }
 0x8bd   : > { %v2189_v39 = vpop.xlane.xlu0 %2188 }
 0x8c0   : > { %v2192_v17 = vpop.xlane.xlu1 %2191 }
 0x8c4   : > { %v2198_v52 = vpop.xlane.xlu1 %2197  ;;  %v2195_v42 = vpop.xlane.xlu0 %2194 }
 0x8c8   : > { %v2204_v62 = vpop.xlane.xlu1 %2203 }
 0x8c9   : > { %v2201_v59 = vpop.xlane.xlu0 %2200 }
 0x8cc   : > { %v722_v2 = vpop.xlane.xlu1 %721 }
 0x8cd   : > { %v2207_v53 = vpop.xlane.xlu0 %2206  ;;  %3263 = vrcp.f32 %v722_v2 }
 0x8d0   : > { %v728_v40 = vpop.xlane.xlu1 %727 }
 0x8d1   : > { %v725_v29 = vpop.xlane.xlu0 %724 }
 0x8d2   : > { %3265 = vrcp.f32 %v725_v29 }
 0x8d3   : > { %3267 = vrcp.f32 %v728_v40 }
 0x8d4   : > { %v734_v38 = vpop.xlane.xlu1 %733 }
 0x8d5   : > { %v731_v44 = vpop.xlane.xlu0 %730 }
 0x8d6   : > { %3269 = vrcp.f32 %v731_v44 }
 0x8d7   : > { %3271 = vrcp.f32 %v734_v38  ;;  %v3264_v55 = vpop.eup %3263 }
 0x8d8   : > { %v740_v61 = vpop.xlane.xlu1 %739  ;;  %v4227_v63 = vmul.f32 %v3264_v55, %v3871_v5 }
 0x8d9   : > { %v737_v37 = vpop.xlane.xlu0 %736 }
 0x8da   : > { %3273 = vrcp.f32 %v737_v37 }
 0x8db   : > { %3275 = vrcp.f32 %v740_v61 }
 0x8dc   : > { %v3266_v6 = vpop.eup %3265 }
 0x8dd   : > { %v743_v54 = vpop.xlane.xlu0 %742  ;;  %v4230_v27 = vmul.f32 %v3266_v6, %v3873_v7  ;;  %v3268_v11 = vpop.eup %3267 }
 0x8de   : > { %3277 = vrcp.f32 %v743_v54  ;;  %v4235_v57 = vmul.f32 %v3268_v11, %v3875_v9 }
 0x8df   : > { %v952_v15 = vpack.c.bf16 %v4230_v27, %v4227_v63  ;;  %3279 = vrcp.f32 %v2186_v60 }
 0x8e0   : > { %v3270_v26 = vpop.eup %3269  ;;  %3281 = vrcp.f32 %v2189_v39 }
 0x8e1   : > { %v4238_v19 = vmul.f32 %v3270_v26, %v3879_v13  ;;  %v3272_v58 = vpop.eup %3271  ;;  %v4357_v13 = vld [vmem:[#allocation15_spill] sm:$0xff]  ;;  %3283 = vrcp.f32 %v2192_v17 }
 0x8e2   : > { %v4243_v7 = vmul.f32 %v3272_v58, %v3877_v10  ;;  %3285 = vrcp.f32 %v2195_v42 }
 0x8e3   : > { %v953_v5 = vpack.c.bf16 %v4238_v19, %v4235_v57  ;;  %3287 = vrcp.f32 %v2198_v52 }
 0x8e4   : > { %v3274_v12 = vpop.eup %3273  ;;  %3289 = vrcp.f32 %v2201_v59 }
 0x8e5   : > { %v4246_v49 = vmul.f32 %v3274_v12, %v3881_v14  ;;  %v3276_v32 = vpop.eup %3275  ;;  %3291 = vrcp.f32 %v2204_v62 }
 0x8e6   : > { %v4251_v33 = vmul.f32 %v3276_v32, %v4356_v0  ;;  %3293 = vrcp.f32 %v2207_v53  ;;  %v2425_v55 = vpop.permute.xlu1 %2424 }
 0x8e7   : > { %v954_v46 = vpack.c.bf16 %v4246_v49, %v4243_v7  ;;  %v2458_v26 = vsel %vm473_vm3, %v952_v15, %v2425_v55 }
 0x8e8   : > { %v3278_v9 = vpop.eup %3277 }
 0x8e9   : > { %v4254_v31 = vmul.f32 %v3278_v9, %v4357_v13  ;;  %v3280_v14 = vpop.eup %3279 }
 0x8ea   : > { %v3282_v43 = vpop.eup %3281 }
 0x8eb   : > { %v955_v21 = vpack.c.bf16 %v4254_v31, %v4251_v33  ;;  %v3284_v20 = vpop.eup %3283  ;;  %v2762_v33 = vld [vmem:[%s4335_s4] ss:$0 sm:$0xff] }
 0x8ec   : > { %v3286_v8 = vpop.eup %3285 }
 0x8ed   : > { %v3288_v39 = vpop.eup %3287  ;;  %v2427_v6 = vpop.permute.xlu0 %2426 }
 0x8ee   : > { %v3290_v52 = vpop.eup %3289  ;;  %v2461_v32 = vsel %vm473_vm3, %v953_v5, %v2427_v6 }
 0x8ef   : > { %v3292_v40 = vpop.eup %3291 }
 0x8f0   : > { %v3294_v38 = vpop.eup %3293 }
 0x8f2   : > { %v2437_v54 = vpop.permute.xlu1 %2436 }
 0x8f3   : > { %v2469_v12 = vsel %vm671_vm4, %v2458_v26, %v2437_v54 }
 0x8f6   : > { %v2439_v58 = vpop.permute.xlu1 %2438 }
 0x8f7   : > { %v2471_v9 = vsel %vm671_vm4, %v2461_v32, %v2439_v58 }
 0x8fa   : > { %v2429_v11 = vpop.permute.xlu0 %2428 }
 0x8fb   : > { %v2464_v13 = vsel %vm473_vm3, %v954_v46, %v2429_v11 }
 0x904   : > { %v2252_v10 = vpop.f32.mrb[56].mxu0 }
 0x905   : > { %v3033_v22 = vpop.f32.mrb[57].mxu0  ;;  %v2408_v28 = vmul.f32 %v3280_v14, %v2252_v10 }
 0x906   : > { %v2255_v56 = vpop.f32.mrb[58].mxu0 }
 0x907   : > { %v2409_v3 = vmul.f32 %v3282_v43, %v2255_v56  ;;  %v3034_v30 = vpop.f32.mrb[59].mxu0 }
 0x909   : > { %v2416_v4 = vpack.c.bf16 %v2409_v3, %v2408_v28 }
 0x90b   : > { %v2299_v34 = vpop.f32.mrb[64].mxu1  ;;  %2448 = vrot.lane.b32.xlu0 %v2416_v4, %s3479_s12 }
 0x90c   : > { %v3039_v1 = vpop.f32.mrb[65].mxu1  ;;  %v2410_v35 = vmul.f32 %v3284_v20, %v2299_v34 }
 0x90d   : > { %v2302_v18 = vpop.f32.mrb[66].mxu1 }
 0x90e   : > { %v2411_v23 = vmul.f32 %v3286_v8, %v2302_v18  ;;  %v3040_v24 = vpop.f32.mrb[67].mxu1 }
 0x90f   : > { %2440 = vrot.lane.b32.xlu0 %v1930_v45, %s3478_s20 }
 0x910   : > { %v2417_v50 = vpack.c.bf16 %v2411_v23, %v2410_v35  ;;  %v2346_v60 = vpop.f32.mrb[60].mxu0 }
 0x911   : > { %v3045_v17 = vpop.f32.mrb[61].mxu0  ;;  %v2412_v62 = vmul.f32 %v3288_v39, %v2346_v60 }
 0x912   : > { %v2349_v42 = vpop.f32.mrb[62].mxu0  ;;  %2450 = vrot.lane.b32.xlu1 %v2417_v50, %s3479_s12 }
 0x913   : > { %v2413_v59 = vmul.f32 %v3290_v52, %v2349_v42  ;;  %v3046_v2 = vpop.f32.mrb[63].mxu0  ;;  %v2393_v53 = vpop.f32.mrb[68].mxu1 }
 0x914   : > { %v3051_v29 = vpop.f32.mrb[69].mxu1  ;;  %v2414_v37 = vmul.f32 %v3292_v40, %v2393_v53 }
 0x915   : > { %v2418_v44 = vpack.c.bf16 %v2413_v59, %v2412_v62  ;;  %v2396_v61 = vpop.f32.mrb[70].mxu1 }
 0x916   : > { %v2415_v41 = vmul.f32 %v3294_v38, %v2396_v61  ;;  %v3052_v36 = vpop.f32.mrb[71].mxu1  ;;  %2442 = vrot.lane.b32.xlu1 %v1931_v48, %s3478_s20  ;;  %v2431_v48 = vpop.permute.xlu1 %2430 }
 0x917   : > { %2452 = vrot.lane.b32.xlu0 %v2418_v44, %s3479_s12  ;;  %v2467_v14 = vsel %vm473_vm3, %v955_v21, %v2431_v48 }
 0x918   : > { %v2419_v45 = vpack.c.bf16 %v2415_v41, %v2414_v37 }
 0x91a   : > { %2454 = vrot.lane.b32.xlu1 %v2419_v45, %s3479_s12 }
 0x97d   : > { %v2449_v25 = vpop.permute.xlu0 %2448 }
 0x97e   : > { %v2478_v47 = vsel %vm2476_vm5, %v2469_v12, %v2449_v25 }
 0x97f   : > { %2489 = vst.msk [vmem:[#allocation3] sm:$0xff] %vm371_vm0, %v2478_v47 }
 0x981   : > { %v2441_v63 = vpop.permute.xlu0 %2440 }
 0x982   : > { %v2473_v57 = vsel %vm671_vm4, %v2464_v13, %v2441_v63 }
 0x984   : > { %v2451_v0 = vpop.permute.xlu1 %2450 }
 0x985   : > { %v2481_v27 = vsel %vm2476_vm5, %v2471_v9, %v2451_v0 }
 0x986   : > { %2490 = vst.msk [vmem:[#allocation3 + $0x8] sm:$0xff] %vm371_vm0, %v2481_v27  ;;  %v2493_v15 = vld [vmem:[#allocation3] sm:$0xff] }
 0x987   : > { %3057 = vmatprep.mubr.msk.bf16.mxu0 %vm371_vm0, %v2493_v15 }
 0x988   : > { %v2443_v10 = vpop.permute.xlu1 %2442 }
 0x989   : > { %v2453_v19 = vpop.permute.xlu0 %2452  ;;  %v2475_v22 = vsel %vm671_vm4, %v2467_v14, %v2443_v10 }
 0x98a   : > { %v2484_v5 = vsel %vm2476_vm5, %v2473_v57, %v2453_v19 }
 0x98b   : > { %2491 = vst.msk [vmem:[#allocation3 + $0x10] sm:$0xff] %vm371_vm0, %v2484_v5 }
 0x98c   : > { %v2455_v16 = vpop.permute.xlu1 %2454 }
 0x98d   : > { %v2487_v7 = vsel %vm2476_vm5, %v2475_v22, %v2455_v16  ;;  %v2494_v49 = vld [vmem:[#allocation3 + $0x8] sm:$0xff] }
 0x98e   : > { %2492 = vst.msk [vmem:[#allocation3 + $0x18] sm:$0xff] %vm371_vm0, %v2487_v7  ;;  %3058 = vmatmul.mubr.msk.bf16.vlgmr.msra.gmra.mrb[64].mxu0 %vm371_vm0, %v2494_v49 }
 0x992   : > { %v2495_v46 = vld [vmem:[#allocation3 + $0x10] sm:$0xff] }
 0x993   : > { %3061 = vmatprep.mubr.msk.bf16.mxu0 %vm371_vm0, %v2495_v46 }
 0x995   : > { %v2496_v43 = vld [vmem:[#allocation3 + $0x18] sm:$0xff] }
 0x996   : > { %3062 = vmatmul.mubr.msk.bf16.gmra.mrb[68].mxu0 %vm371_vm0, %v2496_v43 }
 0xa61   : > { %v3059_v31 = vpop.f32.mrb[64].mxu0 }
 0xa62   : > { %v2575_v21 = vadd.f32 %v3059_v31, %v2762_v33  ;;  %v2566_v56 = vpop.f32.mrb[65].mxu0 }
 0xa63   : > { %v2567_v28 = vadd.f32 %v2762_v33, %v2566_v56  ;;  %v3060_v3 = vpop.f32.mrb[66].mxu0 }
 0xa64   : > { %2599 = vst.msk [vmem:[%s317_s29 + $0x10] sm:$0xff] %vm371_vm0, %v2575_v21  ;;  %v2578_v30 = vadd.f32 %v3060_v3, %v2762_v33  ;;  %v2569_v4 = vpop.f32.mrb[67].mxu0 }
 0xa65   : > { %2597 = vst.msk [vmem:[%s317_s29] sm:$0xff] %vm371_vm0, %v2567_v28  ;;  %v2570_v51 = vadd.f32 %v2762_v33, %v2569_v4 }
 0xa66   : > { %2600 = vst.msk [vmem:[%s317_s29 + $0x18] sm:$0xff] %vm371_vm0, %v2578_v30 }
 0xa67   : > { %2598 = vst.msk [vmem:[%s317_s29 + $0x8] sm:$0xff] %vm371_vm0, %v2570_v51 }
 0xa69   : > { %v3063_v34 = vpop.f32.mrb[68].mxu0 }
 0xa6a   : > { %v2591_v20 = vadd.f32 %v3063_v34, %v2762_v33  ;;  %v2582_v1 = vpop.f32.mrb[69].mxu0 }
 0xa6b   : > { %v2583_v8 = vadd.f32 %v2762_v33, %v2582_v1  ;;  %v3064_v18 = vpop.f32.mrb[70].mxu0 }
 0xa6c   : > { %2603 = vst.msk [vmem:[%s317_s29 + $0x30] sm:$0xff] %vm371_vm0, %v2591_v20  ;;  %v2594_v35 = vadd.f32 %v3064_v18, %v2762_v33  ;;  %v2585_v23 = vpop.f32.mrb[71].mxu0 }
 0xa6d   : > { %2601 = vst.msk [vmem:[%s317_s29 + $0x20] sm:$0xff] %vm371_vm0, %v2583_v8  ;;  %v2586_v24 = vadd.f32 %v2762_v33, %v2585_v23 }
 0xa6e   : > { %2604 = vst.msk [vmem:[%s317_s29 + $0x38] sm:$0xff] %vm371_vm0, %v2594_v35 }
 0xa6f   : > { %2602 = vst.msk [vmem:[%s317_s29 + $0x28] sm:$0xff] %vm371_vm0, %v2586_v24 }
 0xa70 PF: > { %p18_p11 = scmp.ge.s32.totalorder %s3645_s8, 4   ;;  %s4358_s21 = smov %s3446_s22 }
 0xa71   : > { %s4359_s22 = smov %s3450_s23  ;;  %s4360_s23 = smov %s3655_s13 }
 0xa72   : > { %s4361_s24 = smov %s3645_s8  ;;  %20 = sbr.rel (!%p18_p11) target bundleno = 5 (0x5), region = 96 }
 0xa79   :  { %2627 = vsyncpa [#allocation5], 1 }
 0xa7a   :  { %2629 = vsyncpa [#allocation5 + $0x1], 1 }
 0xa7b   :  { %2630 = vsyncpa [#allocation7], 1 }
 0xa7c   :  { %2631 = vsyncpa [#allocation10], 1 }

// kernel: tpu_custom_call.1
= control target key start
LH: loop header
LB: loop body
LE: loop exit
PB: predicated region body
PF: predicated region fallthrough
CT: control target
= control target key end

     0   :  { %11 = vsyncpa [#allocation5], 0  ;;  %s4331_s0 = inlined_call_operand.hbm [shape: bf16[8,16,32], index: 0, kind: input, shape index: {}]   ;;  %s4332_s1 = inlined_call_operand.hbm [shape: bf16[32,96], index: 1, kind: input, shape index: {}]   ;;  %s4333_s2 = inlined_call_operand.vmem [shape: f32[1,96], index: 2, kind: input, shape index: {}]   ;;  %s4334_s3 = inlined_call_operand.hbm [shape: bf16[32,32], index: 3, kind: input, shape index: {}]   ;;  %s4335_s4 = inlined_call_operand.vmem [shape: f32[1,32], index: 4, kind: input, shape index: {}]   ;;  %s4336_s5 = inlined_call_operand.hbm [shape: f32[4,1,16,16], index: 5, kind: input, shape index: {}]   ;;  %s4337_s6 = inlined_call_operand.vmem [shape: f32[128,32], index: 6, kind: output, shape index: {}]  }
   0x1   :  { %13 = vsyncpa [#allocation5 + $0x1], 0 }
   0x2   :  { %14 = vsyncpa [#allocation7], 0 }
   0x3   :  { %15 = vsyncpa [#allocation10], 0  ;;  %s3515_s21 = smov 0   ;;  %s3517_s22 = smov 0  }
   0x4   :  { %s3519_s23 = smov 0   ;;  %s3521_s24 = smov 0  }
   0x5 LB: > { %s2701_s25 = sadd.s32 4294967295, %s3454_s24   ;;  %p41_p0 = scmp.ne.s32.totalorder %s3446_s22, %s3442_s21  ;;  %s3454_s24 = sphi %s3521_s24, %s4361_s24   ;;  %s3450_s23 = sphi %s3519_s23, %s4360_s23   ;;  %s3446_s22 = sphi %s3517_s22, %s4359_s22   ;;  %s3442_s21 = sphi %s3515_s21, %s4358_s21  }
   0x6   : > { %p3537_p1 = scmp.eq.s32.totalorder %s2701_s25, 0  ;;  %p2703_p2 = scmp.ge.s32.totalorder %s3454_s24, 1 }
   0x7   : > { %p183_p3 = scmp.lt.s32.totalorder %s3454_s24, 3  ;;  %s3456_s29 = smov [#allocation6]  }
   0x8   : > { %s4344_s26 = scalar_select %p3537_p1, 1, 0 }
   0x9   : > { %p3545_p4 = por %p3537_p1, %p41_p0  ;;  %p3549_p5 = pnand %p2703_p2, %p183_p3 }
   0xa   : > { %s195_s30 = sshll.u32 %s3456_s29, 4  ;;  %s3457_s8 = smov [#allocation8]   ;;  %s3553_s30 = int_to_ptr.vmem [resolvable:$true] %s195_s30 }
   0xb   : > { %s4345_s27 = scalar_select %p3545_p4, 1, 0 }
   0xc   : > { %s4346_s28 = scalar_select %p3549_p5, 1, 0 }
   0xd   : > { %p3083_p6 = pneg %p3549_p5  ;;  %s211_s9 = sshll.u32 %s3457_s8, 4  ;;  %s3563_s9 = int_to_ptr.vmem [resolvable:$true] %s211_s9 }
   0xe   : > { %s3458_s10 = smov [#allocation9]   ;;  %s3298_s14 = scalar_lea.hbm %s4332_s1, 256 }
   0xf   : > { %p3559_p7 = pnand %p3083_p6, %p3537_p1  ;;  %s3565_s11 = sshll.u32 %s3458_s10, 4  ;;  %s228_s11 = int_to_ptr.vmem [resolvable:$true] %s3565_s11 }
  0x10   : > { %p3299_p8 = scmp.ne.s32.totalorder %s4332_s1, %s3298_s14  ;;  %p3305_p12 = scmp.lt.u32.totalorder %s3298_s14, %s4332_s1 }
  0x11   : > { %p3575_p9 = pneg %p3559_p7 }
  0x13   : > { %p3301_p10 = pnand %p3575_p9, %p3299_p8 }
  0x15   : > { %p3302_p11 = pneg %p3301_p10 }
  0x17   : > { %p3307_p13 = pnand %p3305_p12, %p3302_p11 }
  0x19   : > { %3310 = shalt.err (!%p3307_p13)
}
  0x1a   : > { %s3311_s20 = scalar_lea.vmem %s3553_s30, 256  ;;  %p3319_p6 = scmp.lt.s32.totalorder %s3553_s30, %s3553_s30 }
  0x1b   : > { %p3312_p0 = scmp.ne.s32.totalorder %s3553_s30, %s3311_s20  ;;  %p3320_p1 = scmp.lt.s32.totalorder %s3311_s20, %s3311_s20 }
  0x1d   : > { %p3314_p2 = pnand %p3312_p0, %p3575_p9  ;;  %p3321_p8 = por %p3320_p1, %p3319_p6 }
  0x1f   : > { %p3315_p3 = pneg %p3314_p2 }
  0x21   : > { %p3322_p10 = pnand %p3321_p8, %p3315_p3 }
  0x23   : > { %3325 = shalt.err (!%p3322_p10)
}
  0x24   : > { %s3459_s21 = smov 64   ;;  %s3460_s29 = smov 4  }
  0x25   : > { %3086 = dma.hbm_to_vmem [thread:$0]  (!%p3559_p7), %s4332_s1, 256, %s3553_s30, [#allocation7], %s3459_s21, %s3459_s21, %s3460_s29  }
  0x26   : > { %s3326_s14 = scalar_lea.hbm %s4334_s3, 256 }
  0x27   : > { %p3327_p1 = scmp.ne.s32.totalorder %s4334_s3, %s3326_s14  ;;  %p3333_p13 = scmp.lt.u32.totalorder %s3326_s14, %s4334_s3 }
  0x29   : > { %p3329_p11 = pnand %p3327_p1, %p3575_p9 }
  0x2b   : > { %p3330_p12 = pneg %p3329_p11 }
  0x2d   : > { %p3335_p0 = pnand %p3333_p13, %p3330_p12 }
  0x2f   : > { %3338 = shalt.err (!%p3335_p0)
}
  0x30   : > { %s3339_s30 = scalar_lea.vmem %s3563_s9, 256  ;;  %p3347_p8 = scmp.lt.s32.totalorder %s3563_s9, %s3563_s9 }
  0x31   : > { %p3340_p2 = scmp.ne.s32.totalorder %s3563_s9, %s3339_s30  ;;  %p3348_p10 = scmp.lt.s32.totalorder %s3339_s30, %s3339_s30 }
  0x33   : > { %p3342_p3 = pnand %p3340_p2, %p3575_p9  ;;  %p3349_p1 = por %p3348_p10, %p3347_p8 }
  0x35   : > { %p3343_p6 = pneg %p3342_p3 }
  0x37   : > { %p3350_p11 = pnand %p3349_p1, %p3343_p6 }
  0x39   : > { %3353 = shalt.err (!%p3350_p11)
}
  0x3a   : > { %3089 = dma.hbm_to_vmem [thread:$0]  (!%p3559_p7), %s4334_s3, 256, %s3563_s9, [#allocation7], %s3459_s21, %s3459_s21, %s3460_s29  }
  0x3b   : > { %s3354_s13 = scalar_lea.hbm %s4336_s5, 1024 }
  0x3c   : > { %p3355_p12 = scmp.ne.s32.totalorder %s4336_s5, %s3354_s13  ;;  %p3361_p2 = scmp.lt.u32.totalorder %s3354_s13, %s4336_s5 }
  0x3e   : > { %p3357_p13 = pnand %p3355_p12, %p3575_p9 }
  0x40   : > { %p3358_p0 = pneg %p3357_p13 }
  0x42   : > { %p3363_p3 = pnand %p3361_p2, %p3358_p0 }
  0x44   : > { %3366 = shalt.err (!%p3363_p3)
}
  0x45   : > { %s3367_s19 = scalar_lea.vmem %s228_s11, 1024  ;;  %p3375_p1 = scmp.lt.s32.totalorder %s228_s11, %s228_s11 }
  0x46   : > { %p3368_p6 = scmp.ne.s32.totalorder %s228_s11, %s3367_s19  ;;  %p3376_p11 = scmp.lt.s32.totalorder %s3367_s19, %s3367_s19 }
  0x48   : > { %p3370_p8 = pnand %p3368_p6, %p3575_p9  ;;  %p3377_p4 = por %p3376_p11, %p3375_p1 }
  0x4a   : > { %p3371_p10 = pneg %p3370_p8 }
  0x4c   : > { %p3378_p5 = pnand %p3377_p4, %p3371_p10 }
  0x4e   : > { %3381 = shalt.err (!%p3378_p5)
}
  0x4f   : > { %s3461_s9 = smov 128   ;;  %s3462_s17 = smov 8  }
  0x50   : > { %3092 = dma.hbm_to_vmem [thread:$0]  (!%p3559_p7), %s4336_s5, 1024, %s228_s11, [#allocation10], %s3461_s9, %s3461_s9, %s3462_s17  }
  0x51   : > { %s3645_s8 = sadd.s32 1, %s3454_s24   ;;  %s28_s12 = sadd.s32 1, %s3450_s23 }
  0x52   : > { %s25_s10 = ssub.s32 %s3454_s24, %s3645_s8  ;;  %p35_p5 = scmp.ne.s32.totalorder %s3450_s23, %s3446_s22 }
  0x53   : > { %p26_p4 = scmp.eq.s32.totalorder %s25_s10, 0  ;;  %p36_p9 = scmp.eq.s32.totalorder %s3454_s24, 0 }
  0x54   : > { %p3100_p12 = scmp.lt.s32.totalorder %s3454_s24, 2  ;;  %s241_s14 = sand.u32 1, %s3450_s23  }
  0x55   : > { %s3655_s13 = scalar_select %p26_p4, %s3450_s23, %s28_s12  }
  0x56   : > { %p37_p13 = por %p36_p9, %p35_p5  ;;  %s2708_s15 = sshll.u32 %s241_s14, 5 }
  0x57   : > { %s2772_s16 = sshll.u32 %s3454_s24, 9  ;;  %s245_s11 = scalar_lea.vmem [#allocation4], %s2708_s15 }
  0x58   : > { %s3662_s19 = scalar_lea.hbm %s4331_s0, %s2772_s16  ;;  %s253_s9 = sshll.u32 %s245_s11, 4  ;;  %s3664_s9 = int_to_ptr.vmem [resolvable:$true] %s253_s9 }
  0x59   : > { %p3666_p7 = pnand %p3100_p12, %p37_p13  ;;  %s3670_s30 = scalar_lea.sflag [#allocation5], %s241_s14 }
  0x5a   : > { %s3382_s20 = scalar_lea.hbm %s3662_s19, 512  ;;  %s3387_s15 = scalar_lea.hbm %s4331_s0, 1024 }
  0x5b   : > { %p3383_p0 = scmp.ne.s32.totalorder %s3662_s19, %s3382_s20  ;;  %p3384_p2 = pneg %p3666_p7 }
  0x5c   : > { %p3388_p8 = scmp.lt.u32.totalorder %s3662_s19, %s4331_s0  ;;  %p3389_p10 = scmp.lt.u32.totalorder %s3387_s15, %s3382_s20 }
  0x5d   : > { %p3385_p3 = pnand %p3384_p2, %p3383_p0  ;;  %p3391_p11 = scmp.lt.u32.totalorder %s3382_s20, %s3662_s19 }
  0x5e   : > { %p3390_p1 = por %p3389_p10, %p3388_p8 }
  0x5f   : > { %p3386_p6 = pneg %p3385_p3 }
  0x60   : > { %p3392_p4 = por %p3391_p11, %p3390_p1 }
  0x62   : > { %p3393_p5 = pnand %p3392_p4, %p3386_p6 }
  0x64   : > { %3396 = shalt.err (!%p3393_p5)
}
  0x65   : > { %s3397_s14 = scalar_lea.vmem %s3664_s9, 512  ;;  %s3463_s18 = smov [#allocation4]  }
  0x66   : > { %p3398_p9 = scmp.ne.s32.totalorder %s3664_s9, %s3397_s14  ;;  %s3402_s11 = sshll.u32 %s3463_s18, 4  ;;  %s3403_s11 = int_to_ptr.vmem [resolvable:$false] %s3402_s11 }
  0x67   : > { %s3404_s10 = scalar_lea.vmem %s3403_s11, 1024  ;;  %p3405_p0 = scmp.lt.s32.totalorder %s3664_s9, %s3403_s11 }
  0x68   : > { %p3400_p12 = pnand %p3398_p9, %p3384_p2  ;;  %p3406_p3 = scmp.lt.s32.totalorder %s3404_s10, %s3397_s14 }
  0x6a   : > { %p3401_p13 = pneg %p3400_p12  ;;  %p3407_p8 = por %p3406_p3, %p3405_p0 }
  0x6c   : > { %p3408_p10 = pnand %p3407_p8, %p3401_p13 }
  0x6e   : > { %3411 = shalt.err (!%p3408_p10)
}
  0x6f   : > { %3096 = dma.hbm_to_vmem [thread:$0]  (!%p3666_p7), %s3662_s19, 512, %s3664_s9, %s3670_s30, %s3459_s21, %s3459_s21, %s3460_s29  }
  0x70   : > { %p4350_p2 = scmp.ne.s32.totalorder %s4346_s28, 0 }
  0x72   : > { %265 = sbr.rel (%p4350_p2) target bundleno = 2672 (0xa70), region = 44 }
  0x79   : > { %s267_s20 = sand.u32 1, %s3446_s22   ;;  %p4351_p6 = scmp.ne.s32.totalorder %s4345_s27, 0 }
  0x7a   : > { %s2713_s12 = sshll.u32 %s267_s20, 5  ;;  %s268_s15 = scalar_lea.sflag [#allocation5], %s267_s20 }
  0x7b   : > { %s271_s16 = scalar_lea.vmem [#allocation4], %s2713_s12 }
  0x7c   : > { %3429 = dma.done.wait (%p4351_p6), %s268_s15, 512  }
  0x7d   : > { %3431 = vsyncadd (%p4351_p6), %s268_s15, 4294966784  ;;  %p4352_p1 = scmp.ne.s32.totalorder %s4344_s26, 0 }
  0x7f   : > { %3433 = dma.done.wait (%p4352_p1), [#allocation7], 512  }
  0x80   : > { %3435 = vsyncadd (%p4352_p1), [#allocation7], 4294966784 }
  0x81   : > { %3437 = dma.done.wait (%p4352_p1), [#allocation10], 1024  }
  0x82   : > { %3439 = vsyncadd (%p4352_p1), [#allocation10], 4294966272  ;;  %v3159_v0 = vld [vmem:[#allocation6] sm:$0xff]   ;;  %v3160_v1 = vld [vmem:[#allocation6 + $0x8] sm:$0xff]   ;;  %vm371_vm0 = vcmask 261120   ;;  %v4342_v20 = vmov 0.0  }
  0x83   : > { %2849 = vmatprep.subr.bf16.mxu0 %v3159_v0  ;;  %3065 = vmatprep.subr.bf16.mxu1 %v3159_v0  ;;  %v3161_v2 = vld [vmem:[%s271_s16] sm:$0xff]   ;;  %v3162_v3 = vld [vmem:[%s271_s16 + $0x10] sm:$0xff]   ;;  %v3163_v4 = vld [vmem:[%s271_s16 + $0x8] sm:$0xff]   ;;  %vm453_vm1 = vcmask 785408   ;;  %vm3465_vm2 = vmmov 0   ;;  %s3466_s28 = smov 96  }
  0x84   : > { %2850 = vmatpush3.bf16.msra.mxu0 %v3159_v0  ;;  %3067 = vmatpush3.bf16.msra.mxu1 %v3159_v0  ;;  %v3164_v5 = vld [vmem:[%s271_s16 + $0x18] sm:$0xff]   ;;  %v2719_v7 = vld [vmem:[%s4333_s2] ss:$0 sm:$0xff]  ;;  %s3467_s21 = smov 64   ;;  %vm473_vm3 = vcmask 64512   ;;  %v463_v44 = vld [vmem:[#allocation9 + $0x8] sm:$0xff] }
  0x85   : > { %2851 = vmatprep.subr.bf16.mxu0 %v3160_v1  ;;  %3066 = vmatprep.subr.bf16.mxu1 %v3160_v1  ;;  %v462_v41 = vld [vmem:[#allocation9] sm:$0xff]  ;;  %vm671_vm4 = vcmask 130048   ;;  %s3468_s29 = smov 88   ;;  %s3469_s19 = smov 120   ;;  %vm2476_vm5 = vcmask 195584  }
  0x86   : > { %2853 = vmatprep.mubr.msk.bf16.mxu0 %vm371_vm0, %v3161_v2  ;;  %2857 = vmatprep.mubr.msk.bf16.mxu1 %vm371_vm0, %v3162_v3  ;;  %s3470_s9 = smov 56   ;;  %s3471_s17 = smov 80  }
  0x87   : > { %s3472_s30 = smov 112   ;;  %s3473_s7 = smov 48  }
  0x88   : > { %2852 = vmatpush3.bf16.msra.mxu0 %v3160_v1  ;;  %3068 = vmatpush3.bf16.msra.mxu1 %v3160_v1  ;;  %s3474_s14 = smov 72   ;;  %s3475_s18 = smov 104  }
  0x89   : > { %2861 = vmatprep.subr.bf16.mxu1 %v4342_v20  ;;  %2873 = vmatprep.subr.bf16.mxu0 %v4342_v20  ;;  %s3476_s11 = smov 40   ;;  %s3477_s10 = smov 8  }
  0x8a   : > { %s3478_s20 = smov 16   ;;  %s3479_s12 = smov 24  }
  0x8b   : > { %2854 = vmatmul.mubr.msk.bf16.vlgmr.msra.gmra.mrb[0].mxu0 %vm371_vm0, %v3163_v4  ;;  %2858 = vmatmul.mubr.msk.bf16.vlgmr.msra.gmra.mrb[0].mxu1 %vm371_vm0, %v3164_v5  ;;  %s2717_s15 = sshll.u32 %s2701_s25, 3 }
  0x8c   : > { %2863 = vmatprep.mubr.msk.bf16.mxu1 %vm3465_vm2, %v4342_v20  ;;  %2875 = vmatprep.mubr.msk.bf16.mxu0 %vm3465_vm2, %v4342_v20  ;;  %p314_p7 = scmp.lt.s32.totalorder %s2717_s15, 15 }
  0x8e   : > { %s4363_s15 = smov (!%p314_p7, %s2717_s15), 15 }
  0x8f   : > { %s2718_s16 = sshll.u32 %s4363_s15, 3 }
 0x15e   : > { %v2855_v6 = vpop.f32.mrb[0].mxu0  ;;  %v2859_v8 = vpop.f32.mrb[0].mxu1 }
 0x15f   : > { %v443_v9 = vadd.f32 %v2859_v8, %v2719_v7  ;;  %v418_v10 = vpop.f32.mrb[1].mxu0  ;;  %v434_v11 = vpop.f32.mrb[1].mxu1  ;;  %v427_v15 = vadd.f32 %v2855_v6, %v2719_v7 }
 0x160   : > { %v435_v12 = vadd.f32 %v2719_v7, %v434_v11  ;;  %v2856_v13 = vpop.f32.mrb[2].mxu0  ;;  %v2860_v14 = vpop.f32.mrb[2].mxu1  ;;  %v419_v21 = vadd.f32 %v2719_v7, %v418_v10 }
 0x161   : > { %v430_v16 = vadd.f32 %v2856_v13, %v2719_v7  ;;  %v446_v17 = vadd.f32 %v2860_v14, %v2719_v7  ;;  %v421_v18 = vpop.f32.mrb[3].mxu0  ;;  %v437_v19 = vpop.f32.mrb[3].mxu1 }
 0x162   : > { %v422_v22 = vadd.f32 %v2719_v7, %v421_v18  ;;  %v438_v23 = vadd.f32 %v2719_v7, %v437_v19 }
 0x163   : > { %v450_v24 = vpack.c.bf16 %v430_v16, %v427_v15  ;;  %v452_v25 = vpack.c.bf16 %v446_v17, %v443_v9 }
 0x164   : > { %v449_v26 = vpack.c.bf16 %v422_v22, %v419_v21  ;;  %v451_v27 = vpack.c.bf16 %v438_v23, %v435_v12 }
 0x165   : > { %455 = vst.msk [vmem:[#allocation2 + $0x8] sm:$0xff] %vm453_vm1, %v450_v24  ;;  %457 = vst.msk [vmem:[#allocation2 + $0x18] sm:$0xff] %vm453_vm1, %v452_v25 }
 0x166   : > { %454 = vst.msk [vmem:[#allocation2] sm:$0xff] %vm453_vm1, %v449_v26  ;;  %456 = vst.msk [vmem:[#allocation2 + $0x10] sm:$0xff] %vm453_vm1, %v451_v27 }
 0x16c   : > { %v3735_v30 = vld [vmem:[#allocation2 + $0x18] sm:$0xff]  ;;  %v3737_v31 = vld [vmem:[#allocation2 + $0x8] sm:$0xff] }
 0x16d   : > { %v3729_v28 = vld [vmem:[#allocation2 + $0x10] sm:$0xff]  ;;  %v3731_v29 = vld [vmem:[#allocation2] sm:$0xff] }
 0x16e   : > { %572 = vrot.lane.b32.xlu1 %v3729_v28, %s3466_s28  ;;  %471 = vrot.lane.b32.xlu0 %v3731_v29, %s3466_s28 }
 0x172   : > { %622 = vrot.lane.b32.xlu1 %v3735_v30, %s3466_s28  ;;  %522 = vrot.lane.b32.xlu0 %v3737_v31, %s3466_s28 }
 0x176   : > { %748 = vrot.lane.b32.xlu1 %v3731_v29, %s3467_s21 }
 0x1e0   : > { %v573_v32 = vpop.permute.xlu1 %572  ;;  %v472_v33 = vpop.permute.xlu0 %471 }
 0x1e1   : > { %v578_v34 = vsel %vm473_vm3, %v573_v32, 0  ;;  %v478_v35 = vsel %vm473_vm3, %v472_v33, 0 }
 0x1e2   : > { %2862 = vmatpush3.bf16.xpose.msra.mxu1 %v478_v35  ;;  %2874 = vmatpush3.bf16.xpose.msra.mxu0 %v578_v34 }
 0x1e3   : > { %2867 = vmatprep.subr.bf16.mxu1 %v4342_v20  ;;  %2885 = vmatprep.subr.bf16.mxu0 %v4342_v20 }
 0x1e4   : > { %v623_v36 = vpop.permute.xlu1 %622  ;;  %v523_v37 = vpop.permute.xlu0 %522 }
 0x1e5   : > { %v528_v39 = vsel %vm473_vm3, %v523_v37, 0  ;;  %v628_v40 = vsel %vm473_vm3, %v623_v36, 0 }
 0x1e8   : > { %v749_v38 = vpop.permute.xlu1 %748 }
 0x1e9   : > { %2864 = vmatmul.mubr.msk.bf16.vlgmr.msra.gmra.mrb[4].mxu1 %vm473_vm3, %v3731_v29  ;;  %2876 = vmatmul.mubr.msk.bf16.vlgmr.msra.gmra.mrb[4].mxu0 %vm473_vm3, %v3729_v28 }
 0x1ea   : > { %2868 = vmatpush3.bf16.xpose.msra.mxu1 %v528_v39  ;;  %2886 = vmatpush3.bf16.msra.mxu0 %v749_v38 }
 0x1eb   : > { %2869 = vmatprep.mubr.msk.bf16.mxu1 %vm3465_vm2, %v4342_v20  ;;  %2879 = vmatprep.subr.bf16.mxu1 %v4342_v20 }
 0x1ec   : > { %2887 = vmatprep.mubr.msk.bf16.mxu0 %vm3465_vm2, %v4342_v20  ;;  %2897 = vmatprep.subr.bf16.mxu0 %v4342_v20 }
 0x1f1   : > { %2870 = vmatmul.mubr.msk.bf16.vlgmr.msra.gmra.mrb[8].mxu1 %vm473_vm3, %v3737_v31 }
 0x1f2   : > { %2880 = vmatpush3.bf16.xpose.msra.mxu1 %v628_v40  ;;  %2881 = vmatprep.mubr.msk.bf16.mxu1 %vm3465_vm2, %v4342_v20 }
 0x1f3   : > { %2891 = vmatprep.subr.bf16.mxu1 %v4342_v20 }
 0x1f9   : > { %2882 = vmatmul.mubr.msk.bf16.vlgmr.msra.gmra.mrb[12].mxu1 %vm473_vm3, %v3735_v30 }
 0x1fa   : > { %2893 = vmatprep.mubr.msk.bf16.mxu1 %vm3465_vm2, %v4342_v20 }
 0x2bc   : > { %v514_v42 = vpop.f32.mrb[4].mxu1  ;;  %v614_v43 = vpop.f32.mrb[4].mxu0 }
 0x2bd   : > { %v515_v45 = vadd.f32 %v514_v42, %v462_v41  ;;  %v3768_v46 = vadd.f32 %v614_v43, %v462_v41  ;;  %v2865_v47 = vpop.f32.mrb[5].mxu1  ;;  %v2877_v48 = vpop.f32.mrb[5].mxu0 }
 0x2be   : > { %v517_v49 = vpop.f32.mrb[6].mxu1  ;;  %v617_v50 = vpop.f32.mrb[6].mxu0 }
 0x2bf   : > { %v518_v51 = vadd.f32 %v517_v49, %v463_v44  ;;  %v3770_v52 = vadd.f32 %v617_v50, %v463_v44  ;;  %v2866_v53 = vpop.f32.mrb[7].mxu1  ;;  %v2878_v54 = vpop.f32.mrb[7].mxu0  ;;  %v684_v55 = vsel %vm671_vm4, %v3768_v46, -inf  ;;  %v672_v56 = vsel %vm671_vm4, %v515_v45, -inf }
 0x2c0   : > { %685 = vmax.xlane.f32.xlu1 %v684_v55  ;;  %673 = vmax.xlane.f32.xlu0 %v672_v56 }
 0x2c1   : > { %v687_v57 = vsel %vm671_vm4, %v3770_v52, -inf  ;;  %v675_v58 = vsel %vm671_vm4, %v518_v51, -inf }
 0x2c4   : > { %688 = vmax.xlane.f32.xlu0 %v687_v57  ;;  %676 = vmax.xlane.f32.xlu1 %v675_v58  ;;  %v564_v59 = vpop.f32.mrb[8].mxu1 }
 0x2c5   : > { %v565_v60 = vadd.f32 %v564_v59, %v462_v41  ;;  %v2871_v61 = vpop.f32.mrb[9].mxu1 }
 0x2c6   : > { %v567_v62 = vpop.f32.mrb[10].mxu1 }
 0x2c7   : > { %v568_v63 = vadd.f32 %v567_v62, %v463_v44  ;;  %v2872_v0 = vpop.f32.mrb[11].mxu1  ;;  %v678_v1 = vsel %vm671_vm4, %v565_v60, -inf }
 0x2c8   : > { %679 = vmax.xlane.f32.xlu0 %v678_v1 }
 0x2c9   : > { %v681_v2 = vsel %vm671_vm4, %v568_v63, -inf }
 0x2cc   : > { %682 = vmax.xlane.f32.xlu0 %v681_v2  ;;  %v664_v3 = vpop.f32.mrb[12].mxu1 }
 0x2cd   : > { %v2883_v4 = vpop.f32.mrb[13].mxu1  ;;  %v3786_v7 = vadd.f32 %v664_v3, %v462_v41 }
 0x2ce   : > { %v667_v5 = vpop.f32.mrb[14].mxu1 }
 0x2cf   : > { %v2884_v6 = vpop.f32.mrb[15].mxu1  ;;  %v3788_v8 = vadd.f32 %v667_v5, %v463_v44  ;;  %v690_v9 = vsel %vm671_vm4, %v3786_v7, -inf }
 0x2d1   : > { %v693_v10 = vsel %vm671_vm4, %v3788_v8, -inf }
 0x2d5   : > { %842 = vrot.lane.b32.xlu1 %v3729_v28, %s3467_s21 }
 0x2d9   : > { %889 = vrot.lane.b32.xlu1 %v3735_v30, %s3467_s21 }
 0x2e2   : > { %795 = vrot.lane.b32.xlu0 %v3737_v31, %s3467_s21 }
 0x2fd   : > { %691 = vmax.xlane.f32.xlu1 %v690_v9 }
 0x301   : > { %694 = vmax.xlane.f32.xlu0 %v693_v10 }
 0x30e   : > { %1009 = vrot.lane.b32.xlu1 %v3737_v31, %s3468_s29 }
 0x312   : > { %1060 = vrot.lane.b32.xlu1 %v3729_v28, %s3468_s29 }
 0x316   : > { %1111 = vrot.lane.b32.xlu1 %v3735_v30, %s3468_s29 }
 0x317   : > { %958 = vrot.lane.b32.xlu0 %v3731_v29, %s3468_s29  ;;  %s317_s29 = scalar_lea.vmem %s4337_s6, %s2718_s16 }
 0x31a   : > { %1109 = vrot.lane.b32.xlu1 %v3735_v30, %s3469_s19 }
 0x31b   : > { %956 = vrot.lane.b32.xlu0 %v3731_v29, %s3469_s19 }
 0x31e   : > { %1236 = vrot.lane.b32.xlu1 %v3731_v29, %s3470_s9 }
 0x31f   : > { %1007 = vrot.lane.b32.xlu0 %v3737_v31, %s3469_s19 }
 0x322   : > { %1330 = vrot.lane.b32.xlu1 %v3729_v28, %s3470_s9 }
 0x323   : > { %1058 = vrot.lane.b32.xlu0 %v3729_v28, %s3469_s19 }
 0x326   : > { %1377 = vrot.lane.b32.xlu1 %v3735_v30, %s3470_s9 }
 0x327   : > { %1283 = vrot.lane.b32.xlu0 %v3737_v31, %s3470_s9 }
 0x34d   : > { %v686_v11 = vpop.xlane.xlu1 %685  ;;  %v674_v12 = vpop.xlane.xlu0 %673 }
 0x34e   : > { %v696_v13 = vsub.f32 %v515_v45, %v674_v12  ;;  %v700_v18 = vsub.f32 %v3768_v46, %v686_v11 }
 0x350   : > { %v704_v14 = vmul.f32 1.442695, %v696_v13  ;;  %v712_v24 = vmul.f32 1.442695, %v700_v18 }
 0x351   : > { %v677_v15 = vpop.xlane.xlu1 %676  ;;  %v689_v16 = vpop.xlane.xlu0 %688 }
 0x352   : > { %v697_v17 = vsub.f32 %v518_v51, %v677_v15  ;;  %v701_v21 = vsub.f32 %v3770_v52, %v689_v16  ;;  %3167 = vpow2.f32 %v704_v14 }
 0x354   : > { %v706_v19 = vmul.f32 1.442695, %v697_v17  ;;  %v714_v25 = vmul.f32 1.442695, %v701_v21  ;;  %v464_v17 = vld [vmem:[#allocation9 + $0x10] sm:$0xff] }
 0x355   : > { %v680_v22 = vpop.xlane.xlu0 %679  ;;  %v843_v38 = vpop.permute.xlu1 %842 }
 0x356   : > { %3169 = vpow2.f32 %v706_v19  ;;  %v698_v23 = vsub.f32 %v565_v60, %v680_v22  ;;  %v465_v19 = vld [vmem:[#allocation9 + $0x18] sm:$0xff] }
 0x357   : > { %3171 = vpow2.f32 %v712_v24 }
 0x358   : > { %v708_v26 = vmul.f32 1.442695, %v698_v23  ;;  %3173 = vpow2.f32 %v714_v25 }
 0x359   : > { %v683_v27 = vpop.xlane.xlu0 %682  ;;  %v890_v45 = vpop.permute.xlu1 %889 }
 0x35a   : > { %v699_v32 = vsub.f32 %v568_v63, %v683_v27  ;;  %3175 = vpow2.f32 %v708_v26 }
 0x35c   : > { %v710_v33 = vmul.f32 1.442695, %v699_v32  ;;  %v3808_v35 = vpop.eup %3167 }
 0x35d   : > { %v796_v34 = vpop.permute.xlu0 %795 }
 0x35e   : > { %3177 = vpow2.f32 %v710_v33  ;;  %2892 = vmatpush3.bf16.msra.mxu1 %v796_v34 }
 0x35f   : > { %2903 = vmatprep.subr.bf16.mxu1 %v4342_v20 }
 0x360   : > { %v3811_v36 = vpop.eup %3169 }
 0x361   : > { %v744_v37 = vpack.c.bf16 %v3811_v36, %v3808_v35  ;;  %v3818_v39 = vpop.eup %3171 }
 0x362   : > { %v3821_v40 = vpop.eup %3173 }
 0x363   : > { %2888 = vmatmul.mubr.msk.bf16.vlgmr.msra.gmra.mrb[8].mxu0 %vm671_vm4, %v744_v37  ;;  %v746_v44 = vpack.c.bf16 %v3821_v40, %v3818_v39 }
 0x364   : > { %2898 = vmatpush3.bf16.msra.mxu0 %v843_v38  ;;  %2899 = vmatprep.mubr.msk.bf16.mxu0 %vm3465_vm2, %v4342_v20  ;;  %v3823_v41 = vpop.eup %3175 }
 0x365   : > { %2909 = vmatprep.subr.bf16.mxu0 %v4342_v20 }
 0x368   : > { %v3825_v42 = vpop.eup %3177 }
 0x369   : > { %v745_v43 = vpack.c.bf16 %v3825_v42, %v3823_v41 }
 0x36b   : > { %2894 = vmatmul.mubr.msk.bf16.vlgmr.msra.gmra.mrb[16].mxu1 %vm671_vm4, %v745_v43  ;;  %2900 = vmatmul.mubr.msk.bf16.vlgmr.msra.gmra.mrb[12].mxu0 %vm671_vm4, %v746_v44 }
 0x36c   : > { %2904 = vmatpush3.bf16.msra.mxu1 %v890_v45  ;;  %2911 = vmatprep.mubr.msk.bf16.mxu0 %vm3465_vm2, %v4342_v20 }
 0x36d   : > { %2905 = vmatprep.mubr.msk.bf16.mxu1 %vm3465_vm2, %v4342_v20  ;;  %2915 = vmatprep.subr.bf16.mxu1 %v4342_v20 }
 0x38a   : > { %v692_v46 = vpop.xlane.xlu1 %691 }
 0x38b   : > { %v702_v47 = vsub.f32 %v3786_v7, %v692_v46 }
 0x38d   : > { %v716_v48 = vmul.f32 1.442695, %v702_v47 }
 0x38e   : > { %v1010_v49 = vpop.permute.xlu1 %1009  ;;  %v695_v50 = vpop.xlane.xlu0 %694 }
 0x38f   : > { %v703_v51 = vsub.f32 %v3788_v8, %v695_v50  ;;  %3179 = vpow2.f32 %v716_v48  ;;  %v1015_v0 = vsel %vm473_vm3, %v1010_v49, 0 }
 0x391   : > { %v718_v52 = vmul.f32 1.442695, %v703_v51 }
 0x392   : > { %v1061_v53 = vpop.permute.xlu1 %1060  ;;  %v959_v54 = vpop.permute.xlu0 %958 }
 0x393   : > { %3181 = vpow2.f32 %v718_v52  ;;  %v964_v55 = vsel %vm473_vm3, %v959_v54, 0  ;;  %v1066_v58 = vsel %vm473_vm3, %v1061_v53, 0 }
 0x394   : > { %2910 = vmatpush3.bf16.xpose.msra.mxu0 %v964_v55 }
 0x395   : > { %2921 = vmatprep.subr.bf16.mxu0 %v4342_v20 }
 0x396   : > { %v957_v56 = vpop.permute.xlu0 %956  ;;  %v1112_v57 = vpop.permute.xlu1 %1111 }
 0x397   : > { %v1117_v3 = vsel %vm473_vm3, %v1112_v57, 0 }
 0x399   : > { %v3844_v59 = vpop.eup %3179 }
 0x39a   : > { %v1008_v60 = vpop.permute.xlu0 %1007  ;;  %v1110_v62 = vpop.permute.xlu1 %1109 }
 0x39b   : > { %2912 = vmatmul.mubr.msk.bf16.vlgmr.msra.gmra.mrb[16].mxu0 %vm473_vm3, %v957_v56 }
 0x39c   : > { %2922 = vmatpush3.bf16.xpose.msra.mxu0 %v1066_v58  ;;  %2923 = vmatprep.mubr.msk.bf16.mxu0 %vm3465_vm2, %v4342_v20 }
 0x39d   : > { %v3848_v61 = vpop.eup %3181  ;;  %2933 = vmatprep.subr.bf16.mxu0 %v4342_v20 }
 0x39e   : > { %v747_v63 = vpack.c.bf16 %v3848_v61, %v3844_v59  ;;  %v1059_v1 = vpop.permute.xlu0 %1058  ;;  %v1237_v2 = vpop.permute.xlu1 %1236 }
 0x3a0   : > { %2906 = vmatmul.mubr.msk.bf16.vlgmr.msra.gmra.mrb[20].mxu1 %vm671_vm4, %v747_v63 }
 0x3a1   : > { %2916 = vmatpush3.bf16.xpose.msra.mxu1 %v1015_v0  ;;  %2917 = vmatprep.mubr.msk.bf16.mxu1 %vm3465_vm2, %v4342_v20 }
 0x3a2   : > { %2927 = vmatprep.subr.bf16.mxu1 %v4342_v20  ;;  %v1284_v4 = vpop.permute.xlu0 %1283 }
 0x3a3   : > { %2924 = vmatmul.mubr.msk.bf16.vlgmr.msra.gmra.mrb[20].mxu0 %vm473_vm3, %v1059_v1 }
 0x3a4   : > { %2934 = vmatpush3.bf16.msra.mxu0 %v1237_v2  ;;  %2935 = vmatprep.mubr.msk.bf16.mxu0 %vm3465_vm2, %v4342_v20 }
 0x3a5   : > { %2945 = vmatprep.subr.bf16.mxu0 %v4342_v20 }
 0x3a8   : > { %2918 = vmatmul.mubr.msk.bf16.vlgmr.msra.gmra.mrb[24].mxu1 %vm473_vm3, %v1008_v60 }
 0x3a9   : > { %2928 = vmatpush3.bf16.xpose.msra.mxu1 %v1117_v3  ;;  %2929 = vmatprep.mubr.msk.bf16.mxu1 %vm3465_vm2, %v4342_v20 }
 0x3aa   : > { %2939 = vmatprep.subr.bf16.mxu1 %v4342_v20 }
 0x3b0   : > { %2930 = vmatmul.mubr.msk.bf16.vlgmr.msra.gmra.mrb[28].mxu1 %vm473_vm3, %v1110_v62 }
 0x3b1   : > { %2940 = vmatpush3.bf16.msra.mxu1 %v1284_v4  ;;  %2941 = vmatprep.mubr.msk.bf16.mxu1 %vm3465_vm2, %v4342_v20  ;;  %v1331_v4 = vpop.permute.xlu1 %1330 }
 0x3b2   : > { %2951 = vmatprep.subr.bf16.mxu1 %v4342_v20 }
 0x436   : > { %v3871_v5 = vpop.f32.mrb[8].mxu0 }
 0x437   : > { %v2889_v6 = vpop.f32.mrb[9].mxu0 }
 0x438   : > { %v3873_v7 = vpop.f32.mrb[10].mxu0  ;;  %v1378_v6 = vpop.permute.xlu1 %1377 }
 0x439   : > { %v2890_v8 = vpop.f32.mrb[11].mxu0 }
 0x43e   : > { %v3875_v9 = vpop.f32.mrb[16].mxu1  ;;  %v3877_v10 = vpop.f32.mrb[12].mxu0 }
 0x43f   : > { %v2895_v11 = vpop.f32.mrb[17].mxu1  ;;  %v2901_v12 = vpop.f32.mrb[13].mxu0 }
 0x440   : > { %v3879_v13 = vpop.f32.mrb[18].mxu1  ;;  %v3881_v14 = vpop.f32.mrb[14].mxu0 }
 0x441   : > { %v2896_v15 = vpop.f32.mrb[19].mxu1  ;;  %v2902_v16 = vpop.f32.mrb[15].mxu0 }
 0x46e   : > { %v1000_v18 = vpop.f32.mrb[16].mxu0 }
 0x46f   : > { %v3883_v21 = vadd.f32 %v1000_v18, %v464_v17  ;;  %v2913_v22 = vpop.f32.mrb[17].mxu0 }
 0x470   : > { %v1003_v23 = vpop.f32.mrb[18].mxu0 }
 0x471   : > { %v1004_v24 = vadd.f32 %v1003_v23, %v465_v19  ;;  %v2914_v25 = vpop.f32.mrb[19].mxu0  ;;  %v1160_v26 = vsel %vm671_vm4, %v3883_v21, -inf }
 0x472   : > { %1161 = vmax.xlane.f32.xlu0 %v1160_v26 }
 0x473   : > { %v3887_v27 = vpop.f32.mrb[20].mxu1  ;;  %v1163_v32 = vsel %vm671_vm4, %v1004_v24, -inf }
 0x474   : > { %4353 = vst [vmem:[#allocation14_spill] sm:$0xff] %v3887_v27  ;;  %v2907_v33 = vpop.f32.mrb[21].mxu1  ;;  %1164 = vmax.xlane.f32.xlu1 %v1163_v32 }
 0x475   : > { %v3890_v34 = vpop.f32.mrb[22].mxu1 }
 0x476   : > { %4354 = vst [vmem:[#allocation15_spill] sm:$0xff] %v3890_v34  ;;  %v2908_v37 = vpop.f32.mrb[23].mxu1  ;;  %v1102_v38 = vpop.f32.mrb[20].mxu0 }
 0x477   : > { %v3892_v43 = vadd.f32 %v1102_v38, %v464_v17  ;;  %v2925_v44 = vpop.f32.mrb[21].mxu0 }
 0x478   : > { %v1105_v45 = vpop.f32.mrb[22].mxu0 }
 0x479   : > { %v2926_v46 = vpop.f32.mrb[23].mxu0  ;;  %v1172_v47 = vsel %vm671_vm4, %v3892_v43, -inf  ;;  %v1106_v55 = vadd.f32 %v1105_v45, %v465_v19 }
 0x47a   : > { %1173 = vmax.xlane.f32.xlu1 %v1172_v47 }
 0x47b   : > { %v1051_v48 = vpop.f32.mrb[24].mxu1  ;;  %v1175_v2 = vsel %vm671_vm4, %v1106_v55, -inf }
 0x47c   : > { %v1052_v49 = vadd.f32 %v1051_v48, %v464_v17  ;;  %v2919_v50 = vpop.f32.mrb[25].mxu1 }
 0x47d   : > { %v1054_v51 = vpop.f32.mrb[26].mxu1 }
 0x47e   : > { %v1055_v52 = vadd.f32 %v1054_v51, %v465_v19  ;;  %v2920_v53 = vpop.f32.mrb[27].mxu1  ;;  %v1166_v54 = vsel %vm671_vm4, %v1052_v49, -inf }
 0x47f   : > { %1167 = vmax.xlane.f32.xlu0 %v1166_v54 }
 0x480   : > { %v1169_v56 = vsel %vm671_vm4, %v1055_v52, -inf }
 0x483   : > { %1170 = vmax.xlane.f32.xlu0 %v1169_v56  ;;  %v1153_v57 = vpop.f32.mrb[28].mxu1 }
 0x484   : > { %v1154_v58 = vadd.f32 %v1153_v57, %v464_v17  ;;  %v2931_v60 = vpop.f32.mrb[29].mxu1 }
 0x485   : > { %v1156_v62 = vpop.f32.mrb[30].mxu1 }
 0x486   : > { %v1157_v63 = vadd.f32 %v1156_v62, %v465_v19  ;;  %v2932_v0 = vpop.f32.mrb[31].mxu1  ;;  %v1178_v1 = vsel %vm671_vm4, %v1154_v58, -inf }
 0x487   : > { %1179 = vmax.xlane.f32.xlu1 %v1178_v1  ;;  %1176 = vmax.xlane.f32.xlu0 %v1175_v2 }
 0x488   : > { %v1181_v3 = vsel %vm671_vm4, %v1157_v63, -inf }
 0x48b   : > { %1182 = vmax.xlane.f32.xlu0 %v1181_v3 }
 0x498   : > { %1497 = vrot.lane.b32.xlu1 %v3737_v31, %s3471_s17 }
 0x49c   : > { %1548 = vrot.lane.b32.xlu1 %v3729_v28, %s3471_s17 }
 0x4a0   : > { %1599 = vrot.lane.b32.xlu1 %v3735_v30, %s3471_s17 }
 0x4a1   : > { %1446 = vrot.lane.b32.xlu0 %v3731_v29, %s3471_s17 }
 0x4a4   : > { %1597 = vrot.lane.b32.xlu1 %v3735_v30, %s3472_s30 }
 0x4a5   : > { %1444 = vrot.lane.b32.xlu0 %v3731_v29, %s3472_s30 }
 0x4a8   : > { %1724 = vrot.lane.b32.xlu1 %v3731_v29, %s3473_s7 }
 0x4a9   : > { %1495 = vrot.lane.b32.xlu0 %v3737_v31, %s3472_s30 }
 0x4ac   : > { %1818 = vrot.lane.b32.xlu1 %v3729_v28, %s3473_s7 }
 0x4ad   : > { %1546 = vrot.lane.b32.xlu0 %v3729_v28, %s3472_s30 }
 0x4b0   : > { %1865 = vrot.lane.b32.xlu1 %v3735_v30, %s3473_s7 }
 0x4b1   : > { %1771 = vrot.lane.b32.xlu0 %v3737_v31, %s3473_s7 }
 0x4ff   : > { %v1162_v8 = vpop.xlane.xlu0 %1161 }
 0x500   : > { %v1184_v11 = vsub.f32 %v3883_v21, %v1162_v8 }
 0x501   : > { %v1165_v12 = vpop.xlane.xlu1 %1164 }
 0x502   : > { %v1192_v15 = vmul.f32 1.442695, %v1184_v11  ;;  %v1185_v16 = vsub.f32 %v1004_v24, %v1165_v12 }
 0x504   : > { %v1194_v17 = vmul.f32 1.442695, %v1185_v16  ;;  %3183 = vpow2.f32 %v1192_v15 }
 0x506   : > { %3185 = vpow2.f32 %v1194_v17 }
 0x507   : > { %v1174_v22 = vpop.xlane.xlu1 %1173 }
 0x508   : > { %v1188_v33 = vsub.f32 %v3892_v43, %v1174_v22 }
 0x50a   : > { %v1200_v45 = vmul.f32 1.442695, %v1188_v33 }
 0x50c   : > { %v1168_v18 = vpop.xlane.xlu0 %1167 }
 0x50d   : > { %v1186_v19 = vsub.f32 %v1052_v49, %v1168_v18 }
 0x50e   : > { %v3914_v23 = vpop.eup %3183 }
 0x50f   : > { %v1196_v26 = vmul.f32 1.442695, %v1186_v19 }
 0x510   : > { %v3916_v25 = vpop.eup %3185  ;;  %v1171_v32 = vpop.xlane.xlu0 %1170 }
 0x511   : > { %v1187_v37 = vsub.f32 %v1055_v52, %v1171_v32  ;;  %v1232_v21 = vpack.c.bf16 %v3916_v25, %v3914_v23  ;;  %3187 = vpow2.f32 %v1196_v26 }
 0x513   : > { %v1198_v38 = vmul.f32 1.442695, %v1187_v37  ;;  %2936 = vmatmul.mubr.msk.bf16.vlgmr.msra.gmra.mrb[24].mxu0 %vm671_vm4, %v1232_v21 }
 0x514   : > { %2946 = vmatpush3.bf16.msra.mxu0 %v1331_v4  ;;  %v1180_v24 = vpop.xlane.xlu1 %1179  ;;  %v1177_v44 = vpop.xlane.xlu0 %1176  ;;  %2947 = vmatprep.mubr.msk.bf16.mxu0 %vm3465_vm2, %v4342_v20 }
 0x515   : > { %3189 = vpow2.f32 %v1198_v38  ;;  %v1190_v46 = vsub.f32 %v1154_v58, %v1180_v24  ;;  %v1189_v47 = vsub.f32 %v1106_v55, %v1177_v44  ;;  %2957 = vmatprep.subr.bf16.mxu0 %v4342_v20 }
 0x516   : > { %3191 = vpow2.f32 %v1200_v45 }
 0x517   : > { %v1202_v43 = vmul.f32 1.442695, %v1189_v47  ;;  %v1204_v48 = vmul.f32 1.442695, %v1190_v46 }
 0x518   : > { %v1183_v49 = vpop.xlane.xlu0 %1182  ;;  %v1498_v54 = vpop.permute.xlu1 %1497 }
 0x519   : > { %v1191_v50 = vsub.f32 %v1157_v63, %v1183_v49  ;;  %3193 = vpow2.f32 %v1202_v43  ;;  %v1503_v4 = vsel %vm473_vm3, %v1498_v54, 0  ;;  %v467_v54 = vld [vmem:[#allocation9 + $0x28] sm:$0xff] }
 0x51a   : > { %3195 = vpow2.f32 %v1204_v48 }
 0x51b   : > { %v1206_v51 = vmul.f32 1.442695, %v1191_v50  ;;  %v3925_v52 = vpop.eup %3187  ;;  %v466_v50 = vld [vmem:[#allocation9 + $0x20] sm:$0xff] }
 0x51c   : > { %v1447_v57 = vpop.permute.xlu0 %1446  ;;  %v1549_v60 = vpop.permute.xlu1 %1548 }
 0x51d   : > { %3197 = vpow2.f32 %v1206_v51  ;;  %v1452_v1 = vsel %vm473_vm3, %v1447_v57, 0  ;;  %v1554_v8 = vsel %vm473_vm3, %v1549_v60, 0 }
 0x51f   : > { %v3927_v53 = vpop.eup %3189 }
 0x520   : > { %v1233_v56 = vpack.c.bf16 %v3927_v53, %v3925_v52  ;;  %v3932_v55 = vpop.eup %3191  ;;  %v1445_v3 = vpop.permute.xlu0 %1444 }
 0x522   : > { %2942 = vmatmul.mubr.msk.bf16.vlgmr.msra.gmra.mrb[32].mxu1 %vm671_vm4, %v1233_v56 }
 0x523   : > { %2952 = vmatpush3.bf16.msra.mxu1 %v1378_v6  ;;  %2953 = vmatprep.mubr.msk.bf16.mxu1 %vm3465_vm2, %v4342_v20  ;;  %v3936_v58 = vpop.eup %3193  ;;  %v1600_v6 = vpop.permute.xlu1 %1599 }
 0x524   : > { %2963 = vmatprep.subr.bf16.mxu1 %v4342_v20  ;;  %v1234_v62 = vpack.c.bf16 %v3936_v58, %v3932_v55  ;;  %v3941_v63 = vpop.eup %3195  ;;  %v1496_v11 = vpop.permute.xlu0 %1495  ;;  %v1605_v15 = vsel %vm473_vm3, %v1600_v6, 0 }
 0x526   : > { %2948 = vmatmul.mubr.msk.bf16.vlgmr.msra.gmra.mrb[28].mxu0 %vm671_vm4, %v1234_v62 }
 0x527   : > { %v3943_v0 = vpop.eup %3197  ;;  %2958 = vmatpush3.bf16.xpose.msra.mxu0 %v1452_v1  ;;  %2959 = vmatprep.mubr.msk.bf16.mxu0 %vm3465_vm2, %v4342_v20  ;;  %v1598_v12 = vpop.permute.xlu1 %1597 }
 0x528   : > { %v1235_v2 = vpack.c.bf16 %v3943_v0, %v3941_v63  ;;  %2969 = vmatprep.subr.bf16.mxu0 %v4342_v20  ;;  %v1547_v16 = vpop.permute.xlu0 %1546 }
 0x52a   : > { %2954 = vmatmul.mubr.msk.bf16.vlgmr.msra.gmra.mrb[36].mxu1 %vm671_vm4, %v1235_v2 }
 0x52b   : > { %2965 = vmatprep.mubr.msk.bf16.mxu1 %vm3465_vm2, %v4342_v20  ;;  %v1725_v17 = vpop.permute.xlu1 %1724 }
 0x52c   : > { %2964 = vmatpush3.bf16.xpose.msra.mxu1 %v1503_v4  ;;  %v1772_v18 = vpop.permute.xlu0 %1771 }
 0x52d   : > { %2975 = vmatprep.subr.bf16.mxu1 %v4342_v20 }
 0x52e   : > { %2960 = vmatmul.mubr.msk.bf16.vlgmr.msra.gmra.mrb[32].mxu0 %vm473_vm3, %v1445_v3 }
 0x52f   : > { %2970 = vmatpush3.bf16.xpose.msra.mxu0 %v1554_v8  ;;  %2971 = vmatprep.mubr.msk.bf16.mxu0 %vm3465_vm2, %v4342_v20 }
 0x530   : > { %2981 = vmatprep.subr.bf16.mxu0 %v4342_v20 }
 0x533   : > { %2966 = vmatmul.mubr.msk.bf16.vlgmr.msra.gmra.mrb[40].mxu1 %vm473_vm3, %v1496_v11 }
 0x534   : > { %2976 = vmatpush3.bf16.xpose.msra.mxu1 %v1605_v15  ;;  %2977 = vmatprep.mubr.msk.bf16.mxu1 %vm3465_vm2, %v4342_v20 }
 0x535   : > { %2987 = vmatprep.subr.bf16.mxu1 %v4342_v20 }
 0x536   : > { %2972 = vmatmul.mubr.msk.bf16.vlgmr.msra.gmra.mrb[36].mxu0 %vm473_vm3, %v1547_v16 }
 0x537   : > { %2982 = vmatpush3.bf16.msra.mxu0 %v1725_v17  ;;  %2983 = vmatprep.mubr.msk.bf16.mxu0 %vm3465_vm2, %v4342_v20 }
 0x538   : > { %2993 = vmatprep.subr.bf16.mxu0 %v4342_v20 }
 0x53b   : > { %2978 = vmatmul.mubr.msk.bf16.vlgmr.msra.gmra.mrb[44].mxu1 %vm473_vm3, %v1598_v12 }
 0x53c   : > { %2988 = vmatpush3.bf16.msra.mxu1 %v1772_v18  ;;  %2989 = vmatprep.mubr.msk.bf16.mxu1 %vm3465_vm2, %v4342_v20 }
 0x53d   : > { %2999 = vmatprep.subr.bf16.mxu1 %v4342_v20 }
 0x5e6   : > { %v3975_v19 = vpop.f32.mrb[24].mxu0 }
 0x5e7   : > { %v2937_v22 = vpop.f32.mrb[25].mxu0 }
 0x5e8   : > { %v3977_v26 = vpop.f32.mrb[26].mxu0 }
 0x5e9   : > { %v2938_v32 = vpop.f32.mrb[27].mxu0 }
 0x5f5   : > { %v3979_v33 = vpop.f32.mrb[32].mxu1 }
 0x5f6   : > { %v2943_v37 = vpop.f32.mrb[33].mxu1 }
 0x5f7   : > { %v3981_v21 = vpop.f32.mrb[34].mxu1 }
 0x5f8   : > { %v2944_v38 = vpop.f32.mrb[35].mxu1 }
 0x5f9   : > { %v3983_v24 = vpop.f32.mrb[28].mxu0 }
 0x5fa   : > { %v2949_v44 = vpop.f32.mrb[29].mxu0 }
 0x5fb   : > { %v3985_v45 = vpop.f32.mrb[30].mxu0 }
 0x5fc   : > { %v2950_v46 = vpop.f32.mrb[31].mxu0 }
 0x5fd   : > { %v3987_v47 = vpop.f32.mrb[36].mxu1 }
 0x5fe   : > { %v2955_v43 = vpop.f32.mrb[37].mxu1 }
 0x5ff   : > { %v3989_v48 = vpop.f32.mrb[38].mxu1 }
 0x600   : > { %v2956_v49 = vpop.f32.mrb[39].mxu1 }
 0x601   : > { %v1488_v51 = vpop.f32.mrb[32].mxu0 }
 0x602   : > { %v1489_v56 = vadd.f32 %v1488_v51, %v466_v50  ;;  %v2961_v57 = vpop.f32.mrb[33].mxu0 }
 0x603   : > { %v1491_v60 = vpop.f32.mrb[34].mxu0 }
 0x604   : > { %v1492_v62 = vadd.f32 %v1491_v60, %v467_v54  ;;  %v2962_v1 = vpop.f32.mrb[35].mxu0  ;;  %v1648_v2 = vsel %vm671_vm4, %v1489_v56, -inf }
 0x605   : > { %1649 = vmax.xlane.f32.xlu0 %v1648_v2 }
 0x606   : > { %v1539_v3 = vpop.f32.mrb[40].mxu1  ;;  %v1651_v8 = vsel %vm671_vm4, %v1492_v62, -inf }
 0x607   : > { %v1540_v4 = vadd.f32 %v1539_v3, %v466_v50  ;;  %v2967_v6 = vpop.f32.mrb[41].mxu1  ;;  %1652 = vmax.xlane.f32.xlu1 %v1651_v8 }
 0x608   : > { %v1542_v11 = vpop.f32.mrb[42].mxu1 }
 0x609   : > { %v1543_v12 = vadd.f32 %v1542_v11, %v467_v54  ;;  %v2968_v15 = vpop.f32.mrb[43].mxu1  ;;  %v1654_v16 = vsel %vm671_vm4, %v1540_v4, -inf  ;;  %v1590_v17 = vpop.f32.mrb[36].mxu0 }
 0x60a   : > { %1655 = vmax.xlane.f32.xlu0 %v1654_v16  ;;  %v1591_v18 = vadd.f32 %v1590_v17, %v466_v50  ;;  %v2973_v22 = vpop.f32.mrb[37].mxu0 }
 0x60b   : > { %v1593_v32 = vpop.f32.mrb[38].mxu0  ;;  %v1657_v44 = vsel %vm671_vm4, %v1543_v12, -inf }
 0x60c   : > { %v1594_v37 = vadd.f32 %v1593_v32, %v467_v54  ;;  %v2974_v38 = vpop.f32.mrb[39].mxu0  ;;  %v1660_v46 = vsel %vm671_vm4, %v1591_v18, -inf }
 0x60d   : > { %1661 = vmax.xlane.f32.xlu1 %v1660_v46 }
 0x60e   : > { %1658 = vmax.xlane.f32.xlu0 %v1657_v44  ;;  %v1641_v43 = vpop.f32.mrb[44].mxu1  ;;  %v1663_v3 = vsel %vm671_vm4, %v1594_v37, -inf }
 0x60f   : > { %v1642_v49 = vadd.f32 %v1641_v43, %v466_v50  ;;  %v2979_v51 = vpop.f32.mrb[45].mxu1  ;;  %v1819_v50 = vpop.permute.xlu1 %1818 }
 0x610   : > { %v1644_v57 = vpop.f32.mrb[46].mxu1 }
 0x611   : > { %v1645_v60 = vadd.f32 %v1644_v57, %v467_v54  ;;  %v2980_v1 = vpop.f32.mrb[47].mxu1  ;;  %v1666_v2 = vsel %vm671_vm4, %v1642_v49, -inf }
 0x612   : > { %1667 = vmax.xlane.f32.xlu1 %v1666_v2  ;;  %1664 = vmax.xlane.f32.xlu0 %v1663_v3 }
 0x613   : > { %v1669_v6 = vsel %vm671_vm4, %v1645_v60, -inf  ;;  %v1866_v54 = vpop.permute.xlu1 %1865 }
 0x616   : > { %1670 = vmax.xlane.f32.xlu0 %v1669_v6 }
 0x623   : > { %1985 = vrot.lane.b32.xlu1 %v3737_v31, %s3474_s14 }
 0x627   : > { %2036 = vrot.lane.b32.xlu1 %v3729_v28, %s3474_s14 }
 0x62b   : > { %2087 = vrot.lane.b32.xlu1 %v3735_v30, %s3474_s14 }
 0x62c   : > { %1934 = vrot.lane.b32.xlu0 %v3731_v29, %s3474_s14 }
 0x62f   : > { %2085 = vrot.lane.b32.xlu1 %v3735_v30, %s3475_s18 }
 0x630   : > { %1932 = vrot.lane.b32.xlu0 %v3731_v29, %s3475_s18 }
 0x633   : > { %2212 = vrot.lane.b32.xlu1 %v3731_v29, %s3476_s11 }
 0x634   : > { %1983 = vrot.lane.b32.xlu0 %v3737_v31, %s3475_s18 }
 0x638   : > { %2034 = vrot.lane.b32.xlu0 %v3729_v28, %s3475_s18 }
 0x692   : > { %v1650_v8 = vpop.xlane.xlu0 %1649 }
 0x693   : > { %v1672_v11 = vsub.f32 %v1489_v56, %v1650_v8 }
 0x694   : > { %v1653_v15 = vpop.xlane.xlu1 %1652 }
 0x695   : > { %v1680_v16 = vmul.f32 1.442695, %v1672_v11  ;;  %v1673_v17 = vsub.f32 %v1492_v62, %v1653_v15 }
 0x697   : > { %v1656_v22 = vpop.xlane.xlu0 %1655  ;;  %v1682_v32 = vmul.f32 1.442695, %v1673_v17  ;;  %3199 = vpow2.f32 %v1680_v16 }
 0x698   : > { %v1674_v30 = vsub.f32 %v1540_v4, %v1656_v22 }
 0x699   : > { %3201 = vpow2.f32 %v1682_v32 }
 0x69a   : > { %v1662_v38 = vpop.xlane.xlu1 %1661  ;;  %v1684_v46 = vmul.f32 1.442695, %v1674_v30 }
 0x69b   : > { %v1659_v44 = vpop.xlane.xlu0 %1658  ;;  %v1676_v29 = vsub.f32 %v1591_v18, %v1662_v38 }
 0x69c   : > { %v1675_v43 = vsub.f32 %v1543_v12, %v1659_v44  ;;  %3203 = vpow2.f32 %v1684_v46 }
 0x69d   : > { %v1688_v57 = vmul.f32 1.442695, %v1676_v29 }
 0x69e   : > { %v1686_v31 = vmul.f32 1.442695, %v1675_v43 }
 0x69f   : > { %v1668_v51 = vpop.xlane.xlu1 %1667  ;;  %v1665_v28 = vpop.xlane.xlu0 %1664 }
 0x6a0   : > { %v1678_v1 = vsub.f32 %v1642_v49, %v1668_v51  ;;  %v1677_v56 = vsub.f32 %v1594_v37, %v1665_v28  ;;  %3205 = vpow2.f32 %v1686_v31 }
 0x6a1   : > { %v4009_v62 = vpop.eup %3199  ;;  %3207 = vpow2.f32 %v1688_v57 }
 0x6a2   : > { %v1690_v2 = vmul.f32 1.442695, %v1677_v56  ;;  %v1692_v3 = vmul.f32 1.442695, %v1678_v1 }
 0x6a3   : > { %v1671_v4 = vpop.xlane.xlu0 %1670  ;;  %v4011_v6 = vpop.eup %3201 }
 0x6a4   : > { %v1679_v8 = vsub.f32 %v1645_v60, %v1671_v4  ;;  %3209 = vpow2.f32 %v1690_v2  ;;  %v1720_v12 = vpack.c.bf16 %v4011_v6, %v4009_v62  ;;  %v1986_v49 = vpop.permute.xlu1 %1985 }
 0x6a5   : > { %3211 = vpow2.f32 %v1692_v3  ;;  %v1991_v29 = vsel %vm473_vm3, %v1986_v49, 0 }
 0x6a6   : > { %v1694_v18 = vmul.f32 1.442695, %v1679_v8  ;;  %2984 = vmatmul.mubr.msk.bf16.vlgmr.msra.gmra.mrb[40].mxu0 %vm671_vm4, %v1720_v12  ;;  %v4019_v37 = vpop.eup %3203 }
 0x6a7   : > { %2994 = vmatpush3.bf16.msra.mxu0 %v1819_v50  ;;  %2995 = vmatprep.mubr.msk.bf16.mxu0 %vm3465_vm2, %v4342_v20  ;;  %v1935_v50 = vpop.permute.xlu0 %1934 }
 0x6a8   : > { %3213 = vpow2.f32 %v1694_v18  ;;  %3005 = vmatprep.subr.bf16.mxu0 %v4342_v20  ;;  %v2037_v17 = vpop.permute.xlu1 %2036  ;;  %v1940_v38 = vsel %vm473_vm3, %v1935_v50, 0 }
 0x6a9   : > { %v2042_v43 = vsel %vm473_vm3, %v2037_v17, 0 }
 0x6aa   : > { %v4021_v11 = vpop.eup %3205 }
 0x6ab   : > { %v1721_v60 = vpack.c.bf16 %v4021_v11, %v4019_v37  ;;  %v4025_v15 = vpop.eup %3207  ;;  %v1933_v44 = vpop.permute.xlu0 %1932 }
 0x6ac   : > { %v2088_v46 = vpop.permute.xlu1 %2087 }
 0x6ad   : > { %2990 = vmatmul.mubr.msk.bf16.vlgmr.msra.gmra.mrb[48].mxu1 %vm671_vm4, %v1721_v60  ;;  %v2093_v28 = vsel %vm473_vm3, %v2088_v46, 0  ;;  %v468_v46 = vld [vmem:[#allocation9 + $0x30] sm:$0xff] }
 0x6ae   : > { %v4028_v16 = vpop.eup %3209  ;;  %3000 = vmatpush3.bf16.msra.mxu1 %v1866_v54  ;;  %3001 = vmatprep.mubr.msk.bf16.mxu1 %vm3465_vm2, %v4342_v20 }
 0x6af   : > { %v1722_v22 = vpack.c.bf16 %v4028_v16, %v4025_v15  ;;  %3011 = vmatprep.subr.bf16.mxu1 %v4342_v20  ;;  %v4035_v32 = vpop.eup %3211  ;;  %v1984_v31 = vpop.permute.xlu0 %1983 }
 0x6b0   : > { %v2086_v51 = vpop.permute.xlu1 %2085 }
 0x6b1   : > { %2996 = vmatmul.mubr.msk.bf16.vlgmr.msra.gmra.mrb[44].mxu0 %vm671_vm4, %v1722_v22 }
 0x6b2   : > { %v4037_v30 = vpop.eup %3213  ;;  %3006 = vmatpush3.bf16.xpose.msra.mxu0 %v1940_v38  ;;  %3007 = vmatprep.mubr.msk.bf16.mxu0 %vm3465_vm2, %v4342_v20 }
 0x6b3   : > { %v1723_v54 = vpack.c.bf16 %v4037_v30, %v4035_v32  ;;  %3017 = vmatprep.subr.bf16.mxu0 %v4342_v20  ;;  %v2035_v57 = vpop.permute.xlu0 %2034 }
 0x6b4   : > { %v2213_v1 = vpop.permute.xlu1 %2212 }
 0x6b5   : > { %3002 = vmatmul.mubr.msk.bf16.vlgmr.msra.gmra.mrb[52].mxu1 %vm671_vm4, %v1723_v54 }
 0x6b6   : > { %3013 = vmatprep.mubr.msk.bf16.mxu1 %vm3465_vm2, %v4342_v20 }
 0x6b7   : > { %3012 = vmatpush3.bf16.xpose.msra.mxu1 %v1991_v29 }
 0x6b8   : > { %3023 = vmatprep.subr.bf16.mxu1 %v4342_v20 }
 0x6b9   : > { %3008 = vmatmul.mubr.msk.bf16.vlgmr.msra.gmra.mrb[48].mxu0 %vm473_vm3, %v1933_v44 }
 0x6ba   : > { %3018 = vmatpush3.bf16.xpose.msra.mxu0 %v2042_v43  ;;  %3019 = vmatprep.mubr.msk.bf16.mxu0 %vm3465_vm2, %v4342_v20 }
 0x6bb   : > { %3029 = vmatprep.subr.bf16.mxu0 %v4342_v20 }
 0x6be   : > { %3014 = vmatmul.mubr.msk.bf16.vlgmr.msra.gmra.mrb[56].mxu1 %vm473_vm3, %v1984_v31  ;;  %v469_v31 = vld [vmem:[#allocation9 + $0x38] sm:$0xff] }
 0x6bf   : > { %3024 = vmatpush3.bf16.xpose.msra.mxu1 %v2093_v28  ;;  %3025 = vmatprep.mubr.msk.bf16.mxu1 %vm3465_vm2, %v4342_v20 }
 0x6c0   : > { %3035 = vmatprep.subr.bf16.mxu1 %v4342_v20 }
 0x6c1   : > { %3020 = vmatmul.mubr.msk.bf16.vlgmr.msra.gmra.mrb[52].mxu0 %vm473_vm3, %v2035_v57 }
 0x6c2   : > { %3030 = vmatpush3.bf16.msra.mxu0 %v2213_v1  ;;  %3031 = vmatprep.mubr.msk.bf16.mxu0 %vm3465_vm2, %v4342_v20 }
 0x6c3   : > { %3041 = vmatprep.subr.bf16.mxu0 %v4342_v20 }
 0x6c6   : > { %3026 = vmatmul.mubr.msk.bf16.vlgmr.msra.gmra.mrb[60].mxu1 %vm473_vm3, %v2086_v51 }
 0x6c7   : > { %3037 = vmatprep.mubr.msk.bf16.mxu1 %vm3465_vm2, %v4342_v20 }
 0x779   : > { %v4068_v56 = vpop.f32.mrb[40].mxu0 }
 0x77a   : > { %v2985_v2 = vpop.f32.mrb[41].mxu0 }
 0x77b   : > { %v4070_v3 = vpop.f32.mrb[42].mxu0 }
 0x77c   : > { %v2986_v4 = vpop.f32.mrb[43].mxu0 }
 0x780   : > { %v4072_v8 = vpop.f32.mrb[48].mxu1 }
 0x781   : > { %v2991_v12 = vpop.f32.mrb[49].mxu1 }
 0x782   : > { %v4074_v18 = vpop.f32.mrb[50].mxu1 }
 0x783   : > { %v2992_v49 = vpop.f32.mrb[51].mxu1 }
 0x784   : > { %v4076_v60 = vpop.f32.mrb[44].mxu0 }
 0x785   : > { %v2997_v50 = vpop.f32.mrb[45].mxu0 }
 0x786   : > { %v4078_v17 = vpop.f32.mrb[46].mxu0 }
 0x787   : > { %v2998_v22 = vpop.f32.mrb[47].mxu0 }
 0x788   : > { %v4080_v38 = vpop.f32.mrb[52].mxu1 }
 0x789   : > { %v3003_v54 = vpop.f32.mrb[53].mxu1 }
 0x78a   : > { %v4082_v44 = vpop.f32.mrb[54].mxu1 }
 0x78b   : > { %v3004_v29 = vpop.f32.mrb[55].mxu1 }
 0x78c   : > { %v1976_v43 = vpop.f32.mrb[48].mxu0 }
 0x78d   : > { %v4084_v51 = vadd.f32 %v1976_v43, %v468_v46  ;;  %v3009_v28 = vpop.f32.mrb[49].mxu0 }
 0x78e   : > { %v1979_v57 = vpop.f32.mrb[50].mxu0 }
 0x78f   : > { %v4086_v1 = vadd.f32 %v1979_v57, %v469_v31  ;;  %v3010_v2 = vpop.f32.mrb[51].mxu0  ;;  %v2136_v4 = vsel %vm671_vm4, %v4084_v51, -inf }
 0x790   : > { %2137 = vmax.xlane.f32.xlu0 %v2136_v4 }
 0x791   : > { %v2027_v12 = vpop.f32.mrb[56].mxu1  ;;  %v2139_v49 = vsel %vm671_vm4, %v4086_v1, -inf }
 0x792   : > { %v4092_v50 = vadd.f32 %v2027_v12, %v468_v46  ;;  %v3015_v22 = vpop.f32.mrb[57].mxu1  ;;  %2140 = vmax.xlane.f32.xlu1 %v2139_v49 }
 0x793   : > { %v2030_v54 = vpop.f32.mrb[58].mxu1 }
 0x794   : > { %v4094_v29 = vadd.f32 %v2030_v54, %v469_v31  ;;  %v3016_v43 = vpop.f32.mrb[59].mxu1  ;;  %v2142_v28 = vsel %vm671_vm4, %v4092_v50, -inf  ;;  %v2078_v57 = vpop.f32.mrb[52].mxu0 }
 0x795   : > { %2143 = vmax.xlane.f32.xlu0 %v2142_v28  ;;  %v4098_v2 = vadd.f32 %v2078_v57, %v468_v46  ;;  %v3021_v4 = vpop.f32.mrb[53].mxu0 }
 0x796   : > { %v2081_v20 = vpop.f32.mrb[54].mxu0  ;;  %v2145_v49 = vsel %vm671_vm4, %v4094_v29, -inf }
 0x797   : > { %v3022_v34 = vpop.f32.mrb[55].mxu0  ;;  %v2148_v12 = vsel %vm671_vm4, %v4098_v2, -inf  ;;  %v4102_v27 = vadd.f32 %v2081_v20, %v469_v31 }
 0x798   : > { %2149 = vmax.xlane.f32.xlu1 %v2148_v12 }
 0x799   : > { %2146 = vmax.xlane.f32.xlu0 %v2145_v49  ;;  %v2129_v22 = vpop.f32.mrb[60].mxu1  ;;  %v2151_v20 = vsel %vm671_vm4, %v4102_v27, -inf  ;;  %v3295_v49 = vld [vmem:[#allocation2 + $0x10] sm:$0xff] }
 0x79a   : > { %v4106_v54 = vadd.f32 %v2129_v22, %v468_v46  ;;  %v3027_v43 = vpop.f32.mrb[61].mxu1  ;;  %v3296_v46 = vld [vmem:[#allocation2 + $0x18] sm:$0xff]  ;;  %v1211_v22 = vsel %vm671_vm4, %v3916_v25, 0.0  ;;  %v1699_v25 = vsel %vm671_vm4, %v4011_v6, 0.0  ;;  %v1229_v6 = vsel %vm671_vm4, %v3943_v0, 0.0 }
 0x79b   : > { %v2132_v28 = vpop.f32.mrb[62].mxu1  ;;  %v1208_v43 = vsel %vm671_vm4, %v3914_v23, 0.0  ;;  %v1220_v23 = vsel %vm671_vm4, %v3932_v55, 0.0  ;;  %v1714_v55 = vsel %vm671_vm4, %v4035_v32, 0.0 }
 0x79c   : > { %v4108_v57 = vadd.f32 %v2132_v28, %v469_v31  ;;  %v3028_v4 = vpop.f32.mrb[63].mxu1  ;;  %v2154_v34 = vsel %vm671_vm4, %v4106_v54, -inf  ;;  %v3297_v31 = vld [vmem:[#allocation2 + $0x8] sm:$0xff]  ;;  %v1696_v28 = vsel %vm671_vm4, %v4009_v62, 0.0  ;;  %v1705_v62 = vsel %vm671_vm4, %v4021_v11, 0.0 }
 0x79d   : > { %2155 = vmax.xlane.f32.xlu1 %v2154_v34  ;;  %2152 = vmax.xlane.f32.xlu0 %v2151_v20  ;;  %v1214_v4 = vsel %vm671_vm4, %v3925_v52, 0.0  ;;  %v1702_v34 = vsel %vm671_vm4, %v4019_v37, 0.0  ;;  %v1217_v20 = vsel %vm671_vm4, %v3927_v53, 0.0  ;;  %v1226_v52 = vsel %vm671_vm4, %v3941_v63, 0.0 }
 0x79e   : > { %v2157_v12 = vsel %vm671_vm4, %v4108_v57, -inf  ;;  %v1708_v53 = vsel %vm671_vm4, %v4025_v15, 0.0  ;;  %v1223_v37 = vsel %vm671_vm4, %v3936_v58, 0.0  ;;  %v1711_v63 = vsel %vm671_vm4, %v4028_v16, 0.0 }
 0x79f   : > { %v1717_v11 = vsel %vm671_vm4, %v4037_v30, 0.0 }
 0x7a1   : > { %2158 = vmax.xlane.f32.xlu0 %v2157_v12 }
 0x7ae   : > { %2306 = vrot.lane.b32.xlu1 %v3295_v49, %s3476_s11 }
 0x7b2   : > { %2353 = vrot.lane.b32.xlu1 %v3296_v46, %s3476_s11 }
 0x7b7   : > { %2259 = vrot.lane.b32.xlu0 %v3297_v31, %s3476_s11 }
 0x7d6   : > { %1212 = vadd.xlane.f32.xlu1 %v1211_v22  ;;  %1209 = vadd.xlane.f32.xlu0 %v1208_v43 }
 0x7da   : > { %1697 = vadd.xlane.f32.xlu1 %v1696_v28  ;;  %1215 = vadd.xlane.f32.xlu0 %v1214_v4 }
 0x7de   : > { %1703 = vadd.xlane.f32.xlu1 %v1702_v34  ;;  %1218 = vadd.xlane.f32.xlu0 %v1217_v20 }
 0x7e2   : > { %1221 = vadd.xlane.f32.xlu1 %v1220_v23  ;;  %1700 = vadd.xlane.f32.xlu0 %v1699_v25 }
 0x7e6   : > { %1227 = vadd.xlane.f32.xlu1 %v1226_v52  ;;  %1706 = vadd.xlane.f32.xlu0 %v1705_v62 }
 0x7ea   : > { %1709 = vadd.xlane.f32.xlu1 %v1708_v53  ;;  %1224 = vadd.xlane.f32.xlu0 %v1223_v37 }
 0x7ee   : > { %1715 = vadd.xlane.f32.xlu1 %v1714_v55  ;;  %1230 = vadd.xlane.f32.xlu0 %v1229_v6 }
 0x7f2   : > { %1712 = vadd.xlane.f32.xlu0 %v1711_v63 }
 0x7f6   : > { %1718 = vadd.xlane.f32.xlu0 %v1717_v11 }
 0x81d   : > { %v2138_v15 = vpop.xlane.xlu0 %2137 }
 0x81e   : > { %v2160_v58 = vsub.f32 %v4084_v51, %v2138_v15  ;;  %v4355_v15 = vmov 0.0  }
 0x81f   : > { %v2141_v12 = vpop.xlane.xlu1 %2140 }
 0x820   : > { %v2168_v49 = vmul.f32 1.442695, %v2160_v58  ;;  %v2161_v32 = vsub.f32 %v4086_v1, %v2141_v12 }
 0x822   : > { %3215 = vpow2.f32 %v2168_v49  ;;  %v2170_v46 = vmul.f32 1.442695, %v2161_v32  ;;  %v2144_v0 = vpop.xlane.xlu0 %2143 }
 0x823   : > { %v2162_v31 = vsub.f32 %v4092_v50, %v2144_v0 }
 0x824   : > { %3217 = vpow2.f32 %v2170_v46 }
 0x825   : > { %v2172_v22 = vmul.f32 1.442695, %v2162_v31  ;;  %v2150_v16 = vpop.xlane.xlu1 %2149 }
 0x826   : > { %v2164_v43 = vsub.f32 %v4098_v2, %v2150_v16  ;;  %v2147_v28 = vpop.xlane.xlu0 %2146 }
 0x827   : > { %3219 = vpow2.f32 %v2172_v22  ;;  %v2163_v30 = vsub.f32 %v4094_v29, %v2147_v28 }
 0x828   : > { %v2176_v4 = vmul.f32 1.442695, %v2164_v43 }
 0x829   : > { %v2174_v51 = vmul.f32 1.442695, %v2163_v30  ;;  %v720_v30 = vsel %vm671_vm4, %v3808_v35, 0.0  ;;  %v729_v35 = vsel %vm671_vm4, %v3825_v42, 0.0 }
 0x82a   : > { %3221 = vpow2.f32 %v2176_v4  ;;  %v2156_v34 = vpop.xlane.xlu1 %2155  ;;  %v2153_v20 = vpop.xlane.xlu0 %2152 }
 0x82b   : > { %3223 = vpow2.f32 %v2174_v51  ;;  %v2166_v1 = vsub.f32 %v4106_v54, %v2156_v34  ;;  %v2165_v23 = vsub.f32 %v4102_v27, %v2153_v20  ;;  %v726_v34 = vsel %vm671_vm4, %v3823_v41, 0.0 }
 0x82c   : > { %v3216_v50 = vpop.eup %3215  ;;  %v723_v20 = vsel %vm671_vm4, %v3811_v36, 0.0  ;;  %v735_v41 = vsel %vm671_vm4, %v3821_v40, 0.0  ;;  %v741_v36 = vsel %vm671_vm4, %v3848_v61, 0.0 }
 0x82d   : > { %v2180_v25 = vmul.f32 1.442695, %v2166_v1  ;;  %v2178_v52 = vmul.f32 1.442695, %v2165_v23  ;;  %v2184_v62 = vsel %vm671_vm4, %v3216_v50, 0.0  ;;  %v732_v1 = vsel %vm671_vm4, %v3818_v39, 0.0 }
 0x82e   : > { %v3218_v2 = vpop.eup %3217  ;;  %v2159_v53 = vpop.xlane.xlu0 %2158  ;;  %2185 = vadd.xlane.f32.xlu1 %v2184_v62  ;;  %v738_v23 = vsel %vm671_vm4, %v3844_v59, 0.0 }
 0x82f   : > { %3225 = vpow2.f32 %v2180_v25  ;;  %v2167_v29 = vsub.f32 %v4108_v57, %v2159_v53  ;;  %v2187_v37 = vsel %vm671_vm4, %v3218_v2, 0.0  ;;  %v2208_v55 = vpack.c.bf16 %v3218_v2, %v3216_v50  ;;  %v2307_v54 = vpop.permute.xlu1 %2306 }
 0x830   : > { %3227 = vpow2.f32 %v2178_v52  ;;  %2188 = vadd.xlane.f32.xlu0 %v2187_v37 }
 0x831   : > { %v3220_v6 = vpop.eup %3219  ;;  %v2182_v63 = vmul.f32 1.442695, %v2167_v29  ;;  %3032 = vmatmul.mubr.msk.bf16.vlgmr.msra.gmra.mrb[56].mxu0 %vm671_vm4, %v2208_v55 }
 0x832   : > { %3042 = vmatpush3.bf16.msra.mxu0 %v2307_v54  ;;  %v2260_v27 = vpop.permute.xlu0 %2259  ;;  %v2190_v11 = vsel %vm671_vm4, %v3220_v6, 0.0  ;;  %3043 = vmatprep.mubr.msk.bf16.mxu0 %vm3465_vm2, %v4355_v15 }
 0x833   : > { %3229 = vpow2.f32 %v2182_v63  ;;  %2191 = vadd.xlane.f32.xlu1 %v2190_v11  ;;  %3036 = vmatpush3.bf16.msra.mxu1 %v2260_v27  ;;  %v2354_v46 = vpop.permute.xlu1 %2353 }
 0x834   : > { %v3222_v57 = vpop.eup %3221  ;;  %3047 = vmatprep.subr.bf16.mxu1 %v4355_v15 }
 0x835   : > { %v3224_v58 = vpop.eup %3223  ;;  %v2196_v12 = vsel %vm671_vm4, %v3222_v57, 0.0 }
 0x836   : > { %v2193_v49 = vsel %vm671_vm4, %v3224_v58, 0.0  ;;  %v2209_v32 = vpack.c.bf16 %v3224_v58, %v3220_v6 }
 0x837   : > { %2197 = vadd.xlane.f32.xlu1 %v2196_v12  ;;  %2194 = vadd.xlane.f32.xlu0 %v2193_v49 }
 0x838   : > { %3038 = vmatmul.mubr.msk.bf16.vlgmr.msra.gmra.mrb[64].mxu1 %vm671_vm4, %v2209_v32 }
 0x839   : > { %v3226_v0 = vpop.eup %3225  ;;  %3048 = vmatpush3.bf16.msra.mxu1 %v2354_v46  ;;  %3049 = vmatprep.mubr.msk.bf16.mxu1 %vm3465_vm2, %v4355_v15 }
 0x83a   : > { %v3228_v31 = vpop.eup %3227  ;;  %v2202_v22 = vsel %vm671_vm4, %v3226_v0, 0.0 }
 0x83b   : > { %2203 = vadd.xlane.f32.xlu1 %v2202_v22  ;;  %v2199_v16 = vsel %vm671_vm4, %v3228_v31, 0.0  ;;  %v2210_v43 = vpack.c.bf16 %v3228_v31, %v3222_v57 }
 0x83c   : > { %2200 = vadd.xlane.f32.xlu0 %v2199_v16 }
 0x83d   : > { %v3230_v28 = vpop.eup %3229  ;;  %3044 = vmatmul.mubr.msk.bf16.vlgmr.msra.gmra.mrb[60].mxu0 %vm671_vm4, %v2210_v43 }
 0x83e   : > { %v2205_v4 = vsel %vm671_vm4, %v3230_v28, 0.0  ;;  %v2211_v51 = vpack.c.bf16 %v3230_v28, %v3226_v0 }
 0x83f   : > { %721 = vadd.xlane.f32.xlu1 %v720_v30 }
 0x840   : > { %2206 = vadd.xlane.f32.xlu0 %v2205_v4  ;;  %3050 = vmatmul.mubr.msk.bf16.vlgmr.msra.gmra.mrb[68].mxu1 %vm671_vm4, %v2211_v51 }
 0x843   : > { %727 = vadd.xlane.f32.xlu1 %v726_v34 }
 0x844   : > { %724 = vadd.xlane.f32.xlu0 %v723_v20 }
 0x847   : > { %733 = vadd.xlane.f32.xlu1 %v732_v1 }
 0x848   : > { %730 = vadd.xlane.f32.xlu0 %v729_v35 }
 0x84b   : > { %739 = vadd.xlane.f32.xlu1 %v738_v23 }
 0x84c   : > { %736 = vadd.xlane.f32.xlu0 %v735_v41 }
 0x850   : > { %742 = vadd.xlane.f32.xlu0 %v741_v36 }
 0x863   : > { %v1213_v50 = vpop.xlane.xlu1 %1212  ;;  %v1210_v25 = vpop.xlane.xlu0 %1209 }
 0x864   : > { %3231 = vrcp.f32 %v1213_v50 }
 0x865   : > { %3233 = vrcp.f32 %v1210_v25 }
 0x867   : > { %v1698_v39 = vpop.xlane.xlu1 %1697  ;;  %v1216_v52 = vpop.xlane.xlu0 %1215 }
 0x868   : > { %3235 = vrcp.f32 %v1216_v52 }
 0x86b   : > { %v1704_v42 = vpop.xlane.xlu1 %1703  ;;  %v1219_v62 = vpop.xlane.xlu0 %1218 }
 0x86c   : > { %3237 = vrcp.f32 %v1219_v62 }
 0x86d   : > { %3239 = vrcp.f32 %v1698_v39 }
 0x86e   : > { %v3232_v59 = vpop.eup %3231 }
 0x86f   : > { %v3234_v2 = vpop.eup %3233  ;;  %v1222_v53 = vpop.xlane.xlu1 %1221  ;;  %v1433_v29 = vmul.f32 %v3232_v59, %v3977_v26 }
 0x870   : > { %v1701_v40 = vpop.xlane.xlu0 %1700  ;;  %v1432_v61 = vmul.f32 %v3234_v2, %v3975_v19 }
 0x871   : > { %3241 = vrcp.f32 %v1701_v40 }
 0x872   : > { %v1440_v37 = vpack.c.bf16 %v1433_v29, %v1432_v61  ;;  %3243 = vrcp.f32 %v1704_v42  ;;  %v3236_v54 = vpop.eup %3235 }
 0x873   : > { %v1228_v55 = vpop.xlane.xlu1 %1227  ;;  %v1434_v11 = vmul.f32 %v3236_v54, %v3979_v33 }
 0x874   : > { %v1707_v6 = vpop.xlane.xlu0 %1706  ;;  %2424 = vrot.lane.b32.xlu1 %v1440_v37, %s3477_s10 }
 0x875   : > { %3245 = vrcp.f32 %v1707_v6 }
 0x876   : > { %v3238_v63 = vpop.eup %3237  ;;  %3247 = vrcp.f32 %v1222_v53 }
 0x877   : > { %v1435_v15 = vmul.f32 %v3238_v63, %v3981_v21  ;;  %v3240_v26 = vpop.eup %3239  ;;  %v1710_v57 = vpop.xlane.xlu1 %1709 }
 0x878   : > { %v1225_v27 = vpop.xlane.xlu0 %1224  ;;  %v1920_v49 = vmul.f32 %v3240_v26, %v4068_v56 }
 0x879   : > { %3249 = vrcp.f32 %v1225_v27  ;;  %v1441_v19 = vpack.c.bf16 %v1435_v15, %v1434_v11 }
 0x87a   : > { %3251 = vrcp.f32 %v1228_v55 }
 0x87b   : > { %v3242_v58 = vpop.eup %3241  ;;  %2426 = vrot.lane.b32.xlu0 %v1441_v19, %s3477_s10  ;;  %v1716_v31 = vpop.xlane.xlu1 %1715 }
 0x87c   : > { %v1231_v12 = vpop.xlane.xlu0 %1230  ;;  %v1921_v32 = vmul.f32 %v3242_v58, %v4070_v3  ;;  %v3244_v46 = vpop.eup %3243 }
 0x87d   : > { %3253 = vrcp.f32 %v1231_v12  ;;  %v1922_v22 = vmul.f32 %v3244_v46, %v4072_v8 }
 0x87e   : > { %3255 = vrcp.f32 %v1710_v57  ;;  %v1928_v0 = vpack.c.bf16 %v1921_v32, %v1920_v49 }
 0x87f   : > { %v3246_v33 = vpop.eup %3245 }
 0x880   : > { %v1713_v21 = vpop.xlane.xlu0 %1712  ;;  %2436 = vrot.lane.b32.xlu1 %v1928_v0, %s3478_s20  ;;  %v1923_v16 = vmul.f32 %v3246_v33, %v4074_v18  ;;  %v3248_v43 = vpop.eup %3247  ;;  %v4356_v0 = vld [vmem:[#allocation14_spill] sm:$0xff] }
 0x881   : > { %3257 = vrcp.f32 %v1713_v21  ;;  %v1436_v30 = vmul.f32 %v3248_v43, %v3983_v24 }
 0x882   : > { %3259 = vrcp.f32 %v1716_v31  ;;  %v1929_v56 = vpack.c.bf16 %v1923_v16, %v1922_v22  ;;  %v3165_v16 = vld [vmem:[#allocation8] sm:$0xff]  }
 0x883   : > { %v3250_v28 = vpop.eup %3249  ;;  %3053 = vmatprep.subr.bf16.mxu0 %v3165_v16 }
 0x884   : > { %v1719_v3 = vpop.xlane.xlu0 %1718  ;;  %2438 = vrot.lane.b32.xlu1 %v1929_v56, %s3478_s20  ;;  %v1437_v4 = vmul.f32 %v3250_v28, %v3985_v45  ;;  %v3252_v51 = vpop.eup %3251  ;;  %3054 = vmatpush3.bf16.msra.mxu0 %v3165_v16 }
 0x885   : > { %3261 = vrcp.f32 %v1719_v3  ;;  %v1438_v8 = vmul.f32 %v3252_v51, %v3987_v47  ;;  %v3166_v51 = vld [vmem:[#allocation8 + $0x8] sm:$0xff]  }
 0x886   : > { %v1442_v34 = vpack.c.bf16 %v1437_v4, %v1436_v30  ;;  %3055 = vmatprep.subr.bf16.mxu0 %v3166_v51 }
 0x887   : > { %v3254_v20 = vpop.eup %3253 }
 0x888   : > { %v3256_v1 = vpop.eup %3255  ;;  %2428 = vrot.lane.b32.xlu0 %v1442_v34, %s3477_s10  ;;  %v1439_v18 = vmul.f32 %v3254_v20, %v3989_v48  ;;  %3056 = vmatpush3.bf16.msra.mxu0 %v3166_v51 }
 0x889   : > { %v4210_v41 = vmul.f32 %v3256_v1, %v4076_v60 }
 0x88a   : > { %v1443_v23 = vpack.c.bf16 %v1439_v18, %v1438_v8 }
 0x88b   : > { %v3258_v35 = vpop.eup %3257 }
 0x88c   : > { %v4213_v36 = vmul.f32 %v3258_v35, %v4078_v17  ;;  %v3260_v24 = vpop.eup %3259  ;;  %2430 = vrot.lane.b32.xlu1 %v1443_v23, %s3477_s10 }
 0x88d   : > { %v4219_v25 = vmul.f32 %v3260_v24, %v4080_v38 }
 0x88e   : > { %v1930_v45 = vpack.c.bf16 %v4213_v36, %v4210_v41 }
 0x88f   : > { %v3262_v50 = vpop.eup %3261 }
 0x890   : > { %v4222_v47 = vmul.f32 %v3262_v50, %v4082_v44 }
 0x892   : > { %v1931_v48 = vpack.c.bf16 %v4222_v47, %v4219_v25 }
 0x8bb   : > { %v2186_v60 = vpop.xlane.xlu1 %2185 }
 0x8bd   : > { %v2189_v39 = vpop.xlane.xlu0 %2188 }
 0x8c0   : > { %v2192_v17 = vpop.xlane.xlu1 %2191 }
 0x8c4   : > { %v2198_v52 = vpop.xlane.xlu1 %2197  ;;  %v2195_v42 = vpop.xlane.xlu0 %2194 }
 0x8c8   : > { %v2204_v62 = vpop.xlane.xlu1 %2203 }
 0x8c9   : > { %v2201_v59 = vpop.xlane.xlu0 %2200 }
 0x8cc   : > { %v722_v2 = vpop.xlane.xlu1 %721 }
 0x8cd   : > { %v2207_v53 = vpop.xlane.xlu0 %2206  ;;  %3263 = vrcp.f32 %v722_v2 }
 0x8d0   : > { %v728_v40 = vpop.xlane.xlu1 %727 }
 0x8d1   : > { %v725_v29 = vpop.xlane.xlu0 %724 }
 0x8d2   : > { %3265 = vrcp.f32 %v725_v29 }
 0x8d3   : > { %3267 = vrcp.f32 %v728_v40 }
 0x8d4   : > { %v734_v38 = vpop.xlane.xlu1 %733 }
 0x8d5   : > { %v731_v44 = vpop.xlane.xlu0 %730 }
 0x8d6   : > { %3269 = vrcp.f32 %v731_v44 }
 0x8d7   : > { %3271 = vrcp.f32 %v734_v38  ;;  %v3264_v55 = vpop.eup %3263 }
 0x8d8   : > { %v740_v61 = vpop.xlane.xlu1 %739  ;;  %v4227_v63 = vmul.f32 %v3264_v55, %v3871_v5 }
 0x8d9   : > { %v737_v37 = vpop.xlane.xlu0 %736 }
 0x8da   : > { %3273 = vrcp.f32 %v737_v37 }
 0x8db   : > { %3275 = vrcp.f32 %v740_v61 }
 0x8dc   : > { %v3266_v6 = vpop.eup %3265 }
 0x8dd   : > { %v743_v54 = vpop.xlane.xlu0 %742  ;;  %v4230_v27 = vmul.f32 %v3266_v6, %v3873_v7  ;;  %v3268_v11 = vpop.eup %3267 }
 0x8de   : > { %3277 = vrcp.f32 %v743_v54  ;;  %v4235_v57 = vmul.f32 %v3268_v11, %v3875_v9 }
 0x8df   : > { %v952_v15 = vpack.c.bf16 %v4230_v27, %v4227_v63  ;;  %3279 = vrcp.f32 %v2186_v60 }
 0x8e0   : > { %v3270_v26 = vpop.eup %3269  ;;  %3281 = vrcp.f32 %v2189_v39 }
 0x8e1   : > { %v4238_v19 = vmul.f32 %v3270_v26, %v3879_v13  ;;  %v3272_v58 = vpop.eup %3271  ;;  %v4357_v13 = vld [vmem:[#allocation15_spill] sm:$0xff]  ;;  %3283 = vrcp.f32 %v2192_v17 }
 0x8e2   : > { %v4243_v7 = vmul.f32 %v3272_v58, %v3877_v10  ;;  %3285 = vrcp.f32 %v2195_v42 }
 0x8e3   : > { %v953_v5 = vpack.c.bf16 %v4238_v19, %v4235_v57  ;;  %3287 = vrcp.f32 %v2198_v52 }
 0x8e4   : > { %v3274_v12 = vpop.eup %3273  ;;  %3289 = vrcp.f32 %v2201_v59 }
 0x8e5   : > { %v4246_v49 = vmul.f32 %v3274_v12, %v3881_v14  ;;  %v3276_v32 = vpop.eup %3275  ;;  %3291 = vrcp.f32 %v2204_v62 }
 0x8e6   : > { %v4251_v33 = vmul.f32 %v3276_v32, %v4356_v0  ;;  %3293 = vrcp.f32 %v2207_v53  ;;  %v2425_v55 = vpop.permute.xlu1 %2424 }
 0x8e7   : > { %v954_v46 = vpack.c.bf16 %v4246_v49, %v4243_v7  ;;  %v2458_v26 = vsel %vm473_vm3, %v952_v15, %v2425_v55 }
 0x8e8   : > { %v3278_v9 = vpop.eup %3277 }
 0x8e9   : > { %v4254_v31 = vmul.f32 %v3278_v9, %v4357_v13  ;;  %v3280_v14 = vpop.eup %3279 }
 0x8ea   : > { %v3282_v43 = vpop.eup %3281 }
 0x8eb   : > { %v955_v21 = vpack.c.bf16 %v4254_v31, %v4251_v33  ;;  %v3284_v20 = vpop.eup %3283  ;;  %v2762_v33 = vld [vmem:[%s4335_s4] ss:$0 sm:$0xff] }
 0x8ec   : > { %v3286_v8 = vpop.eup %3285 }
 0x8ed   : > { %v3288_v39 = vpop.eup %3287  ;;  %v2427_v6 = vpop.permute.xlu0 %2426 }
 0x8ee   : > { %v3290_v52 = vpop.eup %3289  ;;  %v2461_v32 = vsel %vm473_vm3, %v953_v5, %v2427_v6 }
 0x8ef   : > { %v3292_v40 = vpop.eup %3291 }
 0x8f0   : > { %v3294_v38 = vpop.eup %3293 }
 0x8f2   : > { %v2437_v54 = vpop.permute.xlu1 %2436 }
 0x8f3   : > { %v2469_v12 = vsel %vm671_vm4, %v2458_v26, %v2437_v54 }
 0x8f6   : > { %v2439_v58 = vpop.permute.xlu1 %2438 }
 0x8f7   : > { %v2471_v9 = vsel %vm671_vm4, %v2461_v32, %v2439_v58 }
 0x8fa   : > { %v2429_v11 = vpop.permute.xlu0 %2428 }
 0x8fb   : > { %v2464_v13 = vsel %vm473_vm3, %v954_v46, %v2429_v11 }
 0x904   : > { %v2252_v10 = vpop.f32.mrb[56].mxu0 }
 0x905   : > { %v3033_v22 = vpop.f32.mrb[57].mxu0  ;;  %v2408_v28 = vmul.f32 %v3280_v14, %v2252_v10 }
 0x906   : > { %v2255_v56 = vpop.f32.mrb[58].mxu0 }
 0x907   : > { %v2409_v3 = vmul.f32 %v3282_v43, %v2255_v56  ;;  %v3034_v30 = vpop.f32.mrb[59].mxu0 }
 0x909   : > { %v2416_v4 = vpack.c.bf16 %v2409_v3, %v2408_v28 }
 0x90b   : > { %v2299_v34 = vpop.f32.mrb[64].mxu1  ;;  %2448 = vrot.lane.b32.xlu0 %v2416_v4, %s3479_s12 }
 0x90c   : > { %v3039_v1 = vpop.f32.mrb[65].mxu1  ;;  %v2410_v35 = vmul.f32 %v3284_v20, %v2299_v34 }
 0x90d   : > { %v2302_v18 = vpop.f32.mrb[66].mxu1 }
 0x90e   : > { %v2411_v23 = vmul.f32 %v3286_v8, %v2302_v18  ;;  %v3040_v24 = vpop.f32.mrb[67].mxu1 }
 0x90f   : > { %2440 = vrot.lane.b32.xlu0 %v1930_v45, %s3478_s20 }
 0x910   : > { %v2417_v50 = vpack.c.bf16 %v2411_v23, %v2410_v35  ;;  %v2346_v60 = vpop.f32.mrb[60].mxu0 }
 0x911   : > { %v3045_v17 = vpop.f32.mrb[61].mxu0  ;;  %v2412_v62 = vmul.f32 %v3288_v39, %v2346_v60 }
 0x912   : > { %v2349_v42 = vpop.f32.mrb[62].mxu0  ;;  %2450 = vrot.lane.b32.xlu1 %v2417_v50, %s3479_s12 }
 0x913   : > { %v2413_v59 = vmul.f32 %v3290_v52, %v2349_v42  ;;  %v3046_v2 = vpop.f32.mrb[63].mxu0  ;;  %v2393_v53 = vpop.f32.mrb[68].mxu1 }
 0x914   : > { %v3051_v29 = vpop.f32.mrb[69].mxu1  ;;  %v2414_v37 = vmul.f32 %v3292_v40, %v2393_v53 }
 0x915   : > { %v2418_v44 = vpack.c.bf16 %v2413_v59, %v2412_v62  ;;  %v2396_v61 = vpop.f32.mrb[70].mxu1 }
 0x916   : > { %v2415_v41 = vmul.f32 %v3294_v38, %v2396_v61  ;;  %v3052_v36 = vpop.f32.mrb[71].mxu1  ;;  %2442 = vrot.lane.b32.xlu1 %v1931_v48, %s3478_s20  ;;  %v2431_v48 = vpop.permute.xlu1 %2430 }
 0x917   : > { %2452 = vrot.lane.b32.xlu0 %v2418_v44, %s3479_s12  ;;  %v2467_v14 = vsel %vm473_vm3, %v955_v21, %v2431_v48 }
 0x918   : > { %v2419_v45 = vpack.c.bf16 %v2415_v41, %v2414_v37 }
 0x91a   : > { %2454 = vrot.lane.b32.xlu1 %v2419_v45, %s3479_s12 }
 0x97d   : > { %v2449_v25 = vpop.permute.xlu0 %2448 }
 0x97e   : > { %v2478_v47 = vsel %vm2476_vm5, %v2469_v12, %v2449_v25 }
 0x97f   : > { %2489 = vst.msk [vmem:[#allocation3] sm:$0xff] %vm371_vm0, %v2478_v47 }
 0x981   : > { %v2441_v63 = vpop.permute.xlu0 %2440 }
 0x982   : > { %v2473_v57 = vsel %vm671_vm4, %v2464_v13, %v2441_v63 }
 0x984   : > { %v2451_v0 = vpop.permute.xlu1 %2450 }
 0x985   : > { %v2481_v27 = vsel %vm2476_vm5, %v2471_v9, %v2451_v0 }
 0x986   : > { %2490 = vst.msk [vmem:[#allocation3 + $0x8] sm:$0xff] %vm371_vm0, %v2481_v27  ;;  %v2493_v15 = vld [vmem:[#allocation3] sm:$0xff] }
 0x987   : > { %3057 = vmatprep.mubr.msk.bf16.mxu0 %vm371_vm0, %v2493_v15 }
 0x988   : > { %v2443_v10 = vpop.permute.xlu1 %2442 }
 0x989   : > { %v2453_v19 = vpop.permute.xlu0 %2452  ;;  %v2475_v22 = vsel %vm671_vm4, %v2467_v14, %v2443_v10 }
 0x98a   : > { %v2484_v5 = vsel %vm2476_vm5, %v2473_v57, %v2453_v19 }
 0x98b   : > { %2491 = vst.msk [vmem:[#allocation3 + $0x10] sm:$0xff] %vm371_vm0, %v2484_v5 }
 0x98c   : > { %v2455_v16 = vpop.permute.xlu1 %2454 }
 0x98d   : > { %v2487_v7 = vsel %vm2476_vm5, %v2475_v22, %v2455_v16  ;;  %v2494_v49 = vld [vmem:[#allocation3 + $0x8] sm:$0xff] }
 0x98e   : > { %2492 = vst.msk [vmem:[#allocation3 + $0x18] sm:$0xff] %vm371_vm0, %v2487_v7  ;;  %3058 = vmatmul.mubr.msk.bf16.vlgmr.msra.gmra.mrb[64].mxu0 %vm371_vm0, %v2494_v49 }
 0x992   : > { %v2495_v46 = vld [vmem:[#allocation3 + $0x10] sm:$0xff] }
 0x993   : > { %3061 = vmatprep.mubr.msk.bf16.mxu0 %vm371_vm0, %v2495_v46 }
 0x995   : > { %v2496_v43 = vld [vmem:[#allocation3 + $0x18] sm:$0xff] }
 0x996   : > { %3062 = vmatmul.mubr.msk.bf16.gmra.mrb[68].mxu0 %vm371_vm0, %v2496_v43 }
 0xa61   : > { %v3059_v31 = vpop.f32.mrb[64].mxu0 }
 0xa62   : > { %v2575_v21 = vadd.f32 %v3059_v31, %v2762_v33  ;;  %v2566_v56 = vpop.f32.mrb[65].mxu0 }
 0xa63   : > { %v2567_v28 = vadd.f32 %v2762_v33, %v2566_v56  ;;  %v3060_v3 = vpop.f32.mrb[66].mxu0 }
 0xa64   : > { %2599 = vst.msk [vmem:[%s317_s29 + $0x10] sm:$0xff] %vm371_vm0, %v2575_v21  ;;  %v2578_v30 = vadd.f32 %v3060_v3, %v2762_v33  ;;  %v2569_v4 = vpop.f32.mrb[67].mxu0 }
 0xa65   : > { %2597 = vst.msk [vmem:[%s317_s29] sm:$0xff] %vm371_vm0, %v2567_v28  ;;  %v2570_v51 = vadd.f32 %v2762_v33, %v2569_v4 }
 0xa66   : > { %2600 = vst.msk [vmem:[%s317_s29 + $0x18] sm:$0xff] %vm371_vm0, %v2578_v30 }
 0xa67   : > { %2598 = vst.msk [vmem:[%s317_s29 + $0x8] sm:$0xff] %vm371_vm0, %v2570_v51 }
 0xa69   : > { %v3063_v34 = vpop.f32.mrb[68].mxu0 }
 0xa6a   : > { %v2591_v20 = vadd.f32 %v3063_v34, %v2762_v33  ;;  %v2582_v1 = vpop.f32.mrb[69].mxu0 }
 0xa6b   : > { %v2583_v8 = vadd.f32 %v2762_v33, %v2582_v1  ;;  %v3064_v18 = vpop.f32.mrb[70].mxu0 }
 0xa6c   : > { %2603 = vst.msk [vmem:[%s317_s29 + $0x30] sm:$0xff] %vm371_vm0, %v2591_v20  ;;  %v2594_v35 = vadd.f32 %v3064_v18, %v2762_v33  ;;  %v2585_v23 = vpop.f32.mrb[71].mxu0 }
 0xa6d   : > { %2601 = vst.msk [vmem:[%s317_s29 + $0x20] sm:$0xff] %vm371_vm0, %v2583_v8  ;;  %v2586_v24 = vadd.f32 %v2762_v33, %v2585_v23 }
 0xa6e   : > { %2604 = vst.msk [vmem:[%s317_s29 + $0x38] sm:$0xff] %vm371_vm0, %v2594_v35 }
 0xa6f   : > { %2602 = vst.msk [vmem:[%s317_s29 + $0x28] sm:$0xff] %vm371_vm0, %v2586_v24 }
 0xa70 PF: > { %p18_p11 = scmp.ge.s32.totalorder %s3645_s8, 4   ;;  %s4358_s21 = smov %s3446_s22 }
 0xa71   : > { %s4359_s22 = smov %s3450_s23  ;;  %s4360_s23 = smov %s3655_s13 }
 0xa72   : > { %s4361_s24 = smov %s3645_s8  ;;  %20 = sbr.rel (!%p18_p11) target bundleno = 5 (0x5), region = 96 }
 0xa79   :  { %2627 = vsyncpa [#allocation5], 1 }
 0xa7a   :  { %2629 = vsyncpa [#allocation5 + $0x1], 1 }
 0xa7b   :  { %2630 = vsyncpa [#allocation7], 1 }
 0xa7c   :  { %2631 = vsyncpa [#allocation10], 1 }

</bundles_post_ra>
